<compile_context>
chip_gen: v5e
topology: v5e:2x2
jax: 0.10.0
libtpu: 0.0.40
codegen_flags: <defaults>
</compile_context>

<pallas_src>
import functools

import jax
import jax.numpy as jnp
from jax import lax
from jax.experimental import pallas as pl
from jax.experimental.pallas import tpu as pltpu

EPS = 1e-5


# ---------------------------------------------------------------------------
# In-kernel helper: stage 3x3 im2col taps into a VMEM scratch buffer.
# ---------------------------------------------------------------------------
def _fill_patches(patch_ref, v):
    """Write the 9 shifted taps of v (H, W, C) into patch_ref (H, W, 9*C).

    "Same" padding is realised by zeroing only the boundary slots of each tap
    (every element of patch_ref is written every call, so this is safe under
    "parallel" grid semantics and needs no step-0 init).
    """
    H, W, C = v.shape
    for kh in range(3):
        for kw in range(3):
            t = kh * 3 + kw
            dh, dw = kh - 1, kw - 1
            lo, hi = t * C, (t + 1) * C
            # halo slots whose source pixel (h+dh, w+dw) falls off the image
            if dh == -1:
                patch_ref[0:1, :, lo:hi] = jnp.zeros((1, W, C), v.dtype)
            elif dh == 1:
                patch_ref[H - 1:H, :, lo:hi] = jnp.zeros((1, W, C), v.dtype)
            if dw == -1:
                patch_ref[:, 0:1, lo:hi] = jnp.zeros((H, 1, C), v.dtype)
            elif dw == 1:
                patch_ref[:, W - 1:W, lo:hi] = jnp.zeros((H, 1, C), v.dtype)
            hs0, hs1 = max(0, dh), H + min(0, dh)
            ws0, ws1 = max(0, dw), W + min(0, dw)
            hd0, hd1 = max(0, -dh), H + min(0, -dh)
            wd0, wd1 = max(0, -dw), W + min(0, -dw)
            patch_ref[hd0:hd1, wd0:wd1, lo:hi] = v[hs0:hs1, ws0:ws1, :]


# ---------------------------------------------------------------------------
# Pass A: conv1 (3x3) + shortcut conv (1x1) + partial BN statistics.
# ---------------------------------------------------------------------------
def conv1_shortcut_kernel(x_ref, w1_ref, ws_ref, t1_ref, s_ref, st_ref,
                          patch_ref, *, use_proj):
    _, H, W, Cin = x_ref.shape
    M = H * W
    C = w1_ref.shape[1]

    xf = x_ref[0].astype(jnp.float32)                    # (H, W, Cin)

    # conv1: single MXU matmul, K = 9*Cin, bf16 operands, f32 accumulation.
    _fill_patches(patch_ref, xf)
    p = patch_ref[...].reshape(M, 9 * Cin).astype(jnp.bfloat16)
    t1 = jnp.dot(p, w1_ref[...], preferred_element_type=jnp.float32)   # (M, C)
    t1_ref[...] = t1.reshape(1, M, C)

    # shortcut: projection (1x1 conv) or identity (requires Cin == C).
    if use_proj:
        xs = xf.reshape(M, Cin).astype(jnp.bfloat16)
        s = jnp.dot(xs, ws_ref[...], preferred_element_type=jnp.float32)
    else:
        s = xf.reshape(M, Cin)
    s_ref[...] = s.reshape(1, M, C)

    # per-image partial BN statistics (reduced across images in the wrapper).
    st_ref[:, 0:1, :] = jnp.sum(t1, axis=0, keepdims=True).reshape(1, 1, C)
    st_ref[:, 1:2, :] = jnp.sum(t1 * t1, axis=0, keepdims=True).reshape(1, 1, C)
    st_ref[:, 2:3, :] = jnp.sum(s, axis=0, keepdims=True).reshape(1, 1, C)
    st_ref[:, 3:4, :] = jnp.sum(s * s, axis=0, keepdims=True).reshape(1, 1, C)


# ---------------------------------------------------------------------------
# Pass B: BN1 + ReLU + conv2 (3x3) + partial BN statistics of conv2 output.
# ---------------------------------------------------------------------------
def bn1_conv2_kernel(t1_ref, sc1_ref, b1_ref, w2_ref, t2_ref, st_ref, patch_ref):
    H, W, C9 = patch_ref.shape
    C1 = C9 // 9
    M = H * W
    C2 = w2_ref.shape[1]

    # BN1 as precomputed scale/bias, then ReLU (all f32 VPU work).
    y1 = jnp.maximum(t1_ref[0] * sc1_ref[...] + b1_ref[...], 0.0)       # (M, C1)

    # conv2: single MXU matmul, K = 9*C1.
    _fill_patches(patch_ref, y1.reshape(H, W, C1))
    p = patch_ref[...].reshape(M, C9).astype(jnp.bfloat16)
    t2 = jnp.dot(p, w2_ref[...], preferred_element_type=jnp.float32)    # (M, C2)
    t2_ref[...] = t2.reshape(1, M, C2)

    st_ref[:, 0:1, :] = jnp.sum(t2, axis=0, keepdims=True).reshape(1, 1, C2)
    st_ref[:, 1:2, :] = jnp.sum(t2 * t2, axis=0, keepdims=True).reshape(1, 1, C2)


# ---------------------------------------------------------------------------
# Pass C: BN2 + BN_shortcut + residual add + ReLU.
# ---------------------------------------------------------------------------
def bn2_add_relu_kernel(t2_ref, s_ref, sc2_ref, b2_ref, scs_ref, bs_ref, o_ref):
    _, M, C = t2_ref.shape
    y2 = t2_ref[0] * sc2_ref[...] + b2_ref[...]
    sh = s_ref[0] * scs_ref[...] + bs_ref[...]
    o_ref[...] = jnp.maximum(y2 + sh, 0.0).reshape(1, M, C)


# ---------------------------------------------------------------------------
# Wrapper
# ---------------------------------------------------------------------------
def _bn_scale_bias(ssum, ssq, gamma, beta, count):
    mean = ssum / count
    var = ssq / count - mean * mean          # biased variance (BatchNorm default)
    scale = gamma * lax.rsqrt(var + EPS)
    bias = beta - mean * scale
    return scale, bias


def basic_block(x_nchw, params, stride=1):
    # TODO(synk): stride != 1 (spatial downsampling) is not implemented.
    assert stride == 1
    N, Cin, H, W = x_nchw.shape
    C = params["w1"].shape[2]
    M = H * W
    use_proj = (stride != 1) or (Cin != C)
    count = float(N * H * W)
    f32 = jnp.float32

    # NCHW -> NHWC; ship activations as bf16, weights as bf16 with the 9 taps
    # flattened into the contraction dimension (matches the im2col layout).
    x = jnp.transpose(x_nchw, (0, 2, 3, 1)).astype(jnp.bfloat16)
    w1f = params["w1"].reshape(9 * Cin, C).astype(jnp.bfloat16)
    w2f = params["w2"].reshape(9 * C, C).astype(jnp.bfloat16)
    wsf = params["ws"].astype(jnp.bfloat16)

    cparams = pltpu.CompilerParams(
        dimension_semantics=("parallel",),
        vmem_limit_bytes=48 * 1024 * 1024,   # explicit; per-step working set is tiny
    )

    # ---- pass A ----
    t1, s, st_a = pl.pallas_call(
        functools.partial(conv1_shortcut_kernel, use_proj=use_proj),
        grid=(N,),
        in_specs=[
            pl.BlockSpec((1, H, W, Cin), lambda i: (i, 0, 0, 0)),
            pl.BlockSpec((9 * Cin, C), lambda i: (0, 0)),
            pl.BlockSpec((Cin, C), lambda i: (0, 0)),
        ],
        out_specs=[
            pl.BlockSpec((1, M, C), lambda i: (i, 0, 0)),
            pl.BlockSpec((1, M, C), lambda i: (i, 0, 0)),
            pl.BlockSpec((1, 4, C), lambda i: (i, 0, 0)),
        ],
        out_shape=[
            jax.ShapeDtypeStruct((N, M, C), f32),
            jax.ShapeDtypeStruct((N, M, C), f32),
            jax.ShapeDtypeStruct((N, 4, C), f32),
        ],
        scratch_shapes=[pltpu.VMEM((H, W, 9 * Cin), f32)],
        compiler_params=cparams,
    )(x, w1f, wsf)

    st_a = jnp.sum(st_a, axis=0)                                   # (4, C)
    scale1, bias1 = _bn_scale_bias(st_a[0:1], st_a[1:2],
                                   params["g1"], params["b1"], count)
    if use_proj:
        scale_s, bias_s = _bn_scale_bias(st_a[2:3], st_a[3:4],
                                         params["gs"], params["bs"], count)
    else:
        scale_s = jnp.ones((1, C), f32)
        bias_s = jnp.zeros((1, C), f32)

    # ---- pass B ----
    t2, st_b = pl.pallas_call(
        bn1_conv2_kernel,
        grid=(N,),
        in_specs=[
            pl.BlockSpec((1, M, C), lambda i: (i, 0, 0)),
            pl.BlockSpec((1, C), lambda i: (0, 0)),
            pl.BlockSpec((1, C), lambda i: (0, 0)),
            pl.BlockSpec((9 * C, C), lambda i: (0, 0)),
        ],
        out_specs=[
            pl.BlockSpec((1, M, C), lambda i: (i, 0, 0)),
            pl.BlockSpec((1, 2, C), lambda i: (i, 0, 0)),
        ],
        out_shape=[
            jax.ShapeDtypeStruct((N, M, C), f32),
            jax.ShapeDtypeStruct((N, 2, C), f32),
        ],
        scratch_shapes=[pltpu.VMEM((H, W, 9 * C), f32)],
        compiler_params=cparams,
    )(t1, scale1, bias1, w2f)

    st_b = jnp.sum(st_b, axis=0)
    scale2, bias2 = _bn_scale_bias(st_b[0:1], st_b[1:2],
                                   params["g2"], params["b2"], count)

    # ---- pass C ----
    out = pl.pallas_call(
        bn2_add_relu_kernel,
        grid=(N,),
        in_specs=[
            pl.BlockSpec((1, M, C), lambda i: (i, 0, 0)),
            pl.BlockSpec((1, M, C), lambda i: (i, 0, 0)),
            pl.BlockSpec((1, C), lambda i: (0, 0)),
            pl.BlockSpec((1, C), lambda i: (0, 0)),
            pl.BlockSpec((1, C), lambda i: (0, 0)),
            pl.BlockSpec((1, C), lambda i: (0, 0)),
        ],
        out_specs=pl.BlockSpec((1, M, C), lambda i: (i, 0, 0)),
        out_shape=jax.ShapeDtypeStruct((N, M, C), f32),
        compiler_params=cparams,
    )(t2, s, scale2, bias2, scale_s, bias_s)

    out = out.reshape(N, H, W, C)
    return jnp.transpose(out, (0, 3, 1, 2))                        # NHWC -> NCHW


# ---------------------------------------------------------------------------
# Parameters & pure-JAX reference (same math / same bf16 MXU operand precision)
# ---------------------------------------------------------------------------
def init_params(key, inp, oup):
    ks = jax.random.split(key, 9)
    w1 = 0.1 * jax.random.normal(ks[0], (9, inp, oup), jnp.float32)
    w2 = 0.1 * jax.random.normal(ks[1], (9, oup, oup), jnp.float32)
    ws = 0.1 * jax.random.normal(ks[2], (inp, oup), jnp.float32)
    g1 = 1.0 + 0.1 * jax.random.normal(ks[3], (1, oup), jnp.float32)
    b1 = 0.1 * jax.random.normal(ks[4], (1, oup), jnp.float32)
    g2 = 1.0 + 0.1 * jax.random.normal(ks[5], (1, oup), jnp.float32)
    b2 = 0.1 * jax.random.normal(ks[6], (1, oup), jnp.float32)
    gs = 1.0 + 0.1 * jax.random.normal(ks[7], (1, oup), jnp.float32)
    bs = 0.1 * jax.random.normal(ks[8], (1, oup), jnp.float32)
    return dict(w1=w1, w2=w2, ws=ws, g1=g1, b1=b1, g2=g2, b2=b2, gs=gs, bs=bs)


def reference(x_nchw, params):
    N, Cin, H, W = x_nchw.shape
    Cout = params["w1"].shape[2]

    def conv3x3(x, w):
        wk = w.reshape(3, 3, -1, Cout).astype(jnp.bfloat16)
        return lax.conv_general_dilated(
            x.astype(jnp.bfloat16), wk, (1, 1), "SAME",
            dimension_numbers=("NCHW", "HWIO", "NCHW"),
            preferred_element_type=jnp.float32)

    def bn(x, g, b):
        mean = jnp.mean(x, axis=(0, 2, 3), keepdims=True)
        var = jnp.mean((x - mean) ** 2, axis=(0, 2, 3), keepdims=True)
        return (x - mean) * lax.rsqrt(var + EPS) * g.reshape(1, -1, 1, 1) \
            + b.reshape(1, -1, 1, 1)

    y = jnp.maximum(bn(conv3x3(x_nchw, params["w1"]),
                       params["g1"], params["b1"]), 0.0)
    y = bn(conv3x3(y, params["w2"]), params["g2"], params["b2"])
    ws = params["ws"].reshape(1, 1, Cin, Cout).astype(jnp.bfloat16)
    sc = lax.conv_general_dilated(
        x_nchw.astype(jnp.bfloat16), ws, (1, 1), "VALID",
        dimension_numbers=("NCHW", "HWIO", "NCHW"),
        preferred_element_type=jnp.float32)
    sc = bn(sc, params["gs"], params["bs"])
    return jnp.maximum(y + sc, 0.0)


if __name__ == "__main__":
    key = jax.random.PRNGKey(0)
    kx, kp = jax.random.split(key)

    N, INP, OUP, H, W = 2, 4, 8, 16, 16          # inp != oup -> projection shortcut
    x = jax.random.normal(kx, (N, INP, H, W), jnp.float32)
    params = init_params(kp, INP, OUP)

    out = jax.block_until_ready(basic_block(x, params, stride=1))
    ref = jax.block_until_ready(reference(x, params))

    assert out.shape == (N, OUP, H, W)
    assert bool(jnp.all(jnp.isfinite(out)))
    assert jnp.allclose(out, ref, atol=2e-3, rtol=2e-3), \
        f"max abs err {float(jnp.max(jnp.abs(out - ref)))}"

    print("KERNEL_OK")
</pallas_src>

<mosaic_0001>
module attributes {stable_mosaic.version = 11 : i64} {
  func.func @conv1_shortcut_kernel(%arg0: i32, %arg1: memref<1x16x16x4xbf16, #tpu.memory_space<vmem>>, %arg2: memref<36x8xbf16, #tpu.memory_space<vmem>>, %arg3: memref<4x8xbf16, #tpu.memory_space<vmem>>, %arg4: memref<1x256x8xf32, #tpu.memory_space<vmem>>, %arg5: memref<1x256x8xf32, #tpu.memory_space<vmem>>, %arg6: memref<1x4x8xf32, #tpu.memory_space<vmem>>, %arg7: memref<16x16x36xf32, #tpu.memory_space<vmem>>) attributes {dimension_semantics = [#tpu.dimension_semantics<parallel>], iteration_bounds = array<i64: 2>, scalar_prefetch = 0 : i64, scratch_operands = 1 : i64, tpu.core_type = #tpu.core_type<tc>, window_params = [{transform_indices = @transform_0, window_bounds = array<i64: 1, 16, 16, 4>}, {pipeline_mode = #tpu.pipeline_mode<synchronous>, transform_indices = @transform_1, window_bounds = array<i64: 36, 8>}, {pipeline_mode = #tpu.pipeline_mode<synchronous>, transform_indices = @transform_2, window_bounds = array<i64: 4, 8>}, {transform_indices = @transform_3, window_bounds = array<i64: 1, 256, 8>}, {transform_indices = @transform_4, window_bounds = array<i64: 1, 256, 8>}, {transform_indices = @transform_5, window_bounds = array<i64: 1, 4, 8>}]} {
    %c0 = arith.constant 0 : index
    %c0_0 = arith.constant 0 : index
    %c0_1 = arith.constant 0 : index
    %c0_2 = arith.constant 0 : index
    %0 = vector.load %arg1[%c0, %c0_0, %c0_1, %c0_2] : memref<1x16x16x4xbf16, #tpu.memory_space<vmem>>, vector<1x16x16x4xbf16>
    %1 = vector.shape_cast %0 : vector<1x16x16x4xbf16> to vector<16x16x4xbf16>
    %2 = arith.extf %1 : vector<16x16x4xbf16> to vector<16x16x4xf32>
    %cst = arith.constant 0.000000e+00 : f32
    %3 = vector.broadcast %cst : f32 to vector<1x16x4xf32>
    %c0_3 = arith.constant 0 : index
    %c0_4 = arith.constant 0 : index
    %c0_5 = arith.constant 0 : index
    %4 = vector.load %arg7[%c0_3, %c0_4, %c0_5] : memref<16x16x36xf32, #tpu.memory_space<vmem>>, vector<1x16x4xf32>
    tpu.vector_store %arg7[%c0_3, %c0_4, %c0_5], %3 {strides = array<i32>} : memref<16x16x36xf32, #tpu.memory_space<vmem>>, vector<1x16x4xf32>,
    %cst_6 = arith.constant 0.000000e+00 : f32
    %5 = vector.broadcast %cst_6 : f32 to vector<16x1x4xf32>
    %c0_7 = arith.constant 0 : index
    %c0_8 = arith.constant 0 : index
    %c0_9 = arith.constant 0 : index
    %6 = vector.load %arg7[%c0_7, %c0_8, %c0_9] : memref<16x16x36xf32, #tpu.memory_space<vmem>>, vector<16x1x4xf32>
    tpu.vector_store %arg7[%c0_7, %c0_8, %c0_9], %5 {strides = array<i32>} : memref<16x16x36xf32, #tpu.memory_space<vmem>>, vector<16x1x4xf32>,
    %7 = vector.extract_strided_slice %2 {offsets = [0, 0, 0], sizes = [15, 15, 4], strides = [1, 1, 1]} : vector<16x16x4xf32> to vector<15x15x4xf32>
    %c1 = arith.constant 1 : index
    %c1_10 = arith.constant 1 : index
    %c0_11 = arith.constant 0 : index
    %8 = vector.load %arg7[%c1, %c1_10, %c0_11] : memref<16x16x36xf32, #tpu.memory_space<vmem>>, vector<15x15x4xf32>
    tpu.vector_store %arg7[%c1, %c1_10, %c0_11], %7 {strides = array<i32>} : memref<16x16x36xf32, #tpu.memory_space<vmem>>, vector<15x15x4xf32>,
    %cst_12 = arith.constant 0.000000e+00 : f32
    %9 = vector.broadcast %cst_12 : f32 to vector<1x16x4xf32>
    %c0_13 = arith.constant 0 : index
    %c0_14 = arith.constant 0 : index
    %c4 = arith.constant 4 : index
    %10 = vector.load %arg7[%c0_13, %c0_14, %c4] : memref<16x16x36xf32, #tpu.memory_space<vmem>>, vector<1x16x4xf32>
    tpu.vector_store %arg7[%c0_13, %c0_14, %c4], %9 {strides = array<i32>} : memref<16x16x36xf32, #tpu.memory_space<vmem>>, vector<1x16x4xf32>,
    %11 = vector.extract_strided_slice %2 {offsets = [0, 0, 0], sizes = [15, 16, 4], strides = [1, 1, 1]} : vector<16x16x4xf32> to vector<15x16x4xf32>
    %c1_15 = arith.constant 1 : index
    %c0_16 = arith.constant 0 : index
    %c4_17 = arith.constant 4 : index
    %12 = vector.load %arg7[%c1_15, %c0_16, %c4_17] : memref<16x16x36xf32, #tpu.memory_space<vmem>>, vector<15x16x4xf32>
    tpu.vector_store %arg7[%c1_15, %c0_16, %c4_17], %11 {strides = array<i32>} : memref<16x16x36xf32, #tpu.memory_space<vmem>>, vector<15x16x4xf32>,
    %cst_18 = arith.constant 0.000000e+00 : f32
    %13 = vector.broadcast %cst_18 : f32 to vector<1x16x4xf32>
    %c0_19 = arith.constant 0 : index
    %c0_20 = arith.constant 0 : index
    %c8 = arith.constant 8 : index
    %14 = vector.load %arg7[%c0_19, %c0_20, %c8] : memref<16x16x36xf32, #tpu.memory_space<vmem>>, vector<1x16x4xf32>
    tpu.vector_store %arg7[%c0_19, %c0_20, %c8], %13 {strides = array<i32>} : memref<16x16x36xf32, #tpu.memory_space<vmem>>, vector<1x16x4xf32>,
    %cst_21 = arith.constant 0.000000e+00 : f32
    %15 = vector.broadcast %cst_21 : f32 to vector<16x1x4xf32>
    %c0_22 = arith.constant 0 : index
    %c15 = arith.constant 15 : index
    %c8_23 = arith.constant 8 : index
    %16 = vector.load %arg7[%c0_22, %c15, %c8_23] : memref<16x16x36xf32, #tpu.memory_space<vmem>>, vector<16x1x4xf32>
    tpu.vector_store %arg7[%c0_22, %c15, %c8_23], %15 {strides = array<i32>} : memref<16x16x36xf32, #tpu.memory_space<vmem>>, vector<16x1x4xf32>,
    %17 = vector.extract_strided_slice %2 {offsets = [0, 1, 0], sizes = [15, 15, 4], strides = [1, 1, 1]} : vector<16x16x4xf32> to vector<15x15x4xf32>
    %c1_24 = arith.constant 1 : index
    %c0_25 = arith.constant 0 : index
    %c8_26 = arith.constant 8 : index
    %18 = vector.load %arg7[%c1_24, %c0_25, %c8_26] : memref<16x16x36xf32, #tpu.memory_space<vmem>>, vector<15x15x4xf32>
    tpu.vector_store %arg7[%c1_24, %c0_25, %c8_26], %17 {strides = array<i32>} : memref<16x16x36xf32, #tpu.memory_space<vmem>>, vector<15x15x4xf32>,
    %cst_27 = arith.constant 0.000000e+00 : f32
    %19 = vector.broadcast %cst_27 : f32 to vector<16x1x4xf32>
    %c0_28 = arith.constant 0 : index
    %c0_29 = arith.constant 0 : index
    %c12 = arith.constant 12 : index
    %20 = vector.load %arg7[%c0_28, %c0_29, %c12] : memref<16x16x36xf32, #tpu.memory_space<vmem>>, vector<16x1x4xf32>
    tpu.vector_store %arg7[%c0_28, %c0_29, %c12], %19 {strides = array<i32>} : memref<16x16x36xf32, #tpu.memory_space<vmem>>, vector<16x1x4xf32>,
    %21 = vector.extract_strided_slice %2 {offsets = [0, 0, 0], sizes = [16, 15, 4], strides = [1, 1, 1]} : vector<16x16x4xf32> to vector<16x15x4xf32>
    %c0_30 = arith.constant 0 : index
    %c1_31 = arith.constant 1 : index
    %c12_32 = arith.constant 12 : index
    %22 = vector.load %arg7[%c0_30, %c1_31, %c12_32] : memref<16x16x36xf32, #tpu.memory_space<vmem>>, vector<16x15x4xf32>
    tpu.vector_store %arg7[%c0_30, %c1_31, %c12_32], %21 {strides = array<i32>} : memref<16x16x36xf32, #tpu.memory_space<vmem>>, vector<16x15x4xf32>,
    %c0_33 = arith.constant 0 : index
    %c0_34 = arith.constant 0 : index
    %c16 = arith.constant 16 : index
    %23 = vector.load %arg7[%c0_33, %c0_34, %c16] : memref<16x16x36xf32, #tpu.memory_space<vmem>>, vector<16x16x4xf32>
    tpu.vector_store %arg7[%c0_33, %c0_34, %c16], %2 {strides = array<i32>} : memref<16x16x36xf32, #tpu.memory_space<vmem>>, vector<16x16x4xf32>,
    %cst_35 = arith.constant 0.000000e+00 : f32
    %24 = vector.broadcast %cst_35 : f32 to vector<16x1x4xf32>
    %c0_36 = arith.constant 0 : index
    %c15_37 = arith.constant 15 : index
    %c20 = arith.constant 20 : index
    %25 = vector.load %arg7[%c0_36, %c15_37, %c20] : memref<16x16x36xf32, #tpu.memory_space<vmem>>, vector<16x1x4xf32>
    tpu.vector_store %arg7[%c0_36, %c15_37, %c20], %24 {strides = array<i32>} : memref<16x16x36xf32, #tpu.memory_space<vmem>>, vector<16x1x4xf32>,
    %26 = vector.extract_strided_slice %2 {offsets = [0, 1, 0], sizes = [16, 15, 4], strides = [1, 1, 1]} : vector<16x16x4xf32> to vector<16x15x4xf32>
    %c0_38 = arith.constant 0 : index
    %c0_39 = arith.constant 0 : index
    %c20_40 = arith.constant 20 : index
    %27 = vector.load %arg7[%c0_38, %c0_39, %c20_40] : memref<16x16x36xf32, #tpu.memory_space<vmem>>, vector<16x15x4xf32>
    tpu.vector_store %arg7[%c0_38, %c0_39, %c20_40], %26 {strides = array<i32>} : memref<16x16x36xf32, #tpu.memory_space<vmem>>, vector<16x15x4xf32>,
    %cst_41 = arith.constant 0.000000e+00 : f32
    %28 = vector.broadcast %cst_41 : f32 to vector<1x16x4xf32>
    %c15_42 = arith.constant 15 : index
    %c0_43 = arith.constant 0 : index
    %c24 = arith.constant 24 : index
    %29 = vector.load %arg7[%c15_42, %c0_43, %c24] : memref<16x16x36xf32, #tpu.memory_space<vmem>>, vector<1x16x4xf32>
    tpu.vector_store %arg7[%c15_42, %c0_43, %c24], %28 {strides = array<i32>} : memref<16x16x36xf32, #tpu.memory_space<vmem>>, vector<1x16x4xf32>,
    %cst_44 = arith.constant 0.000000e+00 : f32
    %30 = vector.broadcast %cst_44 : f32 to vector<16x1x4xf32>
    %c0_45 = arith.constant 0 : index
    %c0_46 = arith.constant 0 : index
    %c24_47 = arith.constant 24 : index
    %31 = vector.load %arg7[%c0_45, %c0_46, %c24_47] : memref<16x16x36xf32, #tpu.memory_space<vmem>>, vector<16x1x4xf32>
    tpu.vector_store %arg7[%c0_45, %c0_46, %c24_47], %30 {strides = array<i32>} : memref<16x16x36xf32, #tpu.memory_space<vmem>>, vector<16x1x4xf32>,
    %32 = vector.extract_strided_slice %2 {offsets = [1, 0, 0], sizes = [15, 15, 4], strides = [1, 1, 1]} : vector<16x16x4xf32> to vector<15x15x4xf32>
    %c0_48 = arith.constant 0 : index
    %c1_49 = arith.constant 1 : index
    %c24_50 = arith.constant 24 : index
    %33 = vector.load %arg7[%c0_48, %c1_49, %c24_50] : memref<16x16x36xf32, #tpu.memory_space<vmem>>, vector<15x15x4xf32>
    tpu.vector_store %arg7[%c0_48, %c1_49, %c24_50], %32 {strides = array<i32>} : memref<16x16x36xf32, #tpu.memory_space<vmem>>, vector<15x15x4xf32>,
    %cst_51 = arith.constant 0.000000e+00 : f32
    %34 = vector.broadcast %cst_51 : f32 to vector<1x16x4xf32>
    %c15_52 = arith.constant 15 : index
    %c0_53 = arith.constant 0 : index
    %c28 = arith.constant 28 : index
    %35 = vector.load %arg7[%c15_52, %c0_53, %c28] : memref<16x16x36xf32, #tpu.memory_space<vmem>>, vector<1x16x4xf32>
    tpu.vector_store %arg7[%c15_52, %c0_53, %c28], %34 {strides = array<i32>} : memref<16x16x36xf32, #tpu.memory_space<vmem>>, vector<1x16x4xf32>,
    %36 = vector.extract_strided_slice %2 {offsets = [1, 0, 0], sizes = [15, 16, 4], strides = [1, 1, 1]} : vector<16x16x4xf32> to vector<15x16x4xf32>
    %c0_54 = arith.constant 0 : index
    %c0_55 = arith.constant 0 : index
    %c28_56 = arith.constant 28 : index
    %37 = vector.load %arg7[%c0_54, %c0_55, %c28_56] : memref<16x16x36xf32, #tpu.memory_space<vmem>>, vector<15x16x4xf32>
    tpu.vector_store %arg7[%c0_54, %c0_55, %c28_56], %36 {strides = array<i32>} : memref<16x16x36xf32, #tpu.memory_space<vmem>>, vector<15x16x4xf32>,
    %cst_57 = arith.constant 0.000000e+00 : f32
    %38 = vector.broadcast %cst_57 : f32 to vector<1x16x4xf32>
    %c15_58 = arith.constant 15 : index
    %c0_59 = arith.constant 0 : index
    %c32 = arith.constant 32 : index
    %39 = vector.load %arg7[%c15_58, %c0_59, %c32] : memref<16x16x36xf32, #tpu.memory_space<vmem>>, vector<1x16x4xf32>
    tpu.vector_store %arg7[%c15_58, %c0_59, %c32], %38 {strides = array<i32>} : memref<16x16x36xf32, #tpu.memory_space<vmem>>, vector<1x16x4xf32>,
    %cst_60 = arith.constant 0.000000e+00 : f32
    %40 = vector.broadcast %cst_60 : f32 to vector<16x1x4xf32>
    %c0_61 = arith.constant 0 : index
    %c15_62 = arith.constant 15 : index
    %c32_63 = arith.constant 32 : index
    %41 = vector.load %arg7[%c0_61, %c15_62, %c32_63] : memref<16x16x36xf32, #tpu.memory_space<vmem>>, vector<16x1x4xf32>
    tpu.vector_store %arg7[%c0_61, %c15_62, %c32_63], %40 {strides = array<i32>} : memref<16x16x36xf32, #tpu.memory_space<vmem>>, vector<16x1x4xf32>,
    %42 = vector.extract_strided_slice %2 {offsets = [1, 1, 0], sizes = [15, 15, 4], strides = [1, 1, 1]} : vector<16x16x4xf32> to vector<15x15x4xf32>
    %c0_64 = arith.constant 0 : index
    %c0_65 = arith.constant 0 : index
    %c32_66 = arith.constant 32 : index
    %43 = vector.load %arg7[%c0_64, %c0_65, %c32_66] : memref<16x16x36xf32, #tpu.memory_space<vmem>>, vector<15x15x4xf32>
    tpu.vector_store %arg7[%c0_64, %c0_65, %c32_66], %42 {strides = array<i32>} : memref<16x16x36xf32, #tpu.memory_space<vmem>>, vector<15x15x4xf32>,
    %c0_67 = arith.constant 0 : index
    %c0_68 = arith.constant 0 : index
    %c0_69 = arith.constant 0 : index
    %44 = vector.load %arg7[%c0_67, %c0_68, %c0_69] : memref<16x16x36xf32, #tpu.memory_space<vmem>>, vector<16x16x36xf32>
    %45 = vector.shape_cast %44 : vector<16x16x36xf32> to vector<256x36xf32>
    %46 = arith.truncf %45 : vector<256x36xf32> to vector<256x36xbf16>
    %c0_70 = arith.constant 0 : index
    %c0_71 = arith.constant 0 : index
    %47 = vector.load %arg2[%c0_70, %c0_71] : memref<36x8xbf16, #tpu.memory_space<vmem>>, vector<36x8xbf16>
    %cst_72 = arith.constant dense<0.000000e+00> : vector<256x8xf32>
    %48 = tpu.matmul %46, %47, %cst_72 {dimension_numbers = #tpu.dot_dimension_numbers<[1], [0], [0], [1], [0, 0, 1, 1], [], []>} : vector<256x36xbf16>, vector<36x8xbf16>, vector<256x8xf32> -> vector<256x8xf32>
    %49 = vector.shape_cast %48 : vector<256x8xf32> to vector<1x256x8xf32>
    %c0_73 = arith.constant 0 : index
    %c0_74 = arith.constant 0 : index
    %c0_75 = arith.constant 0 : index
    %50 = vector.load %arg4[%c0_73, %c0_74, %c0_75] : memref<1x256x8xf32, #tpu.memory_space<vmem>>, vector<1x256x8xf32>
    tpu.vector_store %arg4[%c0_73, %c0_74, %c0_75], %49 {strides = array<i32>} : memref<1x256x8xf32, #tpu.memory_space<vmem>>, vector<1x256x8xf32>,
    %51 = vector.shape_cast %2 : vector<16x16x4xf32> to vector<256x4xf32>
    %52 = arith.truncf %51 : vector<256x4xf32> to vector<256x4xbf16>
    %c0_76 = arith.constant 0 : index
    %c0_77 = arith.constant 0 : index
    %53 = vector.load %arg3[%c0_76, %c0_77] : memref<4x8xbf16, #tpu.memory_space<vmem>>, vector<4x8xbf16>
    %cst_78 = arith.constant dense<0.000000e+00> : vector<256x8xf32>
    %54 = tpu.matmul %52, %53, %cst_78 {dimension_numbers = #tpu.dot_dimension_numbers<[1], [0], [0], [1], [0, 0, 1, 1], [], []>} : vector<256x4xbf16>, vector<4x8xbf16>, vector<256x8xf32> -> vector<256x8xf32>
    %55 = vector.shape_cast %54 : vector<256x8xf32> to vector<1x256x8xf32>
    %c0_79 = arith.constant 0 : index
    %c0_80 = arith.constant 0 : index
    %c0_81 = arith.constant 0 : index
    %56 = vector.load %arg5[%c0_79, %c0_80, %c0_81] : memref<1x256x8xf32, #tpu.memory_space<vmem>>, vector<1x256x8xf32>
    tpu.vector_store %arg5[%c0_79, %c0_80, %c0_81], %55 {strides = array<i32>} : memref<1x256x8xf32, #tpu.memory_space<vmem>>, vector<1x256x8xf32>,
    %cst_82 = arith.constant dense<0.000000e+00> : vector<8xf32>
    %57 = vector.multi_reduction <add>, %48, %cst_82 [0] : vector<256x8xf32> to vector<8xf32>
    %58 = vector.shape_cast %57 : vector<8xf32> to vector<1x8xf32>
    %59 = vector.shape_cast %58 : vector<1x8xf32> to vector<1x1x8xf32>
    %c0_83 = arith.constant 0 : index
    %c0_84 = arith.constant 0 : index
    %c0_85 = arith.constant 0 : index
    %60 = vector.load %arg6[%c0_83, %c0_84, %c0_85] : memref<1x4x8xf32, #tpu.memory_space<vmem>>, vector<1x1x8xf32>
    tpu.vector_store %arg6[%c0_83, %c0_84, %c0_85], %59 {strides = array<i32>} : memref<1x4x8xf32, #tpu.memory_space<vmem>>, vector<1x1x8xf32>,
    %61 = arith.mulf %48, %48 : vector<256x8xf32>
    %cst_86 = arith.constant dense<0.000000e+00> : vector<8xf32>
    %62 = vector.multi_reduction <add>, %61, %cst_86 [0] : vector<256x8xf32> to vector<8xf32>
    %63 = vector.shape_cast %62 : vector<8xf32> to vector<1x8xf32>
    %64 = vector.shape_cast %63 : vector<1x8xf32> to vector<1x1x8xf32>
    %c0_87 = arith.constant 0 : index
    %c1_88 = arith.constant 1 : index
    %c0_89 = arith.constant 0 : index
    %65 = vector.load %arg6[%c0_87, %c1_88, %c0_89] : memref<1x4x8xf32, #tpu.memory_space<vmem>>, vector<1x1x8xf32>
    tpu.vector_store %arg6[%c0_87, %c1_88, %c0_89], %64 {strides = array<i32>} : memref<1x4x8xf32, #tpu.memory_space<vmem>>, vector<1x1x8xf32>,
    %cst_90 = arith.constant dense<0.000000e+00> : vector<8xf32>
    %66 = vector.multi_reduction <add>, %54, %cst_90 [0] : vector<256x8xf32> to vector<8xf32>
    %67 = vector.shape_cast %66 : vector<8xf32> to vector<1x8xf32>
    %68 = vector.shape_cast %67 : vector<1x8xf32> to vector<1x1x8xf32>
    %c0_91 = arith.constant 0 : index
    %c2 = arith.constant 2 : index
    %c0_92 = arith.constant 0 : index
    %69 = vector.load %arg6[%c0_91, %c2, %c0_92] : memref<1x4x8xf32, #tpu.memory_space<vmem>>, vector<1x1x8xf32>
    tpu.vector_store %arg6[%c0_91, %c2, %c0_92], %68 {strides = array<i32>} : memref<1x4x8xf32, #tpu.memory_space<vmem>>, vector<1x1x8xf32>,
    %70 = arith.mulf %54, %54 : vector<256x8xf32>
    %cst_93 = arith.constant dense<0.000000e+00> : vector<8xf32>
    %71 = vector.multi_reduction <add>, %70, %cst_93 [0] : vector<256x8xf32> to vector<8xf32>
    %72 = vector.shape_cast %71 : vector<8xf32> to vector<1x8xf32>
    %73 = vector.shape_cast %72 : vector<1x8xf32> to vector<1x1x8xf32>
    %c0_94 = arith.constant 0 : index
    %c3 = arith.constant 3 : index
    %c0_95 = arith.constant 0 : index
    %74 = vector.load %arg6[%c0_94, %c3, %c0_95] : memref<1x4x8xf32, #tpu.memory_space<vmem>>, vector<1x1x8xf32>
    tpu.vector_store %arg6[%c0_94, %c3, %c0_95], %73 {strides = array<i32>} : memref<1x4x8xf32, #tpu.memory_space<vmem>>, vector<1x1x8xf32>,
    return
  }
  func.func @transform_0(%arg0: i32) -> (i32, i32, i32, i32) {
    %c0_i32 = arith.constant 0 : i32
    %c0_i32_0 = arith.constant 0 : i32
    %c0_i32_1 = arith.constant 0 : i32
    %c0_i32_2 = arith.constant 0 : i32
    return %arg0, %c0_i32, %c0_i32_0, %c0_i32_1 : i32, i32, i32, i32
  }
  func.func @transform_1(%arg0: i32) -> (i32, i32) {
    %c0_i32 = arith.constant 0 : i32
    %c0_i32_0 = arith.constant 0 : i32
    %c0_i32_1 = arith.constant 0 : i32
    return %c0_i32, %c0_i32_0 : i32, i32
  }
  func.func @transform_2(%arg0: i32) -> (i32, i32) {
    %c0_i32 = arith.constant 0 : i32
    %c0_i32_0 = arith.constant 0 : i32
    %c0_i32_1 = arith.constant 0 : i32
    return %c0_i32, %c0_i32_0 : i32, i32
  }
  func.func @transform_3(%arg0: i32) -> (i32, i32, i32) {
    %c0_i32 = arith.constant 0 : i32
    %c0_i32_0 = arith.constant 0 : i32
    %c0_i32_1 = arith.constant 0 : i32
    return %arg0, %c0_i32, %c0_i32_0 : i32, i32, i32
  }
  func.func @transform_4(%arg0: i32) -> (i32, i32, i32) {
    %c0_i32 = arith.constant 0 : i32
    %c0_i32_0 = arith.constant 0 : i32
    %c0_i32_1 = arith.constant 0 : i32
    return %arg0, %c0_i32, %c0_i32_0 : i32, i32, i32
  }
  func.func @transform_5(%arg0: i32) -> (i32, i32, i32) {
    %c0_i32 = arith.constant 0 : i32
    %c0_i32_0 = arith.constant 0 : i32
    %c0_i32_1 = arith.constant 0 : i32
    return %arg0, %c0_i32, %c0_i32_0 : i32, i32, i32
  }
}

</mosaic_0001>

<bundles_post_ra>
// kernel: tpu_custom_call.1
= control target key start
LH: loop header
LB: loop body
LE: loop exit
PB: predicated region body
PF: predicated region fallthrough
CT: control target
= control target key end

     0   :  { %11 = vsyncpa [#allocation4], 0  ;;  %s5302_s0 = inlined_call_operand.vmem [shape: bf16[2,16,16,4], index: 0, kind: input, shape index: {}]   ;;  %s5303_s1 = inlined_call_operand.vmem [shape: bf16[36,8], index: 1, kind: input, shape index: {}]   ;;  %s5304_s2 = inlined_call_operand.vmem [shape: bf16[4,8], index: 2, kind: input, shape index: {}]   ;;  %s5305_s3 = inlined_call_operand.vmem [shape: f32[2,256,8], index: 3, kind: output, shape index: {0}]   ;;  %s5306_s4 = inlined_call_operand.vmem [shape: f32[2,256,8], index: 4, kind: output, shape index: {1}]   ;;  %s5307_s5 = inlined_call_operand.hbm [shape: f32[2,4,8], index: 5, kind: output, shape index: {2}]  }
   0x1   :  { %13 = vsyncpa [#allocation4 + $0x1], 0  ;;  %s3328_s18 = smov 0   ;;  %s3330_s19 = smov 0  }
   0x2   :  { %s3332_s20 = smov 0   ;;  %s3334_s21 = smov 0  }
   0x3 LB: > { %s3349_s22 = sadd.s32 4294967295, %s3287_s21   ;;  %s2408_s23 = sadd.s32 4294967294, %s3287_s21   ;;  %s3287_s21 = sphi %s3334_s21, %s5313_s21   ;;  %s3283_s20 = sphi %s3332_s20, %s5312_s20   ;;  %s3279_s19 = sphi %s3330_s19, %s5311_s19   ;;  %s3275_s18 = sphi %s3328_s18, %s5310_s18  }
   0x4   : > { %s3353_s24 = sadd.s32 1, %s3287_s21   ;;  %s146_s25 = sadd.s32 1, %s3283_s20 }
   0x5   : > { %s143_s26 = ssub.s32 %s3287_s21, %s3353_s24  ;;  %p156_p0 = scmp.ne.s32.totalorder %s3283_s20, %s3279_s19 }
   0x6   : > { %p144_p1 = scmp.eq.s32.totalorder %s143_s26, 0  ;;  %p157_p2 = scmp.eq.s32.totalorder %s3349_s22, 1 }
   0x7   : > { %p162_p3 = scmp.ne.s32.totalorder %s3279_s19, %s3275_s18  ;;  %p163_p4 = scmp.eq.s32.totalorder %s2408_s23, 1 }
   0x8   : > { %s3364_s27 = scalar_select %p144_p1, %s3283_s20, %s146_s25  }
   0x9   : > { %p3366_p5 = por %p157_p2, %p156_p0  ;;  %p3370_p6 = por %p163_p4, %p162_p3 }
   0xa   : > { %p2411_p7 = scmp.ge.s32.totalorder %s3287_s21, 1  ;;  %p195_p8 = scmp.lt.s32.totalorder %s3287_s21, 3 }
   0xc   : > { %p196_p9 = pnand %p2411_p7, %p195_p8 }
   0xd   : > { %p233_p10 = scmp.lt.s32.totalorder (!%p196_p9), %s3349_s22, 1  ;;  %s3289_s10 = smov (!%p196_p9), 4  }
   0xe   : > { %199 = sbr.rel (%p196_p9) target bundleno = 669 (0x29d), region = 32  ;;  %s3290_s11 = smov (!%p196_p9), 8  }
   0xf   : > { %s3291_s12 = smov (!%p196_p9), 12   ;;  %s3293_s13 = smov (!%p196_p9), 16  }
  0x10   : > { %s3294_s14 = smov (!%p196_p9), 20   ;;  %s3295_s15 = smov (!%p196_p9), 24  }
  0x11   : > { %s3296_s16 = smov (!%p196_p9), 28   ;;  %s3297_s25 = smov (!%p196_p9), 32  }
  0x12   : > { %s2460_s26 = sshll.u32 (!%p196_p9), %s3349_s22, 2 }
  0x13   : > { %s3378_s30 = scalar_select %p233_p10, %s3349_s22, 1  ;;  %vm313_vm0 = vcmask 31744   ;;  %vm335_vm1 = vcmask 30720   ;;  %v3292_v60 = vmov 0.0   ;;  %vm365_vm2 = vcmask 64544  }
  0x14   : > { %314 = vst.msk [vmem:[#allocation2] sm:$0xff] %vm313_vm0, %v3292_v60  ;;  %vm521_vm3 = vcmask 90176   ;;  %vm316_vm4 = vcmask 24576   ;;  %vm628_vm5 = vcmask 97345   ;;  %vm518_vm6 = vcmask 97344   ;;  %s2294_s8 = scalar_lea.hbm %s5307_s5, %s2460_s26 }
  0x15   : > { %s2463_s6 = sshll.u32 %s3378_s30, 7  ;;  %315 = vst.msk [vmem:[#allocation2 + $0x8] sm:$0xff] %vm313_vm0, %v3292_v60  ;;  %vm659_vm7 = vcmask 122976   ;;  %vm1607_vm8 = vcmask 1041408   ;;  %vm776_vm9 = vcmask 129120   ;;  %vm774_vm10 = vcmask 130144  }
  0x16   : > { %s3384_s9 = scalar_lea.vmem %s5302_s0, %s2463_s6  ;;  %367 = vst.msk [vmem:[#allocation2 + $0x8] sm:$0xff] %vm365_vm2, %v3292_v60  ;;  %vm904_vm11 = vcmask 162944   ;;  %vm937_vm12 = vcmask 188576   ;;  %vm1050_vm13 = vcmask 195745   ;;  %vm1052_vm14 = vcmask 195744  }
  0x17   : > { %v3387_v0 = vld [vmem:[%s3384_s9] sm:$0xff]   ;;  %v3390_v1 = vld [vmem:[%s3384_s9 + $0x10] sm:$0xff]   ;;  %v3397_v6 = vld [vmem:[%s3384_s9 + $0x8] sm:$0xff]   ;;  %318 = vst.msk [vmem:[#allocation2 + $0x10] sm:$0x1] %vm316_vm4, %v3292_v60  ;;  %vm1088_vm15 = vcmask 221376  }
  0x18   : > { %v2470_v2 = vunpack.c.l.bf16 %v3387_v0  ;;  %v2471_v3 = vunpack.c.h.bf16 %v3387_v0  ;;  %v2478_v4 = vunpack.c.l.bf16 %v3390_v1  ;;  %v2479_v5 = vunpack.c.h.bf16 %v3390_v1  ;;  %v2534_v7 = vld [vmem:[%s3384_s9 + $0x18] sm:$0xff]   ;;  %v3413_v10 = vld [vmem:[%s3384_s9 + $0x20] sm:$0xff]   ;;  %v3428_v17 = vld [vmem:[%s3384_s9 + $0x28] sm:$0xff]   ;;  %317 = vst.msk [vmem:[#allocation2] sm:$0x1] %vm316_vm4, %v3292_v60 }
  0x19   : > { %v2474_v11 = vunpack.c.l.bf16 %v3397_v6  ;;  %v2475_v12 = vunpack.c.h.bf16 %v3397_v6  ;;  %v3421_v13 = vunpack.c.l.bf16 %v2534_v7  ;;  %v3423_v14 = vunpack.c.h.bf16 %v2534_v7  ;;  %v3447_v21 = vld [vmem:[%s3384_s9 + $0x30] sm:$0xff]   ;;  %v3450_v22 = vld [vmem:[%s3384_s9 + $0x38] sm:$0xff]   ;;  %v2539_v30 = vld [vmem:[%s3384_s9 + $0x40] sm:$0xff]   ;;  %319 = vst.msk [vmem:[#allocation2 + $0x20] sm:$0x1] %vm316_vm4, %v3292_v60 }
  0x1a   : > { %v3404_v8 = vpack.i.bf16 %v2471_v3, %v2470_v2  ;;  %v3410_v9 = vpack.i.bf16 %v2479_v5, %v2478_v4  ;;  %v2486_v15 = vunpack.c.l.bf16 %v3413_v10  ;;  %v2487_v16 = vunpack.c.h.bf16 %v3413_v10  ;;  %v3484_v33 = vld [vmem:[%s3384_s9 + $0x48] sm:$0xff]   ;;  %v3487_v34 = vld [vmem:[%s3384_s9 + $0x50] sm:$0xff]   ;;  %v3512_v42 = vld [vmem:[%s3384_s9 + $0x58] sm:$0xff]   ;;  %336 = vst.msk [vmem:[#allocation2 + $0x19] sm:$0x7f] %vm335_vm1, %v2471_v3 }
  0x1b   : > { %v3440_v19 = vpack.i.bf16 %v2475_v12, %v2474_v11  ;;  %v3444_v20 = vpack.i.bf16 %v3423_v14, %v3421_v13  ;;  %v2490_v23 = vunpack.c.l.bf16 %v3428_v17  ;;  %v2491_v24 = vunpack.c.h.bf16 %v3428_v17  ;;  %v3525_v45 = vld [vmem:[%s3384_s9 + $0x60] sm:$0xff]   ;;  %v3528_v46 = vld [vmem:[%s3384_s9 + $0x68] sm:$0xff]   ;;  %v3549_v54 = vld [vmem:[%s3384_s9 + $0x70] sm:$0xff]   ;;  %334 = vst.msk [vmem:[#allocation2 + $0x11] sm:$0xff] %vm313_vm0, %v2470_v2 }
  0x1c   : > { %2600 = vrot.lane.b32.xlu0 %v3404_v8, %s3289_s10  ;;  %2610 = vrot.lane.b32.xlu1 %v3410_v9, %s3289_s10  ;;  %v3434_v18 = vpack.i.bf16 %v2487_v16, %v2486_v15  ;;  %v2494_v25 = vunpack.c.l.bf16 %v3447_v21  ;;  %v2495_v26 = vunpack.c.h.bf16 %v3447_v21  ;;  %v2498_v27 = vunpack.c.l.bf16 %v3450_v22  ;;  %337 = vst.msk [vmem:[#allocation2 + $0x21] sm:$0xff] %vm313_vm0, %v2474_v11  ;;  %v2546_v63 = vld [vmem:[%s3384_s9 + $0x78] sm:$0xff]  }
  0x1d   : > { %v2499_v28 = vunpack.c.h.bf16 %v3450_v22  ;;  %v3468_v29 = vpack.i.bf16 %v2491_v24, %v2490_v23  ;;  %v3491_v35 = vunpack.c.l.bf16 %v2539_v30  ;;  %v3493_v36 = vunpack.c.h.bf16 %v2539_v30  ;;  %338 = vst.msk [vmem:[#allocation2 + $0x29] sm:$0x7f] %vm335_vm1, %v2475_v12 }
  0x1e   : > { %2620 = vrot.lane.b32.xlu2 %v3434_v18, %s3289_s10  ;;  %v3475_v31 = vpack.i.bf16 %v2495_v26, %v2494_v25  ;;  %v3500_v37 = vunpack.c.l.bf16 %v3484_v33  ;;  %v3503_v38 = vunpack.c.h.bf16 %v3484_v33  ;;  %v2510_v39 = vunpack.c.l.bf16 %v3487_v34  ;;  %339 = vst.msk [vmem:[#allocation2 + $0x31] sm:$0xff] %vm313_vm0, %v2478_v4 }
  0x1f   : > { %v3481_v32 = vpack.i.bf16 %v2499_v28, %v2498_v27  ;;  %v2511_v40 = vunpack.c.h.bf16 %v3487_v34  ;;  %v3509_v41 = vpack.i.bf16 %v3493_v36, %v3491_v35  ;;  %v2514_v47 = vunpack.c.l.bf16 %v3512_v42  ;;  %340 = vst.msk [vmem:[#allocation2 + $0x39] sm:$0x7f] %vm335_vm1, %v2479_v5 }
  0x20   : > { %v3516_v43 = vpack.i.bf16 %v3503_v38, %v3500_v37  ;;  %v2515_v48 = vunpack.c.h.bf16 %v3512_v42  ;;  %v2518_v49 = vunpack.c.l.bf16 %v3525_v45  ;;  %v2519_v50 = vunpack.c.h.bf16 %v3525_v45  ;;  %341 = vst.msk [vmem:[#allocation2 + $0x41] sm:$0xff] %vm313_vm0, %v3421_v13 }
  0x21   : > { %v3522_v44 = vpack.i.bf16 %v2511_v40, %v2510_v39  ;;  %v2522_v51 = vunpack.c.l.bf16 %v3528_v46  ;;  %v2523_v52 = vunpack.c.h.bf16 %v3528_v46  ;;  %v2526_v57 = vunpack.c.l.bf16 %v3549_v54  ;;  %342 = vst.msk [vmem:[#allocation2 + $0x49] sm:$0x7f] %vm335_vm1, %v3423_v14 }
  0x22   : > { %v3546_v53 = vpack.i.bf16 %v2515_v48, %v2514_v47  ;;  %v3555_v55 = vpack.i.bf16 %v2519_v50, %v2518_v49  ;;  %v2527_v58 = vunpack.c.h.bf16 %v3549_v54  ;;  %343 = vst.msk [vmem:[#allocation2 + $0x51] sm:$0xff] %vm313_vm0, %v2486_v15  ;;  %v2530_v3 = vunpack.c.l.bf16 %v2546_v63 }
  0x23   : > { %v3561_v56 = vpack.i.bf16 %v2523_v52, %v2522_v51  ;;  %344 = vst.msk [vmem:[#allocation2 + $0x59] sm:$0x7f] %vm335_vm1, %v2487_v16  ;;  %v2531_v4 = vunpack.c.h.bf16 %v2546_v63 }
  0x24   : > { %2605 = vrot.lane.b32.xlu0 %v3440_v19, %s3289_s10  ;;  %2615 = vrot.lane.b32.xlu1 %v3444_v20, %s3289_s10  ;;  %v3575_v59 = vpack.i.bf16 %v2527_v58, %v2526_v57  ;;  %345 = vst.msk [vmem:[#allocation2 + $0x61] sm:$0xff] %vm313_vm0, %v2490_v23 }
  0x25   : > { %346 = vst.msk [vmem:[#allocation2 + $0x69] sm:$0x7f] %vm335_vm1, %v2491_v24  ;;  %v3727_v15 = vpack.i.bf16 %v2531_v4, %v2530_v3 }
  0x26   : > { %2625 = vrot.lane.b32.xlu2 %v3468_v29, %s3289_s10  ;;  %347 = vst.msk [vmem:[#allocation2 + $0x71] sm:$0xff] %vm313_vm0, %v2494_v25 }
  0x27   : > { %348 = vst.msk [vmem:[#allocation2 + $0x79] sm:$0x7f] %vm335_vm1, %v2495_v26 }
  0x28   : > { %349 = vst.msk [vmem:[#allocation2 + $0x81] sm:$0xff] %vm313_vm0, %v2498_v27 }
  0x29   : > { %350 = vst.msk [vmem:[#allocation2 + $0x89] sm:$0x7f] %vm335_vm1, %v2499_v28 }
  0x2a   : > { %351 = vst.msk [vmem:[#allocation2 + $0x91] sm:$0xff] %vm313_vm0, %v3491_v35 }
  0x2b   : > { %352 = vst.msk [vmem:[#allocation2 + $0x99] sm:$0x7f] %vm335_vm1, %v3493_v36 }
  0x2c   : > { %2630 = vrot.lane.b32.xlu0 %v3475_v31, %s3289_s10  ;;  %2635 = vrot.lane.b32.xlu1 %v3481_v32, %s3289_s10  ;;  %353 = vst.msk [vmem:[#allocation2 + $0xa1] sm:$0xff] %vm313_vm0, %v3500_v37 }
  0x2d   : > { %354 = vst.msk [vmem:[#allocation2 + $0xa9] sm:$0x7f] %vm335_vm1, %v3503_v38 }
  0x2e   : > { %2640 = vrot.lane.b32.xlu2 %v3509_v41, %s3289_s10  ;;  %355 = vst.msk [vmem:[#allocation2 + $0xb1] sm:$0xff] %vm313_vm0, %v2510_v39 }
  0x2f   : > { %356 = vst.msk [vmem:[#allocation2 + $0xb9] sm:$0x7f] %vm335_vm1, %v2511_v40 }
  0x30   : > { %357 = vst.msk [vmem:[#allocation2 + $0xc1] sm:$0xff] %vm313_vm0, %v2514_v47 }
  0x31   : > { %358 = vst.msk [vmem:[#allocation2 + $0xc9] sm:$0x7f] %vm335_vm1, %v2515_v48 }
  0x32   : > { %359 = vst.msk [vmem:[#allocation2 + $0xd1] sm:$0xff] %vm313_vm0, %v2518_v49 }
  0x33   : > { %360 = vst.msk [vmem:[#allocation2 + $0xd9] sm:$0x7f] %vm335_vm1, %v2519_v50 }
  0x34   : > { %2645 = vrot.lane.b32.xlu0 %v3516_v43, %s3289_s10  ;;  %2650 = vrot.lane.b32.xlu1 %v3522_v44, %s3289_s10  ;;  %361 = vst.msk [vmem:[#allocation2 + $0xe1] sm:$0xff] %vm313_vm0, %v2522_v51 }
  0x35   : > { %362 = vst.msk [vmem:[#allocation2 + $0xe9] sm:$0x7f] %vm335_vm1, %v2523_v52 }
  0x36   : > { %2655 = vrot.lane.b32.xlu2 %v3546_v53, %s3289_s10  ;;  %363 = vst.msk [vmem:[#allocation2 + $0xf1] sm:$0xff] %vm313_vm0, %v2526_v57 }
  0x37   : > { %364 = vst.msk [vmem:[#allocation2 + $0xf9] sm:$0x7f] %vm335_vm1, %v2527_v58  ;;  %vm1085_vm1 = vcmask 228544  }
  0x38   : > { %320 = vst.msk [vmem:[#allocation2 + $0x30] sm:$0x1] %vm316_vm4, %v3292_v60 }
  0x39   : > { %321 = vst.msk [vmem:[#allocation2 + $0x40] sm:$0x1] %vm316_vm4, %v3292_v60 }
  0x3a   : > { %322 = vst.msk [vmem:[#allocation2 + $0x50] sm:$0x1] %vm316_vm4, %v3292_v60 }
  0x3b   : > { %323 = vst.msk [vmem:[#allocation2 + $0x60] sm:$0x1] %vm316_vm4, %v3292_v60 }
  0x3c   : > { %2660 = vrot.lane.b32.xlu0 %v3555_v55, %s3289_s10  ;;  %2665 = vrot.lane.b32.xlu1 %v3561_v56, %s3289_s10  ;;  %324 = vst.msk [vmem:[#allocation2 + $0x70] sm:$0x1] %vm316_vm4, %v3292_v60 }
  0x3d   : > { %325 = vst.msk [vmem:[#allocation2 + $0x80] sm:$0x1] %vm316_vm4, %v3292_v60 }
  0x3e   : > { %2670 = vrot.lane.b32.xlu2 %v3575_v59, %s3289_s10  ;;  %326 = vst.msk [vmem:[#allocation2 + $0x90] sm:$0x1] %vm316_vm4, %v3292_v60 }
  0x3f   : > { %327 = vst.msk [vmem:[#allocation2 + $0xa0] sm:$0x1] %vm316_vm4, %v3292_v60 }
  0x40   : > { %328 = vst.msk [vmem:[#allocation2 + $0xb0] sm:$0x1] %vm316_vm4, %v3292_v60 }
  0x41   : > { %329 = vst.msk [vmem:[#allocation2 + $0xc0] sm:$0x1] %vm316_vm4, %v3292_v60 }
  0x42   : > { %330 = vst.msk [vmem:[#allocation2 + $0xd0] sm:$0x1] %vm316_vm4, %v3292_v60 }
  0x43   : > { %331 = vst.msk [vmem:[#allocation2 + $0xe0] sm:$0x1] %vm316_vm4, %v3292_v60 }
  0x44   : > { %2675 = vrot.lane.b32.xlu0 %v3404_v8, %s3290_s11  ;;  %2680 = vrot.lane.b32.xlu1 %v3440_v19, %s3290_s11  ;;  %332 = vst.msk [vmem:[#allocation2 + $0xf0] sm:$0x1] %vm316_vm4, %v3292_v60  ;;  %vm1352_vm4 = vcmask 286976  }
  0x45   : > { %520 = vst.msk [vmem:[#allocation2 + $0x8] sm:$0xff] %vm518_vm6, %v3292_v60 }
  0x46   : > { %2685 = vrot.lane.b32.xlu2 %v3410_v9, %s3290_s11  ;;  %366 = vst.msk [vmem:[#allocation2] sm:$0xff] %vm365_vm2, %v3292_v60 }
  0x47   : > { %522 = vst.msk [vmem:[#allocation2 + $0xf] sm:$0x1] %vm521_vm3, %v3292_v60 }
  0x48   : > { %519 = vst.msk [vmem:[#allocation2] sm:$0xff] %vm518_vm6, %v3292_v60 }
  0x49   : > { %660 = vst.msk [vmem:[#allocation2] sm:$0x1] %vm659_vm7, %v3292_v60 }
  0x4c   : > { %2690 = vrot.lane.b32.xlu0 %v3444_v20, %s3290_s11  ;;  %2695 = vrot.lane.b32.xlu1 %v3434_v18, %s3290_s11 }
  0x4e   : > { %2700 = vrot.lane.b32.xlu2 %v3468_v29, %s3290_s11 }
  0x54   : > { %2705 = vrot.lane.b32.xlu0 %v3475_v31, %s3290_s11  ;;  %2710 = vrot.lane.b32.xlu1 %v3481_v32, %s3290_s11 }
  0x56   : > { %2715 = vrot.lane.b32.xlu2 %v3509_v41, %s3290_s11 }
  0x5c   : > { %2720 = vrot.lane.b32.xlu0 %v3516_v43, %s3290_s11  ;;  %2725 = vrot.lane.b32.xlu1 %v3522_v44, %s3290_s11 }
  0x5e   : > { %2730 = vrot.lane.b32.xlu2 %v3546_v53, %s3290_s11 }
  0x64   : > { %2735 = vrot.lane.b32.xlu0 %v3555_v55, %s3290_s11  ;;  %2740 = vrot.lane.b32.xlu1 %v3561_v56, %s3290_s11 }
  0x66   : > { %2745 = vrot.lane.b32.xlu2 %v3575_v59, %s3290_s11  ;;  %s2298_s11 = sshll.u32 %s2294_s8, 4  ;;  %s2299_s11 = int_to_ptr.hbm [resolvable:$true] %s2298_s11 }
  0x6c   : > { %2750 = vrot.lane.b32.xlu0 %v3404_v8, %s3291_s12  ;;  %2755 = vrot.lane.b32.xlu1 %v3440_v19, %s3291_s12 }
  0x6e   : > { %2760 = vrot.lane.b32.xlu2 %v3410_v9, %s3291_s12 }
  0x74   : > { %2765 = vrot.lane.b32.xlu0 %v3444_v20, %s3291_s12  ;;  %2770 = vrot.lane.b32.xlu1 %v3434_v18, %s3291_s12 }
  0x76   : > { %2775 = vrot.lane.b32.xlu2 %v3468_v29, %s3291_s12 }
  0x78   : > { %v3647_v61 = vpop.permute.xlu2 %2620 }
  0x79   : > { %v2623_v1 = vunpack.i.h.bf16 %v3647_v61 }
  0x7b   : > { %497 = vst.msk [vmem:[#allocation2 + $0x58] sm:$0xff] %vm365_vm2, %v2623_v1 }
  0x7c   : > { %2780 = vrot.lane.b32.xlu0 %v3475_v31, %s3291_s12  ;;  %2785 = vrot.lane.b32.xlu1 %v3481_v32, %s3291_s12  ;;  %527 = vst.msk [vmem:[#allocation2 + $0x5f] sm:$0x1] %vm521_vm3, %v3292_v60 }
  0x7e   : > { %2790 = vrot.lane.b32.xlu2 %v3509_v41, %s3291_s12 }
  0x80   : > { %v3675_v62 = vpop.permute.xlu2 %2625 }
  0x81   : > { %v2628_v5 = vunpack.i.h.bf16 %v3675_v62 }
  0x83   : > { %499 = vst.msk [vmem:[#allocation2 + $0x68] sm:$0xff] %vm365_vm2, %v2628_v5 }
  0x84   : > { %2795 = vrot.lane.b32.xlu0 %v3516_v43, %s3291_s12  ;;  %2800 = vrot.lane.b32.xlu1 %v3522_v44, %s3291_s12  ;;  %528 = vst.msk [vmem:[#allocation2 + $0x6f] sm:$0x1] %vm521_vm3, %v3292_v60 }
  0x86   : > { %2805 = vrot.lane.b32.xlu2 %v3546_v53, %s3291_s12 }
  0x88   : > { %v3709_v2 = vpop.permute.xlu2 %2640 }
  0x89   : > { %v2643_v16 = vunpack.i.h.bf16 %v3709_v2 }
  0x8b   : > { %505 = vst.msk [vmem:[#allocation2 + $0x98] sm:$0xff] %vm365_vm2, %v2643_v16 }
  0x8c   : > { %2810 = vrot.lane.b32.xlu0 %v3555_v55, %s3291_s12  ;;  %2815 = vrot.lane.b32.xlu1 %v3561_v56, %s3291_s12  ;;  %531 = vst.msk [vmem:[#allocation2 + $0x9f] sm:$0x1] %vm521_vm3, %v3292_v60 }
  0x8e   : > { %v2601_v7 = vpop.permute.xlu0 %2600  ;;  %v3721_v10 = vpop.permute.xlu1 %2610  ;;  %2820 = vrot.lane.b32.xlu2 %v3575_v59, %s3291_s12 }
  0x8f   : > { %v2603_v11 = vunpack.i.h.bf16 %v2601_v7  ;;  %v2613_v12 = vunpack.i.h.bf16 %v3721_v10  ;;  %v2602_v45 = vunpack.i.l.bf16 %v2601_v7 }
  0x90   : > { %v3737_v17 = vpop.permute.xlu2 %2655 }
  0x91   : > { %489 = vst.msk [vmem:[#allocation2 + $0x18] sm:$0xff] %vm365_vm2, %v2603_v11  ;;  %v2658_v21 = vunpack.i.h.bf16 %v3737_v17 }
  0x92   : > { %523 = vst.msk [vmem:[#allocation2 + $0x1f] sm:$0x1] %vm521_vm3, %v3292_v60 }
  0x93   : > { %493 = vst.msk [vmem:[#allocation2 + $0x38] sm:$0xff] %vm365_vm2, %v2613_v12 }
  0x94   : > { %525 = vst.msk [vmem:[#allocation2 + $0x3f] sm:$0x1] %vm521_vm3, %v3292_v60  ;;  %2825 = vrot.lane.b32.xlu0 %v3727_v15, %s3291_s12  ;;  %2830 = vrot.lane.b32.xlu1 %v3404_v8, %s3293_s13 }
  0x95   : > { %511 = vst.msk [vmem:[#allocation2 + $0xc8] sm:$0xff] %vm365_vm2, %v2658_v21  ;;  %v2612_v21 = vunpack.i.l.bf16 %v3721_v10  ;;  %v2627_v10 = vunpack.i.l.bf16 %v3675_v62 }
  0x96   : > { %v3748_v22 = vpop.permute.xlu0 %2605  ;;  %v3750_v23 = vpop.permute.xlu1 %2615  ;;  %2835 = vrot.lane.b32.xlu2 %v3440_v19, %s3293_s13  ;;  %534 = vst.msk [vmem:[#allocation2 + $0xcf] sm:$0x1] %vm521_vm3, %v3292_v60 }
  0x97   : > { %v2608_v24 = vunpack.i.h.bf16 %v3748_v22  ;;  %v2618_v25 = vunpack.i.h.bf16 %v3750_v23  ;;  %488 = vst.msk [vmem:[#allocation2 + $0x10] sm:$0xff] %vm365_vm2, %v2602_v45  ;;  %v2607_v4 = vunpack.i.l.bf16 %v3748_v22  ;;  %v2617_v22 = vunpack.i.l.bf16 %v3750_v23 }
  0x98   : > { %v3764_v26 = vpop.permute.xlu2 %2670  ;;  %492 = vst.msk [vmem:[#allocation2 + $0x30] sm:$0xff] %vm365_vm2, %v2612_v21  ;;  %v2657_v45 = vunpack.i.l.bf16 %v3737_v17 }
  0x99   : > { %491 = vst.msk [vmem:[#allocation2 + $0x28] sm:$0xff] %vm365_vm2, %v2608_v24  ;;  %v2673_v27 = vunpack.i.h.bf16 %v3764_v26  ;;  %v2622_v24 = vunpack.i.l.bf16 %v3647_v61  ;;  %v2672_v17 = vunpack.i.l.bf16 %v3764_v26 }
  0x9a   : > { %524 = vst.msk [vmem:[#allocation2 + $0x2f] sm:$0x1] %vm521_vm3, %v3292_v60 }
  0x9b   : > { %495 = vst.msk [vmem:[#allocation2 + $0x48] sm:$0xff] %vm365_vm2, %v2618_v25 }
  0x9c   : > { %526 = vst.msk [vmem:[#allocation2 + $0x4f] sm:$0x1] %vm521_vm3, %v3292_v60  ;;  %2840 = vrot.lane.b32.xlu0 %v3410_v9, %s3293_s13  ;;  %2845 = vrot.lane.b32.xlu1 %v3444_v20, %s3293_s13 }
  0x9d   : > { %517 = vst.msk [vmem:[#allocation2 + $0xf8] sm:$0xff] %vm365_vm2, %v2673_v27 }
  0x9e   : > { %v3775_v28 = vpop.permute.xlu0 %2630  ;;  %v3777_v30 = vpop.permute.xlu1 %2635  ;;  %537 = vst.msk [vmem:[#allocation2 + $0xff] sm:$0x1] %vm521_vm3, %v3292_v60  ;;  %2850 = vrot.lane.b32.xlu2 %v3434_v18, %s3293_s13 }
  0x9f   : > { %v2633_v39 = vunpack.i.h.bf16 %v3775_v28  ;;  %v2638_v40 = vunpack.i.h.bf16 %v3777_v30  ;;  %490 = vst.msk [vmem:[#allocation2 + $0x20] sm:$0xff] %vm365_vm2, %v2607_v4  ;;  %v2632_v23 = vunpack.i.l.bf16 %v3775_v28  ;;  %v2637_v27 = vunpack.i.l.bf16 %v3777_v30 }
  0xa0   : > { %v3847_v57 = vpop.permute.xlu2 %2685  ;;  %494 = vst.msk [vmem:[#allocation2 + $0x40] sm:$0xff] %vm365_vm2, %v2617_v22  ;;  %v2924_v4 = vpack.i.bf16 %v3491_v35, %v3421_v13 }
  0xa1   : > { %501 = vst.msk [vmem:[#allocation2 + $0x78] sm:$0xff] %vm365_vm2, %v2633_v39 }
  0xa2   : > { %529 = vst.msk [vmem:[#allocation2 + $0x7f] sm:$0x1] %vm521_vm3, %v3292_v60 }
  0xa3   : > { %503 = vst.msk [vmem:[#allocation2 + $0x88] sm:$0xff] %vm365_vm2, %v2638_v40  ;;  %v2642_v40 = vunpack.i.l.bf16 %v3709_v2 }
  0xa4   : > { %530 = vst.msk [vmem:[#allocation2 + $0x8f] sm:$0x1] %vm521_vm3, %v3292_v60  ;;  %2855 = vrot.lane.b32.xlu0 %v3468_v29, %s3293_s13  ;;  %2860 = vrot.lane.b32.xlu1 %v3475_v31, %s3293_s13 }
  0xa5   : > { %496 = vst.msk [vmem:[#allocation2 + $0x50] sm:$0xff] %vm365_vm2, %v2622_v24 }
  0xa6   : > { %v3799_v46 = vpop.permute.xlu0 %2645  ;;  %v3801_v47 = vpop.permute.xlu1 %2650  ;;  %2865 = vrot.lane.b32.xlu2 %v3481_v32, %s3293_s13  ;;  %498 = vst.msk [vmem:[#allocation2 + $0x60] sm:$0xff] %vm365_vm2, %v2627_v10 }
  0xa7   : > { %v2648_v48 = vunpack.i.h.bf16 %v3799_v46  ;;  %v2653_v49 = vunpack.i.h.bf16 %v3801_v47  ;;  %v2647_v62 = vunpack.i.l.bf16 %v3799_v46  ;;  %v2652_v28 = vunpack.i.l.bf16 %v3801_v47  ;;  %500 = vst.msk [vmem:[#allocation2 + $0x70] sm:$0xff] %vm365_vm2, %v2632_v23 }
  0xa8   : > { %v3878_v16 = vpop.permute.xlu2 %2700  ;;  %502 = vst.msk [vmem:[#allocation2 + $0x80] sm:$0xff] %vm365_vm2, %v2637_v27 }
  0xa9   : > { %507 = vst.msk [vmem:[#allocation2 + $0xa8] sm:$0xff] %vm365_vm2, %v2648_v48  ;;  %v2687_v48 = vunpack.i.l.bf16 %v3847_v57 }
  0xaa   : > { %532 = vst.msk [vmem:[#allocation2 + $0xaf] sm:$0x1] %vm521_vm3, %v3292_v60 }
  0xab   : > { %509 = vst.msk [vmem:[#allocation2 + $0xb8] sm:$0xff] %vm365_vm2, %v2653_v49 }
  0xac   : > { %533 = vst.msk [vmem:[#allocation2 + $0xbf] sm:$0x1] %vm521_vm3, %v3292_v60  ;;  %2870 = vrot.lane.b32.xlu0 %v3509_v41, %s3293_s13  ;;  %2875 = vrot.lane.b32.xlu1 %v3516_v43, %s3293_s13 }
  0xad   : > { %504 = vst.msk [vmem:[#allocation2 + $0x90] sm:$0xff] %vm365_vm2, %v2642_v40 }
  0xae   : > { %v3823_v50 = vpop.permute.xlu0 %2660  ;;  %v3825_v51 = vpop.permute.xlu1 %2665  ;;  %2880 = vrot.lane.b32.xlu2 %v3522_v44, %s3293_s13  ;;  %506 = vst.msk [vmem:[#allocation2 + $0xa0] sm:$0xff] %vm365_vm2, %v2647_v62 }
  0xaf   : > { %v2663_v52 = vunpack.i.h.bf16 %v3823_v50  ;;  %v2668_v54 = vunpack.i.h.bf16 %v3825_v51  ;;  %v2662_v30 = vunpack.i.l.bf16 %v3823_v50  ;;  %v2667_v2 = vunpack.i.l.bf16 %v3825_v51  ;;  %508 = vst.msk [vmem:[#allocation2 + $0xb0] sm:$0xff] %vm365_vm2, %v2652_v28 }
  0xb0   : > { %v3907_v39 = vpop.permute.xlu2 %2715  ;;  %510 = vst.msk [vmem:[#allocation2 + $0xc0] sm:$0xff] %vm365_vm2, %v2657_v45  ;;  %v2688_v50 = vunpack.i.h.bf16 %v3847_v57 }
  0xb1   : > { %513 = vst.msk [vmem:[#allocation2 + $0xd8] sm:$0xff] %vm365_vm2, %v2663_v52  ;;  %v2717_v22 = vunpack.i.l.bf16 %v3907_v39 }
  0xb2   : > { %535 = vst.msk [vmem:[#allocation2 + $0xdf] sm:$0x1] %vm521_vm3, %v3292_v60 }
  0xb3   : > { %515 = vst.msk [vmem:[#allocation2 + $0xe8] sm:$0xff] %vm365_vm2, %v2668_v54 }
  0xb4   : > { %536 = vst.msk [vmem:[#allocation2 + $0xef] sm:$0x1] %vm521_vm3, %v3292_v60  ;;  %2885 = vrot.lane.b32.xlu0 %v3546_v53, %s3293_s13  ;;  %2890 = vrot.lane.b32.xlu1 %v3555_v55, %s3293_s13  ;;  %vm1226_vm3 = vcmask 261344  }
  0xb5   : > { %512 = vst.msk [vmem:[#allocation2 + $0xd0] sm:$0xff] %vm365_vm2, %v2662_v30 }
  0xb6   : > { %v2676_v58 = vpop.permute.xlu0 %2675  ;;  %v2681_v63 = vpop.permute.xlu1 %2680  ;;  %2895 = vrot.lane.b32.xlu2 %v3561_v56, %s3293_s13  ;;  %514 = vst.msk [vmem:[#allocation2 + $0xe0] sm:$0xff] %vm365_vm2, %v2667_v2 }
  0xb7   : > { %v2678_v1 = vunpack.i.h.bf16 %v2676_v58  ;;  %v2677_v3 = vunpack.i.l.bf16 %v2676_v58  ;;  %v2682_v5 = vunpack.i.l.bf16 %v2681_v63  ;;  %v2683_v12 = vunpack.i.h.bf16 %v2681_v63  ;;  %516 = vst.msk [vmem:[#allocation2 + $0xf0] sm:$0xff] %vm365_vm2, %v2672_v17 }
  0xb8   : > { %v3936_v49 = vpop.permute.xlu2 %2730  ;;  %633 = vst.msk [vmem:[#allocation2 + $0x2f] sm:$0xfe] %vm628_vm5, %v2687_v48  ;;  %vm1196_vm2 = vcmask 227520  }
  0xb9   : > { %629 = vst.msk [vmem:[#allocation2 + $0xf] sm:$0xfe] %vm628_vm5, %v2677_v3  ;;  %v2959_v3 = vpack.i.bf16 %v3500_v37, %v3493_v36 }
  0xba   : > { %630 = vst.msk [vmem:[#allocation2 + $0x17] sm:$0xff] %vm518_vm6, %v2678_v1  ;;  %v2702_v1 = vunpack.i.l.bf16 %v3878_v16 }
  0xbb   : > { %661 = vst.msk [vmem:[#allocation2 + $0x10] sm:$0x1] %vm659_vm7, %v3292_v60 }
  0xbc   : > { %2900 = vrot.lane.b32.xlu0 %v3575_v59, %s3293_s13  ;;  %2905 = vrot.lane.b32.xlu1 %v3727_v15, %s3293_s13  ;;  %631 = vst.msk [vmem:[#allocation2 + $0x1f] sm:$0xfe] %vm628_vm5, %v2682_v5 }
  0xbd   : > { %632 = vst.msk [vmem:[#allocation2 + $0x27] sm:$0xff] %vm518_vm6, %v2683_v12  ;;  %v1749_v12 = vld [vmem:[%s5304_s2] sm:$0x3] }
  0xbe   : > { %v3872_v7 = vpop.permute.xlu0 %2690  ;;  %v3874_v11 = vpop.permute.xlu1 %2695  ;;  %662 = vst.msk [vmem:[#allocation2 + $0x20] sm:$0x1] %vm659_vm7, %v3292_v60  ;;  %2910 = vrot.lane.b32.xlu2 %v3404_v8, %s3294_s14  ;;  %v2703_v8 = vunpack.i.h.bf16 %v3878_v16  ;;  %v2718_v16 = vunpack.i.h.bf16 %v3907_v39  ;;  %v1799_v21 = vsel %vm1607_vm8, %v1749_v12, 0 }
  0xbf   : > { %634 = vst.msk [vmem:[#allocation2 + $0x37] sm:$0xff] %vm518_vm6, %v2688_v50  ;;  %v2693_v26 = vunpack.i.h.bf16 %v3872_v7  ;;  %v2692_v51 = vunpack.i.l.bf16 %v3872_v7  ;;  %v2698_v57 = vunpack.i.h.bf16 %v3874_v11  ;;  %v2697_v58 = vunpack.i.l.bf16 %v3874_v11  ;;  %1808 = vmatpush.bf16.msra.mxu1 %v1799_v21  ;;  %2550 = vmatpush.bf16.msra.mxu3 %v1799_v21 }
  0xc0   : > { %663 = vst.msk [vmem:[#allocation2 + $0x30] sm:$0x1] %vm659_vm7, %v3292_v60  ;;  %v3966_v63 = vpop.permute.xlu2 %2745 }
  0xc1   : > { %636 = vst.msk [vmem:[#allocation2 + $0x47] sm:$0xff] %vm518_vm6, %v2693_v26  ;;  %v2748_v30 = vunpack.i.h.bf16 %v3966_v63 }
  0xc2   : > { %635 = vst.msk [vmem:[#allocation2 + $0x3f] sm:$0xfe] %vm628_vm5, %v2692_v51  ;;  %2443 = vmatmul.msk.bf16.vlgmr.msra.gmra.mxu1 %vm313_vm0, %v3387_v0  ;;  %2452 = vmatmul.msk.bf16.vlgmr.msra.gmra.mxu3 %vm313_vm0, %v3484_v33  ;;  %v2733_v0 = vunpack.i.h.bf16 %v3936_v49  ;;  %v2732_v33 = vunpack.i.l.bf16 %v3936_v49 }
  0xc3   : > { %664 = vst.msk [vmem:[#allocation2 + $0x40] sm:$0x1] %vm659_vm7, %v3292_v60 }
  0xc4   : > { %2915 = vrot.lane.b32.xlu0 %v3440_v19, %s3294_s14  ;;  %2920 = vrot.lane.b32.xlu1 %v3410_v9, %s3294_s14  ;;  %638 = vst.msk [vmem:[#allocation2 + $0x57] sm:$0xff] %vm518_vm6, %v2698_v57 }
  0xc5   : > { %637 = vst.msk [vmem:[#allocation2 + $0x4f] sm:$0xfe] %vm628_vm5, %v2697_v58 }
  0xc6   : > { %v3901_v61 = vpop.permute.xlu0 %2705  ;;  %v3903_v25 = vpop.permute.xlu1 %2710  ;;  %665 = vst.msk [vmem:[#allocation2 + $0x50] sm:$0x1] %vm659_vm7, %v3292_v60  ;;  %2925 = vrot.lane.b32.xlu2 %v2924_v4, %s3294_s14 }
  0xc7   : > { %v2707_v5 = vunpack.i.l.bf16 %v3901_v61  ;;  %640 = vst.msk [vmem:[#allocation2 + $0x67] sm:$0xff] %vm518_vm6, %v2703_v8  ;;  %v2708_v13 = vunpack.i.h.bf16 %v3901_v61  ;;  %v2713_v35 = vunpack.i.h.bf16 %v3903_v25  ;;  %v2712_v37 = vunpack.i.l.bf16 %v3903_v25 }
  0xc8   : > { %639 = vst.msk [vmem:[#allocation2 + $0x5f] sm:$0xfe] %vm628_vm5, %v2702_v1  ;;  %v3996_v36 = vpop.permute.xlu2 %2760 }
  0xc9   : > { %666 = vst.msk [vmem:[#allocation2 + $0x60] sm:$0x1] %vm659_vm7, %v3292_v60  ;;  %v2762_v49 = vunpack.i.l.bf16 %v3996_v36  ;;  %v2763_v50 = vunpack.i.h.bf16 %v3996_v36 }
  0xca   : > { %641 = vst.msk [vmem:[#allocation2 + $0x6f] sm:$0xfe] %vm628_vm5, %v2707_v5 }
  0xcb   : > { %642 = vst.msk [vmem:[#allocation2 + $0x77] sm:$0xff] %vm518_vm6, %v2708_v13  ;;  %v3214_v13 = vld [vmem:[%s3384_s9 + $0x10] sm:$0xff]  }
  0xcc   : > { %2930 = vrot.lane.b32.xlu0 %v3440_v19, %s3295_s15  ;;  %2935 = vrot.lane.b32.xlu1 %v3440_v19, %s3296_s16  ;;  %667 = vst.msk [vmem:[#allocation2 + $0x70] sm:$0x1] %vm659_vm7, %v3292_v60 }
  0xcd   : > { %644 = vst.msk [vmem:[#allocation2 + $0x87] sm:$0xff] %vm518_vm6, %v2713_v35 }
  0xce   : > { %v3929_v46 = vpop.permute.xlu0 %2720  ;;  %v3931_v47 = vpop.permute.xlu1 %2725  ;;  %643 = vst.msk [vmem:[#allocation2 + $0x7f] sm:$0xfe] %vm628_vm5, %v2712_v37  ;;  %2940 = vrot.lane.b32.xlu2 %v3440_v19, %s3297_s25  ;;  %v2994_v19 = vpack.i.bf16 %v3423_v14, %v3503_v38 }
  0xcf   : > { %668 = vst.msk [vmem:[#allocation2 + $0x80] sm:$0x1] %vm659_vm7, %v3292_v60  ;;  %v2722_v23 = vunpack.i.l.bf16 %v3929_v46  ;;  %v2723_v61 = vunpack.i.h.bf16 %v3929_v46  ;;  %v2728_v27 = vunpack.i.h.bf16 %v3931_v47  ;;  %v2727_v39 = vunpack.i.l.bf16 %v3931_v47 }
  0xd0   : > { %646 = vst.msk [vmem:[#allocation2 + $0x97] sm:$0xff] %vm518_vm6, %v2718_v16  ;;  %v4031_v25 = vpop.permute.xlu2 %2775  ;;  %v2747_v46 = vunpack.i.l.bf16 %v3966_v63 }
  0xd1   : > { %645 = vst.msk [vmem:[#allocation2 + $0x8f] sm:$0xfe] %vm628_vm5, %v2717_v22  ;;  %v2777_v8 = vunpack.i.l.bf16 %v4031_v25 }
  0xd2   : > { %669 = vst.msk [vmem:[#allocation2 + $0x90] sm:$0x1] %vm659_vm7, %v3292_v60  ;;  %2444 = vmatmul.msk.bf16.gmra.mxu1 %vm313_vm0, %v3397_v6  ;;  %2453 = vmatmul.msk.bf16.gmra.mxu3 %vm313_vm0, %v3487_v34 }
  0xd3   : > { %647 = vst.msk [vmem:[#allocation2 + $0x9f] sm:$0xfe] %vm628_vm5, %v2722_v23 }
  0xd4   : > { %2945 = vrot.lane.b32.xlu0 %v3410_v9, %s3295_s15  ;;  %2950 = vrot.lane.b32.xlu1 %v3410_v9, %s3296_s16  ;;  %648 = vst.msk [vmem:[#allocation2 + $0xa7] sm:$0xff] %vm518_vm6, %v2723_v61 }
  0xd5   : > { %670 = vst.msk [vmem:[#allocation2 + $0xa0] sm:$0x1] %vm659_vm7, %v3292_v60 }
  0xd6   : > { %v3955_v52 = vpop.permute.xlu0 %2735  ;;  %v3957_v54 = vpop.permute.xlu1 %2740  ;;  %650 = vst.msk [vmem:[#allocation2 + $0xb7] sm:$0xff] %vm518_vm6, %v2728_v27  ;;  %2955 = vrot.lane.b32.xlu2 %v3410_v9, %s3297_s25 }
  0xd7   : > { %649 = vst.msk [vmem:[#allocation2 + $0xaf] sm:$0xfe] %vm628_vm5, %v2727_v39  ;;  %v2737_v40 = vunpack.i.l.bf16 %v3955_v52  ;;  %v2738_v62 = vunpack.i.h.bf16 %v3955_v52  ;;  %v2743_v45 = vunpack.i.h.bf16 %v3957_v54  ;;  %v2742_v9 = vunpack.i.l.bf16 %v3957_v54 }
  0xd8   : > { %671 = vst.msk [vmem:[#allocation2 + $0xb0] sm:$0x1] %vm659_vm7, %v3292_v60  ;;  %v4061_v28 = vpop.permute.xlu2 %2790 }
  0xd9   : > { %652 = vst.msk [vmem:[#allocation2 + $0xc7] sm:$0xff] %vm518_vm6, %v2733_v0  ;;  %v2792_v35 = vunpack.i.l.bf16 %v4061_v28  ;;  %v2793_v37 = vunpack.i.h.bf16 %v4061_v28  ;;  %v3216_v28 = vld [vmem:[%s3384_s9 + $0x60] sm:$0xff]  }
  0xda   : > { %651 = vst.msk [vmem:[#allocation2 + $0xbf] sm:$0xfe] %vm628_vm5, %v2732_v33 }
  0xdb   : > { %672 = vst.msk [vmem:[#allocation2 + $0xc0] sm:$0x1] %vm659_vm7, %v3292_v60 }
  0xdc   : > { %2960 = vrot.lane.b32.xlu0 %v2959_v3, %s3294_s14  ;;  %2965 = vrot.lane.b32.xlu1 %v3516_v43, %s3295_s15  ;;  %653 = vst.msk [vmem:[#allocation2 + $0xcf] sm:$0xfe] %vm628_vm5, %v2737_v40 }
  0xdd   : > { %654 = vst.msk [vmem:[#allocation2 + $0xd7] sm:$0xff] %vm518_vm6, %v2738_v62  ;;  %v3215_v62 = vld [vmem:[%s3384_s9 + $0x18] sm:$0xff]  }
  0xde   : > { %v3985_v7 = vpop.permute.xlu0 %2750  ;;  %v3987_v11 = vpop.permute.xlu1 %2755  ;;  %673 = vst.msk [vmem:[#allocation2 + $0xd0] sm:$0x1] %vm659_vm7, %v3292_v60  ;;  %2970 = vrot.lane.b32.xlu2 %v3516_v43, %s3296_s16 }
  0xdf   : > { %656 = vst.msk [vmem:[#allocation2 + $0xe7] sm:$0xff] %vm518_vm6, %v2743_v45  ;;  %v2753_v47 = vunpack.i.h.bf16 %v3985_v7  ;;  %v2757_v6 = vunpack.i.l.bf16 %v3987_v11  ;;  %v2758_v34 = vunpack.i.h.bf16 %v3987_v11 }
  0xe0   : > { %655 = vst.msk [vmem:[#allocation2 + $0xdf] sm:$0xfe] %vm628_vm5, %v2742_v9  ;;  %v4093_v48 = vpop.permute.xlu2 %2805 }
  0xe1   : > { %674 = vst.msk [vmem:[#allocation2 + $0xe0] sm:$0x1] %vm659_vm7, %v3292_v60  ;;  %v2808_v23 = vunpack.i.h.bf16 %v4093_v48 }
  0xe2   : > { %658 = vst.msk [vmem:[#allocation2 + $0xf7] sm:$0xff] %vm518_vm6, %v2748_v30  ;;  %2445 = vmatmul.msk.bf16.gmra.mxu1 %vm313_vm0, %v3214_v13  ;;  %2454 = vmatmul.msk.bf16.gmra.mxu3 %vm313_vm0, %v3512_v42  ;;  %vm1349_vm6 = vcmask 294144  }
  0xe3   : > { %657 = vst.msk [vmem:[#allocation2 + $0xef] sm:$0xfe] %vm628_vm5, %v2747_v46  ;;  %vm1459_vm5 = vcmask 294145  }
  0xe4   : > { %2975 = vrot.lane.b32.xlu0 %v3516_v43, %s3297_s25  ;;  %2980 = vrot.lane.b32.xlu1 %v3444_v20, %s3295_s15  ;;  %v2752_v43 = vunpack.i.l.bf16 %v3985_v7  ;;  %675 = vst.msk [vmem:[#allocation2 + $0xf0] sm:$0x1] %vm659_vm7, %v3292_v60  ;;  %vm1558_vm7 = vcmask 293888  }
  0xe5   : > { %777 = vst.msk [vmem:[#allocation2 + $0x9] sm:$0x7f] %vm776_vm9, %v2753_v47 }
  0xe6   : > { %v4015_v24 = vpop.permute.xlu0 %2765  ;;  %v4017_v10 = vpop.permute.xlu1 %2770  ;;  %775 = vst.msk [vmem:[#allocation2 + $0x1] sm:$0xff] %vm774_vm10, %v2752_v43  ;;  %2985 = vrot.lane.b32.xlu2 %v3444_v20, %s3296_s16 }
  0xe7   : > { %778 = vst.msk [vmem:[#allocation2 + $0x11] sm:$0xff] %vm774_vm10, %v2757_v6  ;;  %v2768_v52 = vunpack.i.h.bf16 %v4015_v24  ;;  %v2767_v54 = vunpack.i.l.bf16 %v4015_v24  ;;  %v2772_v57 = vunpack.i.l.bf16 %v4017_v10  ;;  %v2773_v63 = vunpack.i.h.bf16 %v4017_v10 }
  0xe8   : > { %779 = vst.msk [vmem:[#allocation2 + $0x19] sm:$0x7f] %vm776_vm9, %v2758_v34  ;;  %v4122_v58 = vpop.permute.xlu2 %2820  ;;  %v2807_v10 = vunpack.i.l.bf16 %v4093_v48 }
  0xe9   : > { %780 = vst.msk [vmem:[#allocation2 + $0x21] sm:$0xff] %vm774_vm10, %v2762_v49  ;;  %v2822_v39 = vunpack.i.l.bf16 %v4122_v58  ;;  %v2823_v0 = vunpack.i.h.bf16 %v4122_v58 }
  0xea   : > { %781 = vst.msk [vmem:[#allocation2 + $0x29] sm:$0x7f] %vm776_vm9, %v2763_v50 }
  0xeb   : > { %783 = vst.msk [vmem:[#allocation2 + $0x39] sm:$0x7f] %vm776_vm9, %v2768_v52  ;;  %v3217_v52 = vld [vmem:[%s3384_s9 + $0x20] sm:$0xff]  }
  0xec   : > { %2990 = vrot.lane.b32.xlu0 %v3444_v20, %s3297_s25  ;;  %2995 = vrot.lane.b32.xlu1 %v2994_v19, %s3294_s14  ;;  %782 = vst.msk [vmem:[#allocation2 + $0x31] sm:$0xff] %vm774_vm10, %v2767_v54  ;;  %v2778_v20 = vunpack.i.h.bf16 %v4031_v25  ;;  %v3218_v54 = vld [vmem:[%s3384_s9 + $0x68] sm:$0xff]  }
  0xed   : > { %784 = vst.msk [vmem:[#allocation2 + $0x41] sm:$0xff] %vm774_vm10, %v2772_v57 }
  0xee   : > { %v4049_v14 = vpop.permute.xlu0 %2780  ;;  %v4051_v38 = vpop.permute.xlu1 %2785  ;;  %785 = vst.msk [vmem:[#allocation2 + $0x49] sm:$0x7f] %vm776_vm9, %v2773_v63  ;;  %3000 = vrot.lane.b32.xlu2 %v3522_v44, %s3295_s15 }
  0xef   : > { %v2783_v1 = vunpack.i.h.bf16 %v4049_v14  ;;  %v2782_v3 = vunpack.i.l.bf16 %v4049_v14  ;;  %786 = vst.msk [vmem:[#allocation2 + $0x51] sm:$0xff] %vm774_vm10, %v2777_v8  ;;  %v2787_v7 = vunpack.i.l.bf16 %v4051_v38  ;;  %v2788_v11 = vunpack.i.h.bf16 %v4051_v38 }
  0xf0   : > { %787 = vst.msk [vmem:[#allocation2 + $0x59] sm:$0x7f] %vm776_vm9, %v2778_v20  ;;  %v4154_v36 = vpop.permute.xlu2 %2835 }
  0xf1   : > { %789 = vst.msk [vmem:[#allocation2 + $0x69] sm:$0x7f] %vm776_vm9, %v2783_v1  ;;  %v2838_v30 = vunpack.i.h.bf16 %v4154_v36 }
  0xf2   : > { %788 = vst.msk [vmem:[#allocation2 + $0x61] sm:$0xff] %vm774_vm10, %v2782_v3  ;;  %2446 = vmatmul.msk.bf16.gmra.mxu1 %vm313_vm0, %v3215_v62  ;;  %2455 = vmatmul.msk.bf16.gmra.mxu3 %vm313_vm0, %v3216_v28 }
  0xf3   : > { %790 = vst.msk [vmem:[#allocation2 + $0x71] sm:$0xff] %vm774_vm10, %v2787_v7 }
  0xf4   : > { %3005 = vrot.lane.b32.xlu0 %v3522_v44, %s3296_s16  ;;  %3010 = vrot.lane.b32.xlu1 %v3522_v44, %s3297_s25  ;;  %791 = vst.msk [vmem:[#allocation2 + $0x79] sm:$0x7f] %vm776_vm9, %v2788_v11 }
  0xf5   : > { %792 = vst.msk [vmem:[#allocation2 + $0x81] sm:$0xff] %vm774_vm10, %v2792_v35 }
  0xf6   : > { %v4077_v2 = vpop.permute.xlu0 %2795  ;;  %v4079_v17 = vpop.permute.xlu1 %2800  ;;  %793 = vst.msk [vmem:[#allocation2 + $0x89] sm:$0x7f] %vm776_vm9, %v2793_v37  ;;  %3015 = vrot.lane.b32.xlu2 %v3434_v18, %s3295_s15 }
  0xf7   : > { %v2798_v12 = vunpack.i.h.bf16 %v4077_v2  ;;  %v2797_v16 = vunpack.i.l.bf16 %v4077_v2  ;;  %v2802_v42 = vunpack.i.l.bf16 %v4079_v17  ;;  %v2803_v21 = vunpack.i.h.bf16 %v4079_v17  ;;  %798 = vst.msk [vmem:[#allocation2 + $0xb1] sm:$0xff] %vm774_vm10, %v2807_v10 }
  0xf8   : > { %v4182_v25 = vpop.permute.xlu2 %2850  ;;  %799 = vst.msk [vmem:[#allocation2 + $0xb9] sm:$0x7f] %vm776_vm9, %v2808_v23  ;;  %v2837_v2 = vunpack.i.l.bf16 %v4154_v36 }
  0xf9   : > { %795 = vst.msk [vmem:[#allocation2 + $0x99] sm:$0x7f] %vm776_vm9, %v2798_v12  ;;  %v2853_v34 = vunpack.i.h.bf16 %v4182_v25  ;;  %v3219_v12 = vld [vmem:[%s3384_s9 + $0x28] sm:$0xff]  }
  0xfa   : > { %794 = vst.msk [vmem:[#allocation2 + $0x91] sm:$0xff] %vm774_vm10, %v2797_v16  ;;  %v3220_v16 = vld [vmem:[%s3384_s9 + $0x70] sm:$0xff]  }
  0xfb   : > { %796 = vst.msk [vmem:[#allocation2 + $0xa1] sm:$0xff] %vm774_vm10, %v2802_v42 }
  0xfc   : > { %3020 = vrot.lane.b32.xlu0 %v3434_v18, %s3296_s16  ;;  %3025 = vrot.lane.b32.xlu1 %v3434_v18, %s3297_s25  ;;  %797 = vst.msk [vmem:[#allocation2 + $0xa9] sm:$0x7f] %vm776_vm9, %v2803_v21 }
  0xfd   : > { %804 = vst.msk [vmem:[#allocation2 + $0xe1] sm:$0xff] %vm774_vm10, %v2822_v39 }
  0xfe   : > { %v4110_v26 = vpop.permute.xlu0 %2810  ;;  %v4112_v51 = vpop.permute.xlu1 %2815  ;;  %3030 = vrot.lane.b32.xlu2 %v3522_v44, %s3294_s14  ;;  %805 = vst.msk [vmem:[#allocation2 + $0xe9] sm:$0x7f] %vm776_vm9, %v2823_v0 }
  0xff   : > { %v2813_v61 = vunpack.i.h.bf16 %v4110_v26  ;;  %v2812_v27 = vunpack.i.l.bf16 %v4110_v26  ;;  %v2817_v19 = vunpack.i.l.bf16 %v4112_v51  ;;  %908 = vst.msk [vmem:[#allocation2 + $0x18] sm:$0xff] %vm904_vm11, %v2838_v30  ;;  %v2852_v26 = vunpack.i.l.bf16 %v4182_v25 }
 0x100   : > { %v4214_v9 = vpop.permute.xlu2 %2865  ;;  %939 = vst.msk [vmem:[#allocation2 + $0x1f] sm:$0x1] %vm937_vm12, %v3292_v60 }
 0x101   : > { %801 = vst.msk [vmem:[#allocation2 + $0xc9] sm:$0x7f] %vm776_vm9, %v2813_v61  ;;  %v2868_v20 = vunpack.i.h.bf16 %v4214_v9 }
 0x102   : > { %800 = vst.msk [vmem:[#allocation2 + $0xc1] sm:$0xff] %vm774_vm10, %v2812_v27  ;;  %2447 = vmatmul.msk.bf16.gmra.mxu1 %vm313_vm0, %v3217_v52  ;;  %2456 = vmatmul.msk.bf16.gmra.mxu3 %vm313_vm0, %v3218_v54  ;;  %v1542_v27 = vld [vmem:[%s5303_s1 + $0x10] sm:$0x3] }
 0x103   : > { %802 = vst.msk [vmem:[#allocation2 + $0xd1] sm:$0xff] %vm774_vm10, %v2817_v19 }
 0x104   : > { %3035 = vrot.lane.b32.xlu0 %v3546_v53, %s3295_s15  ;;  %3040 = vrot.lane.b32.xlu1 %v3546_v53, %s3296_s16  ;;  %907 = vst.msk [vmem:[#allocation2 + $0x10] sm:$0xff] %vm904_vm11, %v2837_v2  ;;  %v3222_v2 = vld [vmem:[%s3384_s9 + $0x78] sm:$0xff]  }
 0x105   : > { %914 = vst.msk [vmem:[#allocation2 + $0x48] sm:$0xff] %vm904_vm11, %v2853_v34 }
 0x106   : > { %v4138_v4 = vpop.permute.xlu0 %2825  ;;  %v4140_v5 = vpop.permute.xlu1 %2830  ;;  %3045 = vrot.lane.b32.xlu2 %v3546_v53, %s3297_s25  ;;  %942 = vst.msk [vmem:[#allocation2 + $0x4f] sm:$0x1] %vm937_vm12, %v3292_v60 }
 0x107   : > { %v2828_v38 = vunpack.i.h.bf16 %v4138_v4  ;;  %v2827_v40 = vunpack.i.l.bf16 %v4138_v4  ;;  %v2833_v45 = vunpack.i.h.bf16 %v4140_v5  ;;  %v2832_v44 = vunpack.i.l.bf16 %v4140_v5  ;;  %913 = vst.msk [vmem:[#allocation2 + $0x40] sm:$0xff] %vm904_vm11, %v2852_v26 }
 0x108   : > { %v4241_v43 = vpop.permute.xlu2 %2880  ;;  %v2867_v4 = vunpack.i.l.bf16 %v4214_v9  ;;  %920 = vst.msk [vmem:[#allocation2 + $0x78] sm:$0xff] %vm904_vm11, %v2868_v20  ;;  %v3221_v9 = vld [vmem:[%s3384_s9 + $0x30] sm:$0xff]  }
 0x109   : > { %807 = vst.msk [vmem:[#allocation2 + $0xf9] sm:$0x7f] %vm776_vm9, %v2828_v38  ;;  %v2883_v37 = vunpack.i.h.bf16 %v4241_v43  ;;  %v2882_v42 = vunpack.i.l.bf16 %v4241_v43 }
 0x10a   : > { %806 = vst.msk [vmem:[#allocation2 + $0xf1] sm:$0xff] %vm774_vm10, %v2827_v40  ;;  %v2467_v40 = vld [vmem:[%s5303_s1 + $0x8] sm:$0xff] }
 0x10b   : > { %906 = vst.msk [vmem:[#allocation2 + $0x8] sm:$0xff] %vm904_vm11, %v2833_v45 }
 0x10c   : > { %3050 = vrot.lane.b32.xlu0 %v3434_v18, %s3294_s14  ;;  %3055 = vrot.lane.b32.xlu1 %v3468_v29, %s3295_s15  ;;  %v2818_v18 = vunpack.i.h.bf16 %v4112_v51  ;;  %938 = vst.msk [vmem:[#allocation2 + $0xf] sm:$0x1] %vm937_vm12, %v3292_v60 }
 0x10d   : > { %905 = vst.msk [vmem:[#allocation2] sm:$0xff] %vm904_vm11, %v2832_v44 }
 0x10e   : > { %v4170_v22 = vpop.permute.xlu0 %2840  ;;  %v4172_v24 = vpop.permute.xlu1 %2845  ;;  %803 = vst.msk [vmem:[#allocation2 + $0xd9] sm:$0x7f] %vm776_vm9, %v2818_v18  ;;  %3060 = vrot.lane.b32.xlu2 %v3468_v29, %s3296_s16  ;;  %v1552_v18 = vunpack.c.l.b16 %v1542_v27 }
 0x10f   : > { %v2843_v47 = vunpack.i.h.bf16 %v4170_v22  ;;  %v2842_v48 = vunpack.i.l.bf16 %v4170_v22  ;;  %v2848_v6 = vunpack.i.h.bf16 %v4172_v24  ;;  %945 = vst.msk [vmem:[#allocation2 + $0x7f] sm:$0x1] %vm937_vm12, %v3292_v60 }
 0x110   : > { %v4272_v57 = vpop.permute.xlu2 %2895  ;;  %919 = vst.msk [vmem:[#allocation2 + $0x70] sm:$0xff] %vm904_vm11, %v2867_v4  ;;  %v1555_v0 = vpack.c.b16 %v1552_v18, %v1552_v18 }
 0x111   : > { %910 = vst.msk [vmem:[#allocation2 + $0x28] sm:$0xff] %vm904_vm11, %v2843_v47  ;;  %v2898_v25 = vunpack.i.h.bf16 %v4272_v57  ;;  %v2897_v39 = vunpack.i.l.bf16 %v4272_v57 }
 0x112   : > { %940 = vst.msk [vmem:[#allocation2 + $0x2f] sm:$0x1] %vm937_vm12, %v3292_v60  ;;  %2448 = vmatmul.msk.bf16.gmra.mxu1 %vm313_vm0, %v3219_v12  ;;  %2457 = vmatmul.msk.bf16.gmra.mxu3 %vm313_vm0, %v3220_v16 }
 0x113   : > { %909 = vst.msk [vmem:[#allocation2 + $0x20] sm:$0xff] %vm904_vm11, %v2842_v48 }
 0x114   : > { %3065 = vrot.lane.b32.xlu0 %v3468_v29, %s3297_s25  ;;  %3070 = vrot.lane.b32.xlu1 %v3546_v53, %s3294_s14  ;;  %v2847_v53 = vunpack.i.l.bf16 %v4172_v24  ;;  %912 = vst.msk [vmem:[#allocation2 + $0x38] sm:$0xff] %vm904_vm11, %v2848_v6 }
 0x115   : > { %941 = vst.msk [vmem:[#allocation2 + $0x3f] sm:$0x1] %vm937_vm12, %v3292_v60 }
 0x116   : > { %v4198_v33 = vpop.permute.xlu0 %2855  ;;  %v4200_v14 = vpop.permute.xlu1 %2860  ;;  %911 = vst.msk [vmem:[#allocation2 + $0x30] sm:$0xff] %vm904_vm11, %v2847_v53  ;;  %3075 = vrot.lane.b32.xlu2 %v3555_v55, %s3295_s15 }
 0x117   : > { %v2858_v51 = vunpack.i.h.bf16 %v4198_v33  ;;  %v2857_v58 = vunpack.i.l.bf16 %v4198_v33  ;;  %v2863_v63 = vunpack.i.h.bf16 %v4200_v14  ;;  %v2862_v8 = vunpack.i.l.bf16 %v4200_v14  ;;  %926 = vst.msk [vmem:[#allocation2 + $0xa8] sm:$0xff] %vm904_vm11, %v2883_v37 }
 0x118   : > { %v4301_v7 = vpop.permute.xlu2 %2910  ;;  %948 = vst.msk [vmem:[#allocation2 + $0xaf] sm:$0x1] %vm937_vm12, %v3292_v60  ;;  %v1609_v14 = vsel %vm1607_vm8, %v1555_v0, 0  ;;  %vm1700_vm8 = vcmask 64512  }
 0x119   : > { %916 = vst.msk [vmem:[#allocation2 + $0x58] sm:$0xff] %vm904_vm11, %v2858_v51  ;;  %1616 = vmatpush.bf16.msra.mxu0 %v1609_v14  ;;  %2547 = vmatpush.bf16.msra.mxu2 %v1609_v14  ;;  %v2912_v44 = vunpack.i.l.bf16 %v4301_v7 }
 0x11a   : > { %943 = vst.msk [vmem:[#allocation2 + $0x5f] sm:$0x1] %vm937_vm12, %v3292_v60 }
 0x11b   : > { %915 = vst.msk [vmem:[#allocation2 + $0x50] sm:$0xff] %vm904_vm11, %v2857_v58  ;;  %v3223_v58 = vld [vmem:[%s3384_s9 + $0x38] sm:$0xff]  }
 0x11c   : > { %3080 = vrot.lane.b32.xlu0 %v3555_v55, %s3296_s16  ;;  %3085 = vrot.lane.b32.xlu1 %v3555_v55, %s3297_s25  ;;  %918 = vst.msk [vmem:[#allocation2 + $0x68] sm:$0xff] %vm904_vm11, %v2863_v63 }
 0x11d   : > { %944 = vst.msk [vmem:[#allocation2 + $0x6f] sm:$0x1] %vm937_vm12, %v3292_v60  ;;  %1617 = vmatpush.bf16.msra.mxu0 %v2467_v40  ;;  %2548 = vmatpush.bf16.msra.mxu2 %v2467_v40 }
 0x11e   : > { %v4229_v17 = vpop.permute.xlu0 %2870  ;;  %v4231_v46 = vpop.permute.xlu1 %2875  ;;  %917 = vst.msk [vmem:[#allocation2 + $0x60] sm:$0xff] %vm904_vm11, %v2862_v8  ;;  %3090 = vrot.lane.b32.xlu2 %v3468_v29, %s3294_s14 }
 0x11f   : > { %v2873_v5 = vunpack.i.h.bf16 %v4229_v17  ;;  %v2872_v11 = vunpack.i.l.bf16 %v4229_v17  ;;  %v2877_v13 = vunpack.i.l.bf16 %v4231_v46  ;;  %925 = vst.msk [vmem:[#allocation2 + $0xa0] sm:$0xff] %vm904_vm11, %v2882_v42  ;;  %v2913_v17 = vunpack.i.h.bf16 %v4301_v7 }
 0x120   : > { %v4333_v21 = vpop.permute.xlu2 %2925  ;;  %932 = vst.msk [vmem:[#allocation2 + $0xd8] sm:$0xff] %vm904_vm11, %v2898_v25 }
 0x121   : > { %922 = vst.msk [vmem:[#allocation2 + $0x88] sm:$0xff] %vm904_vm11, %v2873_v5 }
 0x122   : > { %946 = vst.msk [vmem:[#allocation2 + $0x8f] sm:$0x1] %vm937_vm12, %v3292_v60  ;;  %2449 = vmatmul.msk.bf16.gmra.mxu1 %vm313_vm0, %v3221_v9  ;;  %2458 = vmatmul.msk.bf16.gmra.mxu3 %vm313_vm0, %v3222_v2 }
 0x123   : > { %921 = vst.msk [vmem:[#allocation2 + $0x80] sm:$0xff] %vm904_vm11, %v2872_v11 }
 0x124   : > { %3095 = vrot.lane.b32.xlu0 %v3475_v31, %s3295_s15  ;;  %3100 = vrot.lane.b32.xlu1 %v3475_v31, %s3296_s16  ;;  %923 = vst.msk [vmem:[#allocation2 + $0x90] sm:$0xff] %vm904_vm11, %v2877_v13 }
 0x125   : > { %951 = vst.msk [vmem:[#allocation2 + $0xdf] sm:$0x1] %vm937_vm12, %v3292_v60 }
 0x126   : > { %v4256_v49 = vpop.permute.xlu0 %2885  ;;  %v4258_v50 = vpop.permute.xlu1 %2890  ;;  %3105 = vrot.lane.b32.xlu2 %v3475_v31, %s3297_s25  ;;  %931 = vst.msk [vmem:[#allocation2 + $0xd0] sm:$0xff] %vm904_vm11, %v2897_v39 }
 0x127   : > { %v2888_v22 = vunpack.i.h.bf16 %v4256_v49  ;;  %v2887_v29 = vunpack.i.l.bf16 %v4256_v49  ;;  %v2893_v24 = vunpack.i.h.bf16 %v4258_v50  ;;  %v2892_v61 = vunpack.i.l.bf16 %v4258_v50  ;;  %1051 = vst.msk [vmem:[#allocation2 - $0x1] sm:$0xfe] %vm1050_vm13, %v2912_v44 }
 0x128   : > { %v4363_v19 = vpop.permute.xlu2 %2940  ;;  %1053 = vst.msk [vmem:[#allocation2 + $0x7] sm:$0xff] %vm1052_vm14, %v2913_v17  ;;  %v2927_v49 = vunpack.i.l.bf16 %v4333_v21 }
 0x129   : > { %928 = vst.msk [vmem:[#allocation2 + $0xb8] sm:$0xff] %vm904_vm11, %v2888_v22  ;;  %v2942_v63 = vunpack.i.l.bf16 %v4363_v19  ;;  %v2943_v8 = vunpack.i.h.bf16 %v4363_v19 }
 0x12a   : > { %949 = vst.msk [vmem:[#allocation2 + $0xbf] sm:$0x1] %vm937_vm12, %v3292_v60 }
 0x12b   : > { %927 = vst.msk [vmem:[#allocation2 + $0xb0] sm:$0xff] %vm904_vm11, %v2887_v29  ;;  %v3224_v29 = vld [vmem:[%s3384_s9 + $0x40] sm:$0xff]   ;;  %s2464_s9 = sshll.u32 %s3378_s30, 8  ;;  %s230_s30 = sand.u32 1, %s3279_s19  }
 0x12c   : > { %3110 = vrot.lane.b32.xlu0 %v3555_v55, %s3294_s14  ;;  %3115 = vrot.lane.b32.xlu1 %v3561_v56, %s3295_s15  ;;  %v2878_v55 = vunpack.i.h.bf16 %v4231_v46  ;;  %930 = vst.msk [vmem:[#allocation2 + $0xc8] sm:$0xff] %vm904_vm11, %v2893_v24  ;;  %v2466_v46 = vld [vmem:[%s5303_s1] sm:$0xff]  ;;  %s4891_s17 = scalar_lea.vmem %s5305_s3, %s2464_s9  ;;  %s2412_s23 = sshll.u32 %s230_s30, 2 }
 0x12d   : > { %950 = vst.msk [vmem:[#allocation2 + $0xcf] sm:$0x1] %vm937_vm12, %v3292_v60  ;;  %1618 = vmatpush.bf16.msra.mxu0 %v2466_v46  ;;  %2549 = vmatpush.bf16.msra.mxu2 %v2466_v46  ;;  %s2278_s22 = scalar_lea.sflag [#allocation4], %s230_s30 }
 0x12e   : > { %v4289_v1 = vpop.permute.xlu0 %2900  ;;  %v4291_v3 = vpop.permute.xlu1 %2905  ;;  %924 = vst.msk [vmem:[#allocation2 + $0x98] sm:$0xff] %vm904_vm11, %v2878_v55  ;;  %3120 = vrot.lane.b32.xlu2 %v3561_v56, %s3296_s16 }
 0x12f   : > { %947 = vst.msk [vmem:[#allocation2 + $0x9f] sm:$0x1] %vm937_vm12, %v3292_v60  ;;  %v2902_v33 = vunpack.i.l.bf16 %v4289_v1  ;;  %v2908_v38 = vunpack.i.h.bf16 %v4291_v3  ;;  %v2907_v45 = vunpack.i.l.bf16 %v4291_v3 }
 0x130   : > { %929 = vst.msk [vmem:[#allocation2 + $0xc0] sm:$0xff] %vm904_vm11, %v2892_v61  ;;  %v4398_v30 = vpop.permute.xlu2 %2955 }
 0x131   : > { %933 = vst.msk [vmem:[#allocation2 + $0xe0] sm:$0xff] %vm904_vm11, %v2902_v33  ;;  %v2957_v11 = vunpack.i.l.bf16 %v4398_v30  ;;  %v2958_v13 = vunpack.i.h.bf16 %v4398_v30 }
 0x132   : > { %936 = vst.msk [vmem:[#allocation2 + $0xf8] sm:$0xff] %vm904_vm11, %v2908_v38  ;;  %2450 = vmatmul.msk.bf16.gmra.mxu1 %vm313_vm0, %v3223_v58 }
 0x133   : > { %953 = vst.msk [vmem:[#allocation2 + $0xff] sm:$0x1] %vm937_vm12, %v3292_v60 }
 0x134   : > { %3125 = vrot.lane.b32.xlu0 %v3561_v56, %s3297_s25  ;;  %3130 = vrot.lane.b32.xlu1 %v3475_v31, %s3294_s14  ;;  %v2903_v31 = vunpack.i.h.bf16 %v4289_v1  ;;  %935 = vst.msk [vmem:[#allocation2 + $0xf0] sm:$0xff] %vm904_vm11, %v2907_v45 }
 0x135   : > { %1089 = vst.msk [vmem:[#allocation2] sm:$0x1] %vm1088_vm15, %v3292_v60 }
 0x136   : > { %v4317_v35 = vpop.permute.xlu0 %2915  ;;  %v4319_v36 = vpop.permute.xlu1 %2920  ;;  %934 = vst.msk [vmem:[#allocation2 + $0xe8] sm:$0xff] %vm904_vm11, %v2903_v31  ;;  %3135 = vrot.lane.b32.xlu2 %v3481_v32, %s3295_s15 }
 0x137   : > { %952 = vst.msk [vmem:[#allocation2 + $0xef] sm:$0x1] %vm937_vm12, %v3292_v60  ;;  %v2917_v47 = vunpack.i.l.bf16 %v4317_v35  ;;  %v2918_v48 = vunpack.i.h.bf16 %v4317_v35  ;;  %v2922_v43 = vunpack.i.l.bf16 %v4319_v36  ;;  %v2923_v6 = vunpack.i.h.bf16 %v4319_v36 }
 0x138   : > { %v4433_v50 = vpop.permute.xlu2 %2970  ;;  %1058 = vst.msk [vmem:[#allocation2 + $0x2f] sm:$0xfe] %vm1050_vm13, %v2927_v49 }
 0x139   : > { %1054 = vst.msk [vmem:[#allocation2 + $0xf] sm:$0xfe] %vm1050_vm13, %v2917_v47  ;;  %v2973_v24 = vunpack.i.h.bf16 %v4433_v50 }
 0x13a   : > { %1055 = vst.msk [vmem:[#allocation2 + $0x17] sm:$0xff] %vm1052_vm14, %v2918_v48 }
 0x13b   : > { %1090 = vst.msk [vmem:[#allocation2 + $0x10] sm:$0x1] %vm1088_vm15, %v3292_v60 }
 0x13c   : > { %3140 = vrot.lane.b32.xlu0 %v3481_v32, %s3296_s16  ;;  %3145 = vrot.lane.b32.xlu1 %v3481_v32, %s3297_s25  ;;  %1056 = vst.msk [vmem:[#allocation2 + $0x1f] sm:$0xfe] %vm1050_vm13, %v2922_v43 }
 0x13d   : > { %1057 = vst.msk [vmem:[#allocation2 + $0x27] sm:$0xff] %vm1052_vm14, %v2923_v6 }
 0x13e   : > { %v4348_v10 = vpop.permute.xlu0 %2930  ;;  %v4350_v23 = vpop.permute.xlu1 %2935  ;;  %1091 = vst.msk [vmem:[#allocation2 + $0x20] sm:$0x1] %vm1088_vm15, %v3292_v60  ;;  %3150 = vrot.lane.b32.xlu2 %v3561_v56, %s3294_s14 }
 0x13f   : > { %v2932_v26 = vunpack.i.l.bf16 %v4348_v10  ;;  %v2933_v51 = vunpack.i.h.bf16 %v4348_v10  ;;  %1092 = vst.msk [vmem:[#allocation2 + $0x30] sm:$0x1] %vm1088_vm15, %v3292_v60  ;;  %v2938_v52 = vunpack.i.h.bf16 %v4350_v23  ;;  %v2937_v56 = vunpack.i.l.bf16 %v4350_v23  ;;  %v4498_v36 = vpop.f32.mrf.mxu1 }
 0x140   : > { %v4467_v20 = vpop.permute.xlu2 %2985  ;;  %v2972_v23 = vunpack.i.l.bf16 %v4433_v50  ;;  %v2095_v25 = vsel %vm1700_vm8, %v4498_v36, 0.0 }
 0x141   : > { %1195 = vst.msk [vmem:[#allocation2 + $0x1] sm:$0xff] %vm1085_vm1, %v2932_v26  ;;  %v2988_v40 = vunpack.i.h.bf16 %v4467_v20  ;;  %v2987_v9 = vunpack.i.l.bf16 %v4467_v20 }
 0x142   : > { %1197 = vst.msk [vmem:[#allocation2 + $0x9] sm:$0x7f] %vm1196_vm2, %v2933_v51  ;;  %2451 = vmatmul.msk.bf16.gmra.mxu1 %vm313_vm0, %v3224_v29  ;;  %vm1991_vm0 = vcmask 57344  }
 0x143   : > { %1320 = vst.msk [vmem:[#allocation2 + $0x8] sm:$0xff] %vm1226_vm3, %v2938_v52 }
 0x144   : > { %3155 = vrot.lane.b32.xlu0 %v3575_v59, %s3295_s15  ;;  %3160 = vrot.lane.b32.xlu1 %v3575_v59, %s3296_s16  ;;  %1353 = vst.msk [vmem:[#allocation2 + $0xf] sm:$0x1] %vm1352_vm4, %v3292_v60 }
 0x145   : > { %1319 = vst.msk [vmem:[#allocation2] sm:$0xff] %vm1226_vm3, %v2937_v56 }
 0x146   : > { %v4387_v62 = vpop.permute.xlu0 %2945  ;;  %v4389_v28 = vpop.permute.xlu1 %2950  ;;  %1460 = vst.msk [vmem:[#allocation2 - $0x1] sm:$0xfe] %vm1459_vm5, %v2942_v63  ;;  %3165 = vrot.lane.b32.xlu2 %v3575_v59, %s3297_s25 }
 0x147   : > { %v2947_v1 = vunpack.i.l.bf16 %v4387_v62  ;;  %v2948_v3 = vunpack.i.h.bf16 %v4387_v62  ;;  %v2953_v4 = vunpack.i.h.bf16 %v4389_v28  ;;  %1461 = vst.msk [vmem:[#allocation2 + $0x7] sm:$0xff] %vm1349_vm6, %v2943_v8  ;;  %v2952_v7 = vunpack.i.l.bf16 %v4389_v28  ;;  %v4530_v18 = vpop.f32.mrf.mxu1 }
 0x148   : > { %v4501_v37 = vpop.permute.xlu2 %3000  ;;  %v2096_v0 = vsel %vm1700_vm8, %v4530_v18, 0.0  ;;  %v2166_v33 = vmul.f32 %v4530_v18, %v4530_v18 }
 0x149   : > { %1198 = vst.msk [vmem:[#allocation2 + $0x11] sm:$0xff] %vm1085_vm1, %v2947_v1  ;;  %v2097_v38 = vadd.f32 %v2096_v0, %v2095_v25  ;;  %v3002_v49 = vunpack.i.l.bf16 %v4501_v37  ;;  %v3003_v26 = vunpack.i.h.bf16 %v4501_v37 }
 0x14a   : > { %1199 = vst.msk [vmem:[#allocation2 + $0x19] sm:$0x7f] %vm1196_vm2, %v2948_v3  ;;  %v2198_v28 = vsel %vm1700_vm8, %v2166_v33, 0.0 }
 0x14b   : > { %1322 = vst.msk [vmem:[#allocation2 + $0x18] sm:$0xff] %vm1226_vm3, %v2953_v4 }
 0x14c   : > { %3170 = vrot.lane.b32.xlu0 %v3481_v32, %s3294_s14  ;;  %3175 = vrot.lane.b32.xlu1 %v3509_v41, %s3295_s15  ;;  %v2928_v32 = vunpack.i.h.bf16 %v4333_v21  ;;  %1354 = vst.msk [vmem:[#allocation2 + $0x1f] sm:$0x1] %vm1352_vm4, %v3292_v60 }
 0x14d   : > { %1321 = vst.msk [vmem:[#allocation2 + $0x10] sm:$0xff] %vm1226_vm3, %v2952_v7 }
 0x14e   : > { %v4425_v53 = vpop.permute.xlu0 %2960  ;;  %v4427_v34 = vpop.permute.xlu1 %2965  ;;  %1068 = vst.msk [vmem:[#allocation2 + $0x7f] sm:$0xfe] %vm1050_vm13, %v2928_v32  ;;  %v1490_v12 = vld [vmem:[#allocation2] sm:$0xff]  ;;  %v1491_v16 = vld [vmem:[#allocation2 + $0x8] sm:$0xff]  ;;  %3180 = vrot.lane.b32.xlu2 %v3509_v41, %s3296_s16 }
 0x14f   : > { %1097 = vst.msk [vmem:[#allocation2 + $0x80] sm:$0x1] %vm1088_vm15, %v3292_v60  ;;  %v2963_v35 = vunpack.i.h.bf16 %v4425_v53  ;;  %v2967_v42 = vunpack.i.l.bf16 %v4427_v34  ;;  %v1522_v21 = vpack.c.bf16 %v1491_v16, %v1490_v12  ;;  %v2968_v22 = vunpack.i.h.bf16 %v4427_v34  ;;  %v4561_v48 = vpop.f32.mrf.mxu1 }
 0x150   : > { %1462 = vst.msk [vmem:[#allocation2 + $0xf] sm:$0xfe] %vm1459_vm5, %v2957_v11  ;;  %v4546_v62 = vpop.permute.xlu2 %3015  ;;  %v2167_v34 = vmul.f32 %v4561_v48, %v4561_v48 }
 0x151   : > { %1463 = vst.msk [vmem:[#allocation2 + $0x17] sm:$0xff] %vm1349_vm6, %v2958_v13  ;;  %2427 = vmatmul.msk.bf16.vlgmr.msra.gmra.mxu0 %vm1558_vm7, %v1522_v21  ;;  %v3017_v11 = vunpack.i.l.bf16 %v4546_v62  ;;  %v3018_v13 = vunpack.i.h.bf16 %v4546_v62 }
 0x152   : > { %1070 = vst.msk [vmem:[#allocation2 + $0x8f] sm:$0xfe] %vm1050_vm13, %v2963_v35 }
 0x153   : > { %1098 = vst.msk [vmem:[#allocation2 + $0x90] sm:$0x1] %vm1088_vm15, %v3292_v60 }
 0x154   : > { %3185 = vrot.lane.b32.xlu0 %v3509_v41, %s3297_s25  ;;  %3190 = vrot.lane.b32.xlu1 %v3575_v59, %s3294_s14  ;;  %v2962_v59 = vunpack.i.l.bf16 %v4425_v53  ;;  %v2165_v41 = vmul.f32 %v4498_v36, %v4498_v36  ;;  %v2098_v53 = vsel %vm1700_vm8, %v4561_v48, 0.0 }
 0x155   : > { %v2099_v50 = vadd.f32 %v2098_v53, %v2097_v38 }
 0x156   : > { %v4453_v54 = vpop.permute.xlu0 %2975  ;;  %v4455_v57 = vpop.permute.xlu1 %2980  ;;  %1069 = vst.msk [vmem:[#allocation2 + $0x87] sm:$0xff] %vm1052_vm14, %v2962_v59  ;;  %v2197_v31 = vsel %vm1700_vm8, %v2165_v41, 0.0  ;;  %3195 = vrot.lane.b32.xlu2 %v3727_v15, %s3295_s15  ;;  %s4585_s15 = scalar_lea.vmem %s5306_s4, %s2464_s9  ;;  %s3239_s9 = sshra.s32 %s2299_s11, 4  ;;  %s3240_s9 = int_to_ptr.hbm [resolvable:$true] %s3239_s9 }
 0x157   : > { %1212 = vst.msk [vmem:[#allocation2 + $0x81] sm:$0xff] %vm1085_vm1, %v2967_v42  ;;  %v2977_v61 = vunpack.i.l.bf16 %v4453_v54  ;;  %v2978_v19 = vunpack.i.h.bf16 %v4453_v54  ;;  %v2982_v39 = vunpack.i.l.bf16 %v4455_v57  ;;  %v2983_v14 = vunpack.i.h.bf16 %v4455_v57  ;;  %v4596_v1 = vpop.f32.mrf.mxu1  ;;  %s3241_s12 = scalar_lea.hbm %s3240_s9, 4  ;;  %p3246_p0 = scmp.lt.s32.totalorder %s3240_s9, %s5307_s5 }
 0x158   : > { %1213 = vst.msk [vmem:[#allocation2 + $0x89] sm:$0x7f] %vm1196_vm2, %v2968_v22  ;;  %v2199_v45 = vadd.f32 %v2198_v28, %v2197_v31  ;;  %v1492_v17 = vld [vmem:[#allocation2 + $0x10] sm:$0xff]  ;;  %v1493_v46 = vld [vmem:[#allocation2 + $0x18] sm:$0xff]  ;;  %v2200_v54 = vsel %vm1700_vm8, %v2167_v34, 0.0  ;;  %v3031_v63 = vpop.permute.xlu2 %3030  ;;  %v2168_v7 = vmul.f32 %v4596_v1, %v4596_v1  ;;  %p3242_p11 = scmp.ne.s32.totalorder %s3240_s9, %s3241_s12 }
 0x159   : > { %1336 = vst.msk [vmem:[#allocation2 + $0x88] sm:$0xff] %vm1226_vm3, %v2973_v24  ;;  %v1523_v32 = vpack.c.bf16 %v1493_v46, %v1492_v17  ;;  %v3033_v25 = vunpack.i.h.bf16 %v3031_v63 }
 0x15a   : > { %1361 = vst.msk [vmem:[#allocation2 + $0x8f] sm:$0x1] %vm1352_vm4, %v3292_v60  ;;  %v2201_v58 = vadd.f32 %v2200_v54, %v2199_v45  ;;  %v2202_v35 = vsel %vm1700_vm8, %v2168_v7, 0.0  ;;  %p3243_p12 = pnand %p3242_p11, %p3366_p5 }
 0x15b   : > { %1335 = vst.msk [vmem:[#allocation2 + $0x80] sm:$0xff] %vm1226_vm3, %v2972_v23 }
 0x15c   : > { %3200 = vrot.lane.b32.xlu0 %v3727_v15, %s3296_s16  ;;  %3205 = vrot.lane.b32.xlu1 %v3727_v15, %s3297_s25  ;;  %1476 = vst.msk [vmem:[#allocation2 + $0x7f] sm:$0xfe] %vm1459_vm5, %v2977_v61  ;;  %s5124_s25 = scalar_lea.vmem [#allocation3], %s2412_s23  ;;  %p3244_p13 = pneg %p3243_p12 }
 0x15d   : > { %1477 = vst.msk [vmem:[#allocation2 + $0x87] sm:$0xff] %vm1349_vm6, %v2978_v19  ;;  %s2296_s10 = sshll.u32 %s5124_s25, 4  ;;  %s2297_s10 = int_to_ptr.vmem [resolvable:$true] %s2296_s10 }
 0x15e   : > { %v4483_v5 = vpop.permute.xlu0 %2990  ;;  %v4489_v55 = vpop.permute.xlu1 %2995  ;;  %1200 = vst.msk [vmem:[#allocation2 + $0x21] sm:$0xff] %vm1085_vm1, %v2982_v39  ;;  %3210 = vrot.lane.b32.xlu2 %v3727_v15, %s3294_s14  ;;  %s3245_s14 = scalar_lea.hbm %s5307_s5, 8 }
 0x15f   : > { %1201 = vst.msk [vmem:[#allocation2 + $0x29] sm:$0x7f] %vm1196_vm2, %v2983_v14  ;;  %v2992_v44 = vunpack.i.l.bf16 %v4483_v5  ;;  %v2993_v30 = vunpack.i.h.bf16 %v4483_v5  ;;  %v2998_v47 = vunpack.i.h.bf16 %v4489_v55  ;;  %v2997_v43 = vunpack.i.l.bf16 %v4489_v55  ;;  %v4622_v22 = vpop.f32.mrf.mxu1  ;;  %p3247_p1 = scmp.lt.s32.totalorder %s3245_s14, %s3241_s12 }
 0x160   : > { %1324 = vst.msk [vmem:[#allocation2 + $0x28] sm:$0xff] %vm1226_vm3, %v2988_v40  ;;  %v2100_v5 = vsel %vm1700_vm8, %v4596_v1, 0.0  ;;  %v3046_v16 = vpop.permute.xlu2 %3045  ;;  %v2102_v24 = vsel %vm1700_vm8, %v4622_v22, 0.0  ;;  %v2169_v41 = vmul.f32 %v4622_v22, %v4622_v22 }
 0x161   : > { %1355 = vst.msk [vmem:[#allocation2 + $0x2f] sm:$0x1] %vm1352_vm4, %v3292_v60  ;;  %2428 = vmatmul.msk.bf16.gmra.mxu0 %vm1558_vm7, %v1523_v32  ;;  %v2101_v55 = vadd.f32 %v2100_v5, %v2099_v50  ;;  %v3048_v46 = vunpack.i.h.bf16 %v3046_v16  ;;  %p3248_p2 = por %p3247_p1, %p3246_p0 }
 0x162   : > { %1323 = vst.msk [vmem:[#allocation2 + $0x20] sm:$0xff] %vm1226_vm3, %v2987_v9  ;;  %v2204_v19 = vsel %vm1700_vm8, %v2169_v41, 0.0 }
 0x163   : > { %1464 = vst.msk [vmem:[#allocation2 + $0x1f] sm:$0xfe] %vm1459_vm5, %v2992_v44  ;;  %v2103_v23 = vadd.f32 %v2102_v24, %v2101_v55  ;;  %p3249_p3 = pnand %p3248_p2, %p3244_p13 }
 0x164   : > { %1465 = vst.msk [vmem:[#allocation2 + $0x27] sm:$0xff] %vm1349_vm6, %v2993_v30  ;;  %v1506_v51 = vld [vmem:[#allocation2 + $0x80] sm:$0xff]  ;;  %v1507_v52 = vld [vmem:[#allocation2 + $0x88] sm:$0xff] }
 0x165   : > { %1059 = vst.msk [vmem:[#allocation2 + $0x37] sm:$0xff] %vm1052_vm14, %v2998_v47  ;;  %v1530_v57 = vpack.c.bf16 %v1507_v52, %v1506_v51 }
 0x166   : > { %v4518_v10 = vpop.permute.xlu0 %3005  ;;  %v4526_v27 = vpop.permute.xlu1 %3010  ;;  %1071 = vst.msk [vmem:[#allocation2 + $0x97] sm:$0xff] %vm1052_vm14, %v2997_v43 }
 0x167   : > { %v3008_v56 = vunpack.i.h.bf16 %v4518_v10  ;;  %1214 = vst.msk [vmem:[#allocation2 + $0x91] sm:$0xff] %vm1085_vm1, %v3002_v49  ;;  %2435 = vmatmul.msk.bf16.vlgmr.msra.gmra.mxu2 %vm1558_vm7, %v1530_v57  ;;  %v3007_v8 = vunpack.i.l.bf16 %v4518_v10  ;;  %v3012_v20 = vunpack.i.l.bf16 %v4526_v27  ;;  %v3013_v3 = vunpack.i.h.bf16 %v4526_v27  ;;  %v4642_v62 = vpop.f32.mrf.mxu1 }
 0x168   : > { %1215 = vst.msk [vmem:[#allocation2 + $0x99] sm:$0x7f] %vm1196_vm2, %v3003_v26  ;;  %v3032_v10 = vunpack.i.l.bf16 %v3031_v63  ;;  %v3061_v28 = vpop.permute.xlu2 %3060  ;;  %v2104_v45 = vsel %vm1700_vm8, %v4642_v62, 0.0  ;;  %v2170_v9 = vmul.f32 %v4642_v62, %v4642_v62 }
 0x169   : > { %1890 = vst.msk [vmem:[%s4585_s15] sm:$0xff] %vm1700_vm8, %v4498_v36  ;;  %v2203_v36 = vadd.f32 %v2202_v35, %v2201_v58  ;;  %v2105_v30 = vadd.f32 %v2104_v45, %v2103_v23  ;;  %v3063_v58 = vunpack.i.h.bf16 %v3061_v28 }
 0x16a   : > { %1338 = vst.msk [vmem:[#allocation2 + $0x98] sm:$0xff] %vm1226_vm3, %v3008_v56  ;;  %v2206_v17 = vsel %vm1700_vm8, %v2170_v9, 0.0 }
 0x16b   : > { %1362 = vst.msk [vmem:[#allocation2 + $0x9f] sm:$0x1] %vm1352_vm4, %v3292_v60  ;;  %v1494_v42 = vld [vmem:[#allocation2 + $0x20] sm:$0xff]  ;;  %v1495_v21 = vld [vmem:[#allocation2 + $0x28] sm:$0xff]  ;;  %v2205_v31 = vadd.f32 %v2204_v19, %v2203_v36 }
 0x16c   : > { %1337 = vst.msk [vmem:[#allocation2 + $0x90] sm:$0xff] %vm1226_vm3, %v3007_v8  ;;  %v1524_v61 = vpack.c.bf16 %v1495_v21, %v1494_v42 }
 0x16d   : > { %1478 = vst.msk [vmem:[#allocation2 + $0x8f] sm:$0xfe] %vm1459_vm5, %v3012_v20  ;;  %v2207_v47 = vadd.f32 %v2206_v17, %v2205_v31  ;;  %v3062_v20 = vunpack.i.l.bf16 %v3061_v28 }
 0x16e   : > { %v4556_v2 = vpop.permute.xlu0 %3020  ;;  %v4565_v6 = vpop.permute.xlu1 %3025  ;;  %1479 = vst.msk [vmem:[#allocation2 + $0x97] sm:$0xff] %vm1349_vm6, %v3013_v3 }
 0x16f   : > { %v3023_v37 = vunpack.i.h.bf16 %v4556_v2  ;;  %1202 = vst.msk [vmem:[#allocation2 + $0x31] sm:$0xff] %vm1085_vm1, %v3017_v11  ;;  %v3022_v12 = vunpack.i.l.bf16 %v4556_v2  ;;  %v3027_v15 = vunpack.i.l.bf16 %v4565_v6  ;;  %v3028_v29 = vunpack.i.h.bf16 %v4565_v6  ;;  %v4660_v50 = vpop.f32.mrf.mxu1 }
 0x170   : > { %1203 = vst.msk [vmem:[#allocation2 + $0x39] sm:$0x7f] %vm1196_vm2, %v3018_v13  ;;  %v3047_v2 = vunpack.i.l.bf16 %v3046_v16  ;;  %v2106_v51 = vsel %vm1700_vm8, %v4660_v50, 0.0  ;;  %v2171_v52 = vmul.f32 %v4660_v50, %v4660_v50  ;;  %v3076_v56 = vpop.permute.xlu2 %3075 }
 0x171   : > { %1891 = vst.msk [vmem:[%s4585_s15 + $0x8] sm:$0xff] %vm1700_vm8, %v4530_v18  ;;  %2429 = vmatmul.msk.bf16.gmra.mxu0 %vm1558_vm7, %v1524_v61  ;;  %v4670_v57 = vadd.f32 %v2106_v51, %v2105_v30  ;;  %v3077_v36 = vunpack.i.l.bf16 %v3076_v56 }
 0x172   : > { %1326 = vst.msk [vmem:[#allocation2 + $0x38] sm:$0xff] %vm1226_vm3, %v3023_v37  ;;  %v2208_v63 = vsel %vm1700_vm8, %v2171_v52, 0.0  ;;  %v4693_v37 = vpop.f32.mrf.mxu3 }
 0x173   : > { %1356 = vst.msk [vmem:[#allocation2 + $0x3f] sm:$0x1] %vm1352_vm4, %v3292_v60  ;;  %v4676_v8 = vadd.f32 %v2208_v63, %v2207_v47 }
 0x174   : > { %1325 = vst.msk [vmem:[#allocation2 + $0x30] sm:$0xff] %vm1226_vm3, %v3022_v12  ;;  %v3078_v12 = vunpack.i.h.bf16 %v3076_v56 }
 0x175   : > { %1466 = vst.msk [vmem:[#allocation2 + $0x2f] sm:$0xfe] %vm1459_vm5, %v3027_v15  ;;  %v1508_v18 = vld [vmem:[#allocation2 + $0x90] sm:$0xff]  ;;  %v1509_v39 = vld [vmem:[#allocation2 + $0x98] sm:$0xff] }
 0x176   : > { %v3036_v4 = vpop.permute.xlu0 %3035  ;;  %v3041_v59 = vpop.permute.xlu1 %3040  ;;  %1467 = vst.msk [vmem:[#allocation2 + $0x37] sm:$0xff] %vm1349_vm6, %v3028_v29  ;;  %v1531_v0 = vpack.c.bf16 %v1509_v39, %v1508_v18 }
 0x177   : > { %1072 = vst.msk [vmem:[#allocation2 + $0x9f] sm:$0xfe] %vm1050_vm13, %v3032_v10  ;;  %v3037_v14 = vunpack.i.l.bf16 %v3036_v4  ;;  %v3038_v38 = vunpack.i.h.bf16 %v3036_v4  ;;  %v3043_v40 = vunpack.i.h.bf16 %v3041_v59  ;;  %v3042_v44 = vunpack.i.l.bf16 %v3041_v59  ;;  %v4684_v55 = vpop.f32.mrf.mxu1 }
 0x178   : > { %1073 = vst.msk [vmem:[#allocation2 + $0xa7] sm:$0xff] %vm1052_vm14, %v3033_v25  ;;  %2436 = vmatmul.msk.bf16.gmra.mxu2 %vm1558_vm7, %v1531_v0  ;;  %v3091_v16 = vpop.permute.xlu2 %3090 }
 0x179   : > { %1099 = vst.msk [vmem:[#allocation2 + $0xa0] sm:$0x1] %vm1088_vm15, %v3292_v60  ;;  %v3092_v61 = vunpack.i.l.bf16 %v3091_v16  ;;  %v3093_v19 = vunpack.i.h.bf16 %v3091_v16 }
 0x17a   : > { %1892 = vst.msk [vmem:[%s4585_s15 + $0x10] sm:$0xff] %vm1700_vm8, %v4561_v48 }
 0x17b   : > { %1216 = vst.msk [vmem:[#allocation2 + $0xa1] sm:$0xff] %vm1085_vm1, %v3037_v14 }
 0x17c   : > { %1217 = vst.msk [vmem:[#allocation2 + $0xa9] sm:$0x7f] %vm1196_vm2, %v3038_v38 }
 0x17d   : > { %1340 = vst.msk [vmem:[#allocation2 + $0xa8] sm:$0xff] %vm1226_vm3, %v3043_v40  ;;  %v1496_v43 = vld [vmem:[#allocation2 + $0x30] sm:$0xff]  ;;  %v1497_v6 = vld [vmem:[#allocation2 + $0x38] sm:$0xff] }
 0x17e   : > { %v3051_v27 = vpop.permute.xlu0 %3050  ;;  %v3056_v33 = vpop.permute.xlu1 %3055  ;;  %1363 = vst.msk [vmem:[#allocation2 + $0xaf] sm:$0x1] %vm1352_vm4, %v3292_v60  ;;  %v1525_v32 = vpack.c.bf16 %v1497_v6, %v1496_v43 }
 0x17f   : > { %1339 = vst.msk [vmem:[#allocation2 + $0xa0] sm:$0xff] %vm1226_vm3, %v3042_v44  ;;  %v3052_v53 = vunpack.i.l.bf16 %v3051_v27  ;;  %v3053_v34 = vunpack.i.h.bf16 %v3051_v27  ;;  %v3057_v26 = vunpack.i.l.bf16 %v3056_v33  ;;  %v3058_v54 = vunpack.i.h.bf16 %v3056_v33  ;;  %v4700_v21 = vpop.f32.mrf.mxu1  ;;  %v4709_v27 = vpop.f32.mrf.mxu3 }
 0x180   : > { %1480 = vst.msk [vmem:[#allocation2 + $0x9f] sm:$0xfe] %vm1459_vm5, %v3047_v2  ;;  %v3106_v18 = vpop.permute.xlu2 %3105 }
 0x181   : > { %1481 = vst.msk [vmem:[#allocation2 + $0xa7] sm:$0xff] %vm1349_vm6, %v3048_v46  ;;  %2430 = vmatmul.msk.bf16.gmra.mxu0 %vm1558_vm7, %v1525_v32  ;;  %v3107_v40 = vunpack.i.l.bf16 %v3106_v18  ;;  %v3108_v28 = vunpack.i.h.bf16 %v3106_v18  ;;  %v2110_v18 = vsel %vm1700_vm8, %v4700_v21, 0.0 }
 0x182   : > { %1893 = vst.msk [vmem:[%s4585_s15 + $0x18] sm:$0xff] %vm1700_vm8, %v4596_v1 }
 0x183   : > { %1060 = vst.msk [vmem:[#allocation2 + $0x3f] sm:$0xfe] %vm1050_vm13, %v3052_v53 }
 0x184   : > { %1061 = vst.msk [vmem:[#allocation2 + $0x47] sm:$0xff] %vm1052_vm14, %v3053_v34 }
 0x185   : > { %1093 = vst.msk [vmem:[#allocation2 + $0x40] sm:$0x1] %vm1088_vm15, %v3292_v60 }
 0x186   : > { %v3066_v48 = vpop.permute.xlu0 %3065  ;;  %v3071_v49 = vpop.permute.xlu1 %3070  ;;  %1204 = vst.msk [vmem:[#allocation2 + $0x41] sm:$0xff] %vm1085_vm1, %v3057_v26 }
 0x187   : > { %1205 = vst.msk [vmem:[#allocation2 + $0x49] sm:$0x7f] %vm1196_vm2, %v3058_v54  ;;  %v3067_v4 = vunpack.i.l.bf16 %v3066_v48  ;;  %v3068_v11 = vunpack.i.h.bf16 %v3066_v48  ;;  %v3072_v13 = vunpack.i.l.bf16 %v3071_v49  ;;  %v3073_v35 = vunpack.i.h.bf16 %v3071_v49  ;;  %v4716_v31 = vpop.f32.mrf.mxu1  ;;  %v4727_v44 = vpop.f32.mrf.mxu3 }
 0x188   : > { %1328 = vst.msk [vmem:[#allocation2 + $0x48] sm:$0xff] %vm1226_vm3, %v3063_v58  ;;  %v1510_v1 = vld [vmem:[#allocation2 + $0xa0] sm:$0xff]  ;;  %v1511_v3 = vld [vmem:[#allocation2 + $0xa8] sm:$0xff]  ;;  %v3121_v47 = vpop.permute.xlu2 %3120 }
 0x189   : > { %1357 = vst.msk [vmem:[#allocation2 + $0x4f] sm:$0x1] %vm1352_vm4, %v3292_v60  ;;  %v1532_v7 = vpack.c.bf16 %v1511_v3, %v1510_v1  ;;  %v3123_v6 = vunpack.i.h.bf16 %v3121_v47  ;;  %v3122_v34 = vunpack.i.l.bf16 %v3121_v47 }
 0x18a   : > { %1327 = vst.msk [vmem:[#allocation2 + $0x40] sm:$0xff] %vm1226_vm3, %v3062_v20 }
 0x18b   : > { %2437 = vmatmul.msk.bf16.gmra.mxu2 %vm1558_vm7, %v1532_v7  ;;  %1894 = vst.msk [vmem:[%s4585_s15 + $0x20] sm:$0xff] %vm1700_vm8, %v4622_v22 }
 0x18c   : > { %1468 = vst.msk [vmem:[#allocation2 + $0x3f] sm:$0xfe] %vm1459_vm5, %v3067_v4 }
 0x18d   : > { %1469 = vst.msk [vmem:[#allocation2 + $0x47] sm:$0xff] %vm1349_vm6, %v3068_v11 }
 0x18e   : > { %v3081_v5 = vpop.permute.xlu0 %3080  ;;  %v3086_v59 = vpop.permute.xlu1 %3085  ;;  %1074 = vst.msk [vmem:[#allocation2 + $0xaf] sm:$0xfe] %vm1050_vm13, %v3072_v13 }
 0x18f   : > { %1075 = vst.msk [vmem:[#allocation2 + $0xb7] sm:$0xff] %vm1052_vm14, %v3073_v35  ;;  %v3083_v42 = vunpack.i.h.bf16 %v3081_v5  ;;  %v3082_v15 = vunpack.i.l.bf16 %v3081_v5  ;;  %v3087_v29 = vunpack.i.l.bf16 %v3086_v59  ;;  %v3088_v24 = vunpack.i.h.bf16 %v3086_v59  ;;  %v4732_v17 = vpop.f32.mrf.mxu1 }
 0x190   : > { %1100 = vst.msk [vmem:[#allocation2 + $0xb0] sm:$0x1] %vm1088_vm15, %v3292_v60  ;;  %v3136_v56 = vpop.permute.xlu2 %3135 }
 0x191   : > { %1218 = vst.msk [vmem:[#allocation2 + $0xb1] sm:$0xff] %vm1085_vm1, %v3077_v36  ;;  %v3137_v1 = vunpack.i.l.bf16 %v3136_v56  ;;  %v3138_v5 = vunpack.i.h.bf16 %v3136_v56  ;;  %v2172_v36 = vmul.f32 %v4684_v55, %v4684_v55 }
 0x192   : > { %1219 = vst.msk [vmem:[#allocation2 + $0xb9] sm:$0x7f] %vm1196_vm2, %v3078_v12 }
 0x193   : > { %1895 = vst.msk [vmem:[%s4585_s15 + $0x28] sm:$0xff] %vm1700_vm8, %v4642_v62 }
 0x194   : > { %1342 = vst.msk [vmem:[#allocation2 + $0xb8] sm:$0xff] %vm1226_vm3, %v3083_v42  ;;  %v1498_v41 = vld [vmem:[#allocation2 + $0x40] sm:$0xff]  ;;  %v1499_v10 = vld [vmem:[#allocation2 + $0x48] sm:$0xff] }
 0x195   : > { %1364 = vst.msk [vmem:[#allocation2 + $0xbf] sm:$0x1] %vm1352_vm4, %v3292_v60  ;;  %v1526_v25 = vpack.c.bf16 %v1499_v10, %v1498_v41 }
 0x196   : > { %v3096_v22 = vpop.permute.xlu0 %3095  ;;  %v3101_v23 = vpop.permute.xlu1 %3100  ;;  %1341 = vst.msk [vmem:[#allocation2 + $0xb0] sm:$0xff] %vm1226_vm3, %v3082_v15 }
 0x197   : > { %1482 = vst.msk [vmem:[#allocation2 + $0xaf] sm:$0xfe] %vm1459_vm5, %v3087_v29  ;;  %2431 = vmatmul.msk.bf16.gmra.mxu0 %vm1558_vm7, %v1526_v25  ;;  %v3097_v39 = vunpack.i.l.bf16 %v3096_v22  ;;  %v3098_v0 = vunpack.i.h.bf16 %v3096_v22  ;;  %v3103_v33 = vunpack.i.h.bf16 %v3101_v23  ;;  %v3102_v38 = vunpack.i.l.bf16 %v3101_v23  ;;  %v4749_v51 = vpop.f32.mrf.mxu1 }
 0x198   : > { %1483 = vst.msk [vmem:[#allocation2 + $0xb7] sm:$0xff] %vm1349_vm6, %v3088_v24  ;;  %v3151_v35 = vpop.permute.xlu2 %3150  ;;  %v2108_v29 = vsel %vm1700_vm8, %v4684_v55, 0.0  ;;  %v2173_v25 = vmul.f32 %v4700_v21, %v4700_v21 }
 0x199   : > { %1062 = vst.msk [vmem:[#allocation2 + $0x4f] sm:$0xfe] %vm1050_vm13, %v3092_v61  ;;  %v3152_v24 = vunpack.i.l.bf16 %v3151_v35  ;;  %v3153_v41 = vunpack.i.h.bf16 %v3151_v35  ;;  %v2210_v61 = vsel %vm1700_vm8, %v2172_v36, 0.0 }
 0x19a   : > { %1063 = vst.msk [vmem:[#allocation2 + $0x57] sm:$0xff] %vm1052_vm14, %v3093_v19 }
 0x19b   : > { %1094 = vst.msk [vmem:[#allocation2 + $0x50] sm:$0x1] %vm1088_vm15, %v3292_v60 }
 0x19c   : > { %1896 = vst.msk [vmem:[%s4585_s15 + $0x30] sm:$0xff] %vm1700_vm8, %v4660_v50  ;;  %v4745_v50 = vpop.f32.mrf.mxu3 }
 0x19d   : > { %1206 = vst.msk [vmem:[#allocation2 + $0x51] sm:$0xff] %vm1085_vm1, %v3097_v39  ;;  %v2211_v39 = vadd.f32 %v2210_v61, %v4676_v8 }
 0x19e   : > { %v3111_v14 = vpop.permute.xlu0 %3110  ;;  %1207 = vst.msk [vmem:[#allocation2 + $0x59] sm:$0x7f] %vm1196_vm2, %v3098_v0  ;;  %v3116_v62 = vpop.permute.xlu1 %3115 }
 0x19f   : > { %1330 = vst.msk [vmem:[#allocation2 + $0x58] sm:$0xff] %vm1226_vm3, %v3103_v33  ;;  %v1512_v45 = vld [vmem:[#allocation2 + $0xb0] sm:$0xff]  ;;  %v1513_v9 = vld [vmem:[#allocation2 + $0xb8] sm:$0xff]  ;;  %v3112_v2 = vunpack.i.l.bf16 %v3111_v14  ;;  %v3113_v46 = vunpack.i.h.bf16 %v3111_v14  ;;  %v3117_v48 = vunpack.i.l.bf16 %v3116_v62  ;;  %v3118_v43 = vunpack.i.h.bf16 %v3116_v62  ;;  %v4770_v13 = vpop.f32.mrf.mxu1 }
 0x1a0   : > { %1358 = vst.msk [vmem:[#allocation2 + $0x5f] sm:$0x1] %vm1352_vm4, %v3292_v60  ;;  %v1533_v30 = vpack.c.bf16 %v1513_v9, %v1512_v45  ;;  %v2212_v14 = vsel %vm1700_vm8, %v2173_v25, 0.0  ;;  %v3166_v8 = vpop.permute.xlu2 %3165  ;;  %v2112_v62 = vsel %vm1700_vm8, %v4716_v31, 0.0  ;;  %v2118_v36 = vsel %vm1700_vm8, %v4770_v13, 0.0 }
 0x1a1   : > { %1329 = vst.msk [vmem:[#allocation2 + $0x50] sm:$0xff] %vm1226_vm3, %v3102_v38 }
 0x1a2   : > { %1470 = vst.msk [vmem:[#allocation2 + $0x4f] sm:$0xfe] %vm1459_vm5, %v3107_v40  ;;  %2438 = vmatmul.msk.bf16.gmra.mxu2 %vm1558_vm7, %v1533_v30  ;;  %v2175_v30 = vmul.f32 %v4732_v17, %v4732_v17 }
 0x1a3   : > { %1471 = vst.msk [vmem:[#allocation2 + $0x57] sm:$0xff] %vm1349_vm6, %v3108_v28  ;;  %v2213_v28 = vadd.f32 %v2212_v14, %v2211_v39 }
 0x1a4   : > { %1897 = vst.msk [vmem:[%s4585_s15 + $0x38] sm:$0xff] %vm1700_vm8, %v4684_v55  ;;  %v4763_v4 = vpop.f32.mrf.mxu3  ;;  %v2109_v55 = vadd.f32 %v2108_v29, %v4670_v57  ;;  %v2174_v57 = vmul.f32 %v4716_v31, %v4716_v31 }
 0x1a5   : > { %1076 = vst.msk [vmem:[#allocation2 + $0xbf] sm:$0xfe] %vm1050_vm13, %v3112_v2  ;;  %v3167_v2 = vunpack.i.l.bf16 %v3166_v8 }
 0x1a6   : > { %1077 = vst.msk [vmem:[#allocation2 + $0xc7] sm:$0xff] %vm1052_vm14, %v3113_v46  ;;  %v3126_v53 = vpop.permute.xlu0 %3125  ;;  %v3131_v49 = vpop.permute.xlu1 %3130  ;;  %v2111_v40 = vadd.f32 %v2110_v18, %v2109_v55  ;;  %v2214_v9 = vsel %vm1700_vm8, %v2174_v57, 0.0 }
 0x1a7   : > { %1101 = vst.msk [vmem:[#allocation2 + $0xc0] sm:$0x1] %vm1088_vm15, %v3292_v60  ;;  %v3127_v54 = vunpack.i.l.bf16 %v3126_v53  ;;  %v3128_v58 = vunpack.i.h.bf16 %v3126_v53  ;;  %v3132_v63 = vunpack.i.l.bf16 %v3131_v49  ;;  %v3133_v20 = vunpack.i.h.bf16 %v3131_v49  ;;  %v4801_v33 = vpop.f32.mrf.mxu1 }
 0x1a8   : > { %1220 = vst.msk [vmem:[#allocation2 + $0xc1] sm:$0xff] %vm1085_vm1, %v3117_v48  ;;  %v2113_v48 = vadd.f32 %v2112_v62, %v2111_v40  ;;  %v2215_v49 = vadd.f32 %v2214_v9, %v2213_v28  ;;  %v2120_v55 = vsel %vm1700_vm8, %v4801_v33, 0.0 }
 0x1a9   : > { %1221 = vst.msk [vmem:[#allocation2 + $0xc9] sm:$0x7f] %vm1196_vm2, %v3118_v43 }
 0x1aa   : > { %1344 = vst.msk [vmem:[#allocation2 + $0xc8] sm:$0xff] %vm1226_vm3, %v3123_v6  ;;  %v1500_v32 = vld [vmem:[#allocation2 + $0x50] sm:$0xff]  ;;  %v1501_v26 = vld [vmem:[#allocation2 + $0x58] sm:$0xff] }
 0x1ab   : > { %1365 = vst.msk [vmem:[#allocation2 + $0xcf] sm:$0x1] %vm1352_vm4, %v3292_v60  ;;  %v1527_v52 = vpack.c.bf16 %v1501_v26, %v1500_v32  ;;  %v2216_v26 = vsel %vm1700_vm8, %v2175_v30, 0.0 }
 0x1ac   : > { %1343 = vst.msk [vmem:[#allocation2 + $0xc0] sm:$0xff] %vm1226_vm3, %v3122_v34  ;;  %v4788_v23 = vpop.f32.mrf.mxu3  ;;  %v2114_v34 = vsel %vm1700_vm8, %v4732_v17, 0.0 }
 0x1ad   : > { %1908 = vst.msk [vmem:[%s4585_s15 + $0x90] sm:$0xff] %vm1700_vm8, %v4693_v37  ;;  %2432 = vmatmul.msk.bf16.gmra.mxu0 %vm1558_vm7, %v1527_v52  ;;  %v2176_v52 = vmul.f32 %v4749_v51, %v4749_v51 }
 0x1ae   : > { %1898 = vst.msk [vmem:[%s4585_s15 + $0x40] sm:$0xff] %vm1700_vm8, %v4700_v21  ;;  %v3141_v3 = vpop.permute.xlu0 %3140  ;;  %v3146_v7 = vpop.permute.xlu1 %3145 }
 0x1af   : > { %1484 = vst.msk [vmem:[#allocation2 + $0xbf] sm:$0xfe] %vm1459_vm5, %v3127_v54  ;;  %v3143_v11 = vunpack.i.h.bf16 %v3141_v3  ;;  %v3142_v59 = vunpack.i.l.bf16 %v3141_v3  ;;  %v3147_v12 = vunpack.i.l.bf16 %v3146_v7  ;;  %v3148_v15 = vunpack.i.h.bf16 %v3146_v7  ;;  %v4835_v56 = vpop.f32.mrf.mxu1  ;;  %v3181_v3 = vpop.permute.xlu2 %3180 }
 0x1b0   : > { %1485 = vst.msk [vmem:[#allocation2 + $0xc7] sm:$0xff] %vm1349_vm6, %v3128_v58  ;;  %v2115_v58 = vadd.f32 %v2114_v34, %v2113_v48  ;;  %v2122_v28 = vsel %vm1700_vm8, %v4835_v56, 0.0 }
 0x1b1   : > { %1064 = vst.msk [vmem:[#allocation2 + $0x5f] sm:$0xfe] %vm1050_vm13, %v3132_v63  ;;  %v2116_v63 = vsel %vm1700_vm8, %v4749_v51, 0.0 }
 0x1b2   : > { %1065 = vst.msk [vmem:[#allocation2 + $0x67] sm:$0xff] %vm1052_vm14, %v3133_v20  ;;  %v2217_v20 = vadd.f32 %v2216_v26, %v2215_v49 }
 0x1b3   : > { %1095 = vst.msk [vmem:[#allocation2 + $0x60] sm:$0x1] %vm1088_vm15, %v3292_v60 }
 0x1b4   : > { %1208 = vst.msk [vmem:[#allocation2 + $0x61] sm:$0xff] %vm1085_vm1, %v3137_v1  ;;  %v4822_v53 = vpop.f32.mrf.mxu3 }
 0x1b5   : > { %1209 = vst.msk [vmem:[#allocation2 + $0x69] sm:$0x7f] %vm1196_vm2, %v3138_v5  ;;  %v2218_v5 = vsel %vm1700_vm8, %v2176_v52, 0.0 }
 0x1b6   : > { %1909 = vst.msk [vmem:[%s4585_s15 + $0x98] sm:$0xff] %vm1700_vm8, %v4709_v27  ;;  %v3156_v10 = vpop.permute.xlu0 %3155  ;;  %v3161_v19 = vpop.permute.xlu1 %3160 }
 0x1b7   : > { %1899 = vst.msk [vmem:[%s4585_s15 + $0x48] sm:$0xff] %vm1700_vm8, %v4716_v31  ;;  %v1514_v16 = vld [vmem:[#allocation2 + $0xc0] sm:$0xff]  ;;  %v1515_v42 = vld [vmem:[#allocation2 + $0xc8] sm:$0xff]  ;;  %v3157_v0 = vunpack.i.l.bf16 %v3156_v10  ;;  %v3158_v38 = vunpack.i.h.bf16 %v3156_v10  ;;  %v3163_v21 = vunpack.i.h.bf16 %v3161_v19  ;;  %v3162_v45 = vunpack.i.l.bf16 %v3161_v19  ;;  %v4870_v39 = vpop.f32.mrf.mxu1  ;;  %v3196_v62 = vpop.permute.xlu2 %3195 }
 0x1b8   : > { %1332 = vst.msk [vmem:[#allocation2 + $0x68] sm:$0xff] %vm1226_vm3, %v3143_v11  ;;  %v1534_v22 = vpack.c.bf16 %v1515_v42, %v1514_v16  ;;  %v3168_v31 = vunpack.i.h.bf16 %v3166_v8  ;;  %v2177_v11 = vmul.f32 %v4770_v13, %v4770_v13  ;;  %v3182_v42 = vunpack.i.l.bf16 %v3181_v3 }
 0x1b9   : > { %1359 = vst.msk [vmem:[#allocation2 + $0x6f] sm:$0x1] %vm1352_vm4, %v3292_v60  ;;  %v2180_v9 = vmul.f32 %v4870_v39, %v4870_v39  ;;  %v3197_v30 = vunpack.i.l.bf16 %v3196_v62  ;;  %v2124_v48 = vsel %vm1700_vm8, %v4870_v39, 0.0 }
 0x1ba   : > { %1331 = vst.msk [vmem:[#allocation2 + $0x60] sm:$0xff] %vm1226_vm3, %v3142_v59  ;;  %2439 = vmatmul.msk.bf16.gmra.mxu2 %vm1558_vm7, %v1534_v22  ;;  %v2117_v59 = vadd.f32 %v2116_v63, %v2115_v58  ;;  %v2220_v29 = vsel %vm1700_vm8, %v2177_v11, 0.0 }
 0x1bb   : > { %1472 = vst.msk [vmem:[#allocation2 + $0x5f] sm:$0xfe] %vm1459_vm5, %v3147_v12  ;;  %v2219_v12 = vadd.f32 %v2218_v5, %v2217_v20  ;;  %v2226_v26 = vsel %vm1700_vm8, %v2180_v9, 0.0 }
 0x1bc   : > { %1473 = vst.msk [vmem:[#allocation2 + $0x67] sm:$0xff] %vm1349_vm6, %v3148_v15  ;;  %v4850_v35 = vpop.f32.mrf.mxu3  ;;  %v2119_v10 = vadd.f32 %v2118_v36, %v2117_v59 }
 0x1bd   : > { %1078 = vst.msk [vmem:[#allocation2 + $0xcf] sm:$0xfe] %vm1050_vm13, %v3152_v24  ;;  %v2178_v24 = vmul.f32 %v4801_v33, %v4801_v33  ;;  %v2221_v19 = vadd.f32 %v2220_v29, %v2219_v12 }
 0x1be   : > { %1079 = vst.msk [vmem:[#allocation2 + $0xd7] sm:$0xff] %vm1052_vm14, %v3153_v41  ;;  %v3171_v6 = vpop.permute.xlu0 %3170  ;;  %v3176_v32 = vpop.permute.xlu1 %3175 }
 0x1bf   : > { %1102 = vst.msk [vmem:[#allocation2 + $0xd0] sm:$0x1] %vm1088_vm15, %v3292_v60  ;;  %v3172_v54 = vunpack.i.l.bf16 %v3171_v6  ;;  %v3177_v1 = vunpack.i.l.bf16 %v3176_v32  ;;  %v3178_v7 = vunpack.i.h.bf16 %v3176_v32  ;;  %v2222_v57 = vsel %vm1700_vm8, %v2178_v24, 0.0  ;;  %v4903_v34 = vpop.f32.mrf.mxu1 }
 0x1c0   : > { %1910 = vst.msk [vmem:[%s4585_s15 + $0xa0] sm:$0xff] %vm1700_vm8, %v4727_v44  ;;  %v2181_v52 = vmul.f32 %v4903_v34, %v4903_v34  ;;  %v2126_v59 = vsel %vm1700_vm8, %v4903_v34, 0.0  ;;  %v2130_v24 = vsel %vm1700_vm8, %v4693_v37, 0.0 }
 0x1c1   : > { %1900 = vst.msk [vmem:[%s4585_s15 + $0x50] sm:$0xff] %vm1700_vm8, %v4732_v17  ;;  %v3173_v17 = vunpack.i.h.bf16 %v3171_v6 }
 0x1c2   : > { %1222 = vst.msk [vmem:[#allocation2 + $0xd1] sm:$0xff] %vm1085_vm1, %v3157_v0  ;;  %v2228_v29 = vsel %vm1700_vm8, %v2181_v52, 0.0 }
 0x1c3   : > { %1223 = vst.msk [vmem:[#allocation2 + $0xd9] sm:$0x7f] %vm1196_vm2, %v3158_v38  ;;  %v1502_v46 = vld [vmem:[#allocation2 + $0x60] sm:$0xff]  ;;  %v1503_v47 = vld [vmem:[#allocation2 + $0x68] sm:$0xff]  ;;  %v2179_v38 = vmul.f32 %v4835_v56, %v4835_v56 }
 0x1c4   : > { %1346 = vst.msk [vmem:[#allocation2 + $0xd8] sm:$0xff] %vm1226_vm3, %v3163_v21  ;;  %v1528_v43 = vpack.c.bf16 %v1503_v47, %v1502_v46  ;;  %v2121_v21 = vadd.f32 %v2120_v55, %v2119_v10  ;;  %v4879_v8 = vpop.f32.mrf.mxu3  ;;  %v3198_v47 = vunpack.i.h.bf16 %v3196_v62  ;;  %v2184_v55 = vmul.f32 %v4709_v27, %v4709_v27 }
 0x1c5   : > { %1366 = vst.msk [vmem:[#allocation2 + $0xdf] sm:$0x1] %vm1352_vm4, %v3292_v60 }
 0x1c6   : > { %1345 = vst.msk [vmem:[#allocation2 + $0xd0] sm:$0xff] %vm1226_vm3, %v3162_v45  ;;  %2433 = vmatmul.msk.bf16.gmra.mxu0 %vm1558_vm7, %v1528_v43  ;;  %v3186_v16 = vpop.permute.xlu0 %3185  ;;  %v3191_v61 = vpop.permute.xlu1 %3190  ;;  %v2223_v45 = vadd.f32 %v2222_v57, %v2221_v19  ;;  %v2123_v46 = vadd.f32 %v2122_v28, %v2121_v21  ;;  %v2185_v21 = vmul.f32 %v4727_v44, %v4727_v44 }
 0x1c7   : > { %1486 = vst.msk [vmem:[#allocation2 + $0xcf] sm:$0xfe] %vm1459_vm5, %v3167_v2  ;;  %v3187_v25 = vunpack.i.l.bf16 %v3186_v16  ;;  %v3188_v18 = vunpack.i.h.bf16 %v3186_v16  ;;  %v3192_v0 = vunpack.i.l.bf16 %v3191_v61  ;;  %v3193_v40 = vunpack.i.h.bf16 %v3191_v61  ;;  %v4935_v61 = vpop.f32.mrf.mxu1 }
 0x1c8   : > { %1487 = vst.msk [vmem:[#allocation2 + $0xd7] sm:$0xff] %vm1349_vm6, %v3168_v31  ;;  %v2125_v63 = vadd.f32 %v2124_v48, %v2123_v46  ;;  %v2134_v46 = vsel %vm1700_vm8, %v4727_v44, 0.0 }
 0x1c9   : > { %1911 = vst.msk [vmem:[%s4585_s15 + $0xa8] sm:$0xff] %vm1700_vm8, %v4745_v50 }
 0x1ca   : > { %1901 = vst.msk [vmem:[%s4585_s15 + $0x58] sm:$0xff] %vm1700_vm8, %v4749_v51  ;;  %v3183_v51 = vunpack.i.h.bf16 %v3181_v3 }
 0x1cb   : > { %1066 = vst.msk [vmem:[#allocation2 + $0x6f] sm:$0xfe] %vm1050_vm13, %v3172_v54 }
 0x1cc   : > { %1067 = vst.msk [vmem:[#allocation2 + $0x77] sm:$0xff] %vm1052_vm14, %v3173_v17  ;;  %v4914_v20 = vpop.f32.mrf.mxu3 }
 0x1cd   : > { %1096 = vst.msk [vmem:[#allocation2 + $0x70] sm:$0x1] %vm1088_vm15, %v3292_v60 }
 0x1ce   : > { %1210 = vst.msk [vmem:[#allocation2 + $0x71] sm:$0xff] %vm1085_vm1, %v3177_v1  ;;  %v1620_v14 = vpop.f32.mrf.mxu0  ;;  %v3201_v2 = vpop.permute.xlu0 %3200 }
 0x1cf   : > { %1211 = vst.msk [vmem:[#allocation2 + $0x79] sm:$0x7f] %vm1196_vm2, %v3178_v7  ;;  %v1516_v15 = vld [vmem:[#allocation2 + $0xd0] sm:$0xff]  ;;  %v1517_v22 = vld [vmem:[#allocation2 + $0xd8] sm:$0xff]  ;;  %v1993_v31 = vmul.f32 %v1620_v14, %v1620_v14  ;;  %v3206_v43 = vpop.permute.xlu1 %3205  ;;  %v3203_v49 = vunpack.i.h.bf16 %v3201_v2  ;;  %v1922_v54 = vsel %vm1700_vm8, %v1620_v14, 0.0  ;;  %v3202_v1 = vunpack.i.l.bf16 %v3201_v2 }
 0x1d0   : > { %1912 = vst.msk [vmem:[%s4585_s15 + $0xb0] sm:$0xff] %vm1700_vm8, %v4763_v4  ;;  %v1535_v41 = vpack.c.bf16 %v1517_v22, %v1516_v15  ;;  %v3207_v3 = vunpack.i.l.bf16 %v3206_v43  ;;  %v3208_v15 = vunpack.i.h.bf16 %v3206_v43  ;;  %v2234_v2 = vsel %vm1700_vm8, %v2184_v55, 0.0 }
 0x1d1   : > { %1334 = vst.msk [vmem:[#allocation2 + $0x78] sm:$0xff] %vm1226_vm3, %v3183_v51  ;;  %v2025_v51 = vsel %vm1700_vm8, %v1993_v31, 0.0  ;;  %v2236_v43 = vsel %vm1700_vm8, %v2185_v21, 0.0 }
 0x1d2   : > { %1360 = vst.msk [vmem:[#allocation2 + $0x7f] sm:$0x1] %vm1352_vm4, %v3292_v60  ;;  %2440 = vmatmul.msk.bf16.gmra.mxu2 %vm1558_vm7, %v1535_v41  ;;  %v3211_v41 = vpop.permute.xlu2 %3210 }
 0x1d3   : > { %1333 = vst.msk [vmem:[#allocation2 + $0x70] sm:$0xff] %vm1226_vm3, %v3182_v42  ;;  %v2183_v42 = vmul.f32 %v4693_v37, %v4693_v37  ;;  %v2182_v37 = vmul.f32 %v4935_v61, %v4935_v61  ;;  %v3212_v28 = vunpack.i.l.bf16 %v3211_v41 }
 0x1d4   : > { %1902 = vst.msk [vmem:[%s4585_s15 + $0x60] sm:$0xff] %vm1700_vm8, %v4770_v13  ;;  %v2224_v13 = vsel %vm1700_vm8, %v2179_v38, 0.0 }
 0x1d5   : > { %1474 = vst.msk [vmem:[#allocation2 + $0x6f] sm:$0xfe] %vm1459_vm5, %v3187_v25  ;;  %v2225_v6 = vadd.f32 %v2224_v13, %v2223_v45  ;;  %v2232_v25 = vsel %vm1700_vm8, %v2183_v42, 0.0  ;;  %v3213_v13 = vunpack.i.h.bf16 %v3211_v41 }
 0x1d6   : > { %1475 = vst.msk [vmem:[#allocation2 + $0x77] sm:$0xff] %vm1349_vm6, %v3188_v18  ;;  %v1622_v32 = vpop.f32.mrf.mxu0  ;;  %v2128_v18 = vsel %vm1700_vm8, %v4935_v61, 0.0 }
 0x1d7   : > { %1080 = vst.msk [vmem:[#allocation2 + $0xdf] sm:$0xfe] %vm1050_vm13, %v3192_v0  ;;  %v1923_v58 = vsel %vm1700_vm8, %v1622_v32, 0.0  ;;  %v1994_v17 = vmul.f32 %v1622_v32, %v1622_v32  ;;  %v2227_v16 = vadd.f32 %v2226_v26, %v2225_v6  ;;  %v2132_v0 = vsel %vm1700_vm8, %v4709_v27, 0.0 }
 0x1d8   : > { %1081 = vst.msk [vmem:[#allocation2 + $0xe7] sm:$0xff] %vm1052_vm14, %v3193_v40  ;;  %v1924_v5 = vadd.f32 %v1923_v58, %v1922_v54  ;;  %v4950_v40 = vpop.f32.mrf.mxu3  ;;  %v2230_v27 = vsel %vm1700_vm8, %v2182_v37, 0.0  ;;  %v2136_v6 = vsel %vm1700_vm8, %v4745_v50, 0.0 }
 0x1d9   : > { %1103 = vst.msk [vmem:[#allocation2 + $0xe0] sm:$0x1] %vm1088_vm15, %v3292_v60  ;;  %v2026_v36 = vsel %vm1700_vm8, %v1994_v17, 0.0  ;;  %v2229_v10 = vadd.f32 %v2228_v29, %v2227_v16  ;;  %v2138_v17 = vsel %vm1700_vm8, %v4763_v4, 0.0  ;;  %v2190_v29 = vmul.f32 %v4850_v35, %v4850_v35 }
 0x1da   : > { %1701 = vst.msk [vmem:[%s4891_s17] sm:$0xff] %vm1700_vm8, %v1620_v14  ;;  %v2027_v22 = vadd.f32 %v2026_v36, %v2025_v51  ;;  %v2140_v51 = vsel %vm1700_vm8, %v4788_v23, 0.0  ;;  %v2189_v36 = vmul.f32 %v4822_v53, %v4822_v53 }
 0x1db   : > { %1913 = vst.msk [vmem:[%s4585_s15 + $0xb8] sm:$0xff] %vm1700_vm8, %v4788_v23  ;;  %v2246_v37 = vsel %vm1700_vm8, %v2190_v29, 0.0 }
 0x1dc   : > { %1224 = vst.msk [vmem:[#allocation2 + $0xe1] sm:$0xff] %vm1085_vm1, %v3197_v30  ;;  %v2231_v30 = vadd.f32 %v2230_v27, %v2229_v10  ;;  %v2244_v10 = vsel %vm1700_vm8, %v2189_v36, 0.0  ;;  %v2148_v27 = vsel %vm1700_vm8, %v4914_v20, 0.0 }
 0x1dd   : > { %1225 = vst.msk [vmem:[#allocation2 + $0xe9] sm:$0x7f] %vm1196_vm2, %v3198_v47  ;;  %v1504_v7 = vld [vmem:[#allocation2 + $0x70] sm:$0xff]  ;;  %v1505_v11 = vld [vmem:[#allocation2 + $0x78] sm:$0xff]  ;;  %v2186_v47 = vmul.f32 %v4745_v50, %v4745_v50  ;;  %v2188_v50 = vmul.f32 %v4788_v23, %v4788_v23  ;;  %v2142_v23 = vsel %vm1700_vm8, %v4822_v53, 0.0 }
 0x1de   : > { %1903 = vst.msk [vmem:[%s4585_s15 + $0x68] sm:$0xff] %vm1700_vm8, %v4801_v33  ;;  %v1529_v12 = vpack.c.bf16 %v1505_v11, %v1504_v7  ;;  %v2127_v33 = vadd.f32 %v2126_v59, %v2125_v63  ;;  %v1625_v19 = vpop.f32.mrf.mxu0  ;;  %v2233_v31 = vadd.f32 %v2232_v25, %v2231_v30  ;;  %v2144_v25 = vsel %vm1700_vm8, %v4850_v35, 0.0 }
 0x1df   : > { %1348 = vst.msk [vmem:[#allocation2 + $0xe8] sm:$0xff] %vm1226_vm3, %v3203_v49  ;;  %v1925_v14 = vsel %vm1700_vm8, %v1625_v19, 0.0  ;;  %v1995_v57 = vmul.f32 %v1625_v19, %v1625_v19  ;;  %v2187_v49 = vmul.f32 %v4763_v4, %v4763_v4  ;;  %v2238_v58 = vsel %vm1700_vm8, %v2186_v47, 0.0 }
 0x1e0   : > { %1367 = vst.msk [vmem:[#allocation2 + $0xef] sm:$0x1] %vm1352_vm4, %v3292_v60  ;;  %2434 = vmatmul.msk.bf16.gmra.mxu0 %vm1558_vm7, %v1529_v12  ;;  %v2129_v38 = vadd.f32 %v2128_v18, %v2127_v33  ;;  %v1926_v62 = vadd.f32 %v1925_v14, %v1924_v5  ;;  %v2235_v54 = vadd.f32 %v2234_v2, %v2233_v31  ;;  %v4991_v59 = vpop.f32.mrf.mxu3  ;;  %v2150_v47 = vsel %vm1700_vm8, %v4950_v40, 0.0 }
 0x1e1   : > { %1347 = vst.msk [vmem:[#allocation2 + $0xe0] sm:$0xff] %vm1226_vm3, %v3202_v1  ;;  %v2028_v45 = vsel %vm1700_vm8, %v1995_v57, 0.0  ;;  %v2240_v4 = vsel %vm1700_vm8, %v2187_v49, 0.0  ;;  %v2192_v14 = vmul.f32 %v4914_v20, %v4914_v20 }
 0x1e2   : > { %1488 = vst.msk [vmem:[#allocation2 + $0xdf] sm:$0xfe] %vm1459_vm5, %v3207_v3  ;;  %v2131_v9 = vadd.f32 %v2130_v24, %v2129_v38  ;;  %v2029_v48 = vadd.f32 %v2028_v45, %v2027_v22  ;;  %v2237_v11 = vadd.f32 %v2236_v43, %v2235_v54  ;;  %v2242_v22 = vsel %vm1700_vm8, %v2188_v50, 0.0 }
 0x1e3   : > { %1489 = vst.msk [vmem:[#allocation2 + $0xe7] sm:$0xff] %vm1349_vm6, %v3208_v15  ;;  %v2193_v45 = vmul.f32 %v4950_v40, %v4950_v40  ;;  %v2250_v2 = vsel %vm1700_vm8, %v2192_v14, 0.0 }
 0x1e4   : > { %1702 = vst.msk [vmem:[%s4891_s17 + $0x8] sm:$0xff] %vm1700_vm8, %v1622_v32  ;;  %v2239_v15 = vadd.f32 %v2238_v58, %v2237_v11 }
 0x1e5   : > { %1914 = vst.msk [vmem:[%s4585_s15 + $0xc0] sm:$0xff] %vm1700_vm8, %v4822_v53  ;;  %v2191_v53 = vmul.f32 %v4879_v8, %v4879_v8  ;;  %v2252_v43 = vsel %vm1700_vm8, %v2193_v45, 0.0 }
 0x1e6   : > { %1904 = vst.msk [vmem:[%s4585_s15 + $0x70] sm:$0xff] %vm1700_vm8, %v4835_v56  ;;  %v2133_v56 = vadd.f32 %v2132_v0, %v2131_v9  ;;  %v1627_v1 = vpop.f32.mrf.mxu0  ;;  %v2241_v24 = vadd.f32 %v2240_v4, %v2239_v15 }
 0x1e7   : > { %1703 = vst.msk [vmem:[%s4891_s17 + $0x10] sm:$0xff] %vm1700_vm8, %v1625_v19  ;;  %v1927_v3 = vsel %vm1700_vm8, %v1627_v1, 0.0  ;;  %v1996_v5 = vmul.f32 %v1627_v1, %v1627_v1 }
 0x1e8   : > { %1915 = vst.msk [vmem:[%s4585_s15 + $0xc8] sm:$0xff] %vm1700_vm8, %v4850_v35  ;;  %v2135_v52 = vadd.f32 %v2134_v46, %v2133_v56  ;;  %v1928_v12 = vadd.f32 %v1927_v3, %v1926_v62  ;;  %v2243_v18 = vadd.f32 %v2242_v22, %v2241_v24  ;;  %v2146_v35 = vsel %vm1700_vm8, %v4879_v8, 0.0  ;;  %v1885_v62 = vpop.f32.mrf.mxu3 }
 0x1e9   : > { %1082 = vst.msk [vmem:[#allocation2 + $0xef] sm:$0xfe] %vm1050_vm13, %v3212_v28  ;;  %v2030_v16 = vsel %vm1700_vm8, %v1996_v5, 0.0 }
 0x1ea   : > { %1083 = vst.msk [vmem:[#allocation2 + $0xf7] sm:$0xff] %vm1052_vm14, %v3213_v13  ;;  %v1518_v44 = vld [vmem:[#allocation2 + $0xe0] sm:$0xff]  ;;  %v1519_v32 = vld [vmem:[#allocation2 + $0xe8] sm:$0xff]  ;;  %v4979_v26 = vpop.f32.mrf.mxu2  ;;  %v2137_v7 = vadd.f32 %v2136_v6, %v2135_v52  ;;  %v2031_v33 = vadd.f32 %v2030_v16, %v2029_v48  ;;  %v2245_v21 = vadd.f32 %v2244_v10, %v2243_v18  ;;  %v2194_v48 = vmul.f32 %v4991_v59, %v4991_v59 }
 0x1eb   : > { %1086 = vst.msk [vmem:[#allocation2 + $0xf0] sm:$0xff] %vm1085_vm1, %v3292_v60  ;;  %v1536_v63 = vpack.c.bf16 %v1519_v32, %v1518_v44  ;;  %v2195_v6 = vmul.f32 %v1885_v62, %v1885_v62  ;;  %v2152_v52 = vsel %vm1700_vm8, %v4991_v59, 0.0 }
 0x1ec   : > { %1087 = vst.msk [vmem:[#allocation2 + $0xf8] sm:$0xff] %vm1085_vm1, %v3292_v60  ;;  %v2139_v42 = vadd.f32 %v2138_v17, %v2137_v7  ;;  %v2247_v30 = vadd.f32 %v2246_v37, %v2245_v21  ;;  %v2254_v58 = vsel %vm1700_vm8, %v2194_v48, 0.0 }
 0x1ed   : > { %1104 = vst.msk [vmem:[#allocation2 + $0xf0] sm:$0x1] %vm1088_vm15, %v3292_v60  ;;  %2441 = vmatmul.msk.bf16.gmra.mxu2 %vm1558_vm7, %v1536_v63  ;;  %v2256_v7 = vsel %vm1700_vm8, %v2195_v6, 0.0 }
 0x1ee   : > { %1227 = vst.msk [vmem:[#allocation2 + $0xf0] sm:$0xff] %vm1226_vm3, %v3292_v60  ;;  %v2141_v41 = vadd.f32 %v2140_v51, %v2139_v42  ;;  %v1630_v0 = vpop.f32.mrf.mxu0 }
 0x1ef   : > { %1228 = vst.msk [vmem:[#allocation2 + $0xf8] sm:$0xff] %vm1226_vm3, %v3292_v60  ;;  %v1997_v57 = vmul.f32 %v1630_v0, %v1630_v0 }
 0x1f0   : > { %1350 = vst.msk [vmem:[#allocation2 + $0xf0] sm:$0xff] %vm1349_vm6, %v3292_v60  ;;  %v2143_v19 = vadd.f32 %v2142_v23, %v2141_v41  ;;  %v1887_v3 = vpop.f32.mrf.mxu3 }
 0x1f1   : > { %1351 = vst.msk [vmem:[#allocation2 + $0xf8] sm:$0xff] %vm1349_vm6, %v3292_v60  ;;  %v2032_v13 = vsel %vm1700_vm8, %v1997_v57, 0.0  ;;  %v2156_v51 = vsel %vm1700_vm8, %v1887_v3, 0.0  ;;  %v2196_v36 = vmul.f32 %v1887_v3, %v1887_v3 }
 0x1f2   : > { %1368 = vst.msk [vmem:[#allocation2 + $0xff] sm:$0x1] %vm1352_vm4, %v3292_v60  ;;  %v5022_v55 = vpop.f32.mrf.mxu2  ;;  %v1929_v60 = vsel %vm1700_vm8, %v1630_v0, 0.0  ;;  %v2145_v38 = vadd.f32 %v2144_v25, %v2143_v19 }
 0x1f3   : > { %1905 = vst.msk [vmem:[%s4585_s15 + $0x78] sm:$0xff] %vm1700_vm8, %v4870_v39  ;;  %v2248_v39 = vsel %vm1700_vm8, %v2191_v53, 0.0  ;;  %v1930_v28 = vadd.f32 %v1929_v60, %v1928_v12  ;;  %v2258_v42 = vsel %vm1700_vm8, %v2196_v36, 0.0 }
 0x1f4   : > { %1704 = vst.msk [vmem:[%s4891_s17 + $0x18] sm:$0xff] %vm1700_vm8, %v1627_v1  ;;  %v2147_v9 = vadd.f32 %v2146_v35, %v2145_v38  ;;  %v2249_v31 = vadd.f32 %v2248_v39, %v2247_v30  ;;  %v2154_v1 = vsel %vm1700_vm8, %v1885_v62, 0.0 }
 0x1f5   : > { %1916 = vst.msk [vmem:[%s4585_s15 + $0xd0] sm:$0xff] %vm1700_vm8, %v4879_v8  ;;  %v2033_v8 = vadd.f32 %v2032_v13, %v2031_v33 }
 0x1f6   : > { %1717 = vst.msk [vmem:[%s4891_s17 + $0x80] sm:$0xff] %vm1700_vm8, %v4979_v26  ;;  %v2149_v56 = vadd.f32 %v2148_v27, %v2147_v9  ;;  %v2251_v32 = vadd.f32 %v2250_v2, %v2249_v31  ;;  %v1632_v54 = vpop.f32.mrf.mxu0 }
 0x1f7   : > { %1906 = vst.msk [vmem:[%s4585_s15 + $0x80] sm:$0xff] %vm1700_vm8, %v4903_v34  ;;  %v1520_v46 = vld [vmem:[#allocation2 + $0xf0] sm:$0xff]  ;;  %v1931_v17 = vsel %vm1700_vm8, %v1632_v54, 0.0  ;;  %v1998_v50 = vmul.f32 %v1632_v54, %v1632_v54 }
 0x1f8   : > { %1705 = vst.msk [vmem:[%s4891_s17 + $0x20] sm:$0xff] %vm1700_vm8, %v1630_v0  ;;  %v2151_v44 = vadd.f32 %v2150_v47, %v2149_v56  ;;  %v2253_v63 = vadd.f32 %v2252_v43, %v2251_v32 }
 0x1f9   : > { %1917 = vst.msk [vmem:[%s4585_s15 + $0xd8] sm:$0xff] %vm1700_vm8, %v4914_v20  ;;  %v1521_v34 = vld [vmem:[#allocation2 + $0xf8] sm:$0xff]  ;;  %v2034_v11 = vsel %vm1700_vm8, %v1998_v50, 0.0 }
 0x1fa   : > { %v1537_v49 = vpack.c.bf16 %v1521_v34, %v1520_v46  ;;  %1718 = vst.msk [vmem:[%s4891_s17 + $0x88] sm:$0xff] %vm1700_vm8, %v5022_v55  ;;  %v2153_v5 = vadd.f32 %v2152_v52, %v2151_v44  ;;  %v2255_v4 = vadd.f32 %v2254_v58, %v2253_v63  ;;  %v2035_v12 = vadd.f32 %v2034_v11, %v2033_v8 }
 0x1fb   : > { %1907 = vst.msk [vmem:[%s4585_s15 + $0x88] sm:$0xff] %vm1700_vm8, %v4935_v61  ;;  %v5069_v20 = vpop.f32.mrf.mxu2  ;;  %v1932_v61 = vadd.f32 %v1931_v17, %v1930_v28 }
 0x1fc   : > { %1706 = vst.msk [vmem:[%s4891_s17 + $0x28] sm:$0xff] %vm1700_vm8, %v1632_v54  ;;  %v2155_v16 = vadd.f32 %v2154_v1, %v2153_v5 }
 0x1fd   : > { %2442 = vmatmul.msk.bf16.gmra.mxu2 %vm1558_vm7, %v1537_v49  ;;  %1918 = vst.msk [vmem:[%s4585_s15 + $0xe0] sm:$0xff] %vm1700_vm8, %v4950_v40  ;;  %v2257_v40 = vadd.f32 %v2256_v7, %v2255_v4 }
 0x1fe   : > { %1719 = vst.msk [vmem:[%s4891_s17 + $0x90] sm:$0xff] %vm1700_vm8, %v5069_v20  ;;  %v2157_v15 = vadd.f32 %v2156_v51, %v2155_v16  ;;  %v1635_v23 = vpop.f32.mrf.mxu0 }
 0x1ff   : > { %1919 = vst.msk [vmem:[%s4585_s15 + $0xe8] sm:$0xff] %vm1700_vm8, %v4991_v59  ;;  %v2259_v22 = vadd.f32 %v2258_v42, %v2257_v40  ;;  %v1933_v24 = vsel %vm1700_vm8, %v1635_v23, 0.0  ;;  %v1999_v59 = vmul.f32 %v1635_v23, %v1635_v23 }
 0x200   : > { %1920 = vst.msk [vmem:[%s4585_s15 + $0xf0] sm:$0xff] %vm1700_vm8, %v1885_v62  ;;  %v2158_v33 = vrot.slane %v2157_v15, 4  ;;  %v1934_v41 = vadd.f32 %v1933_v24, %v1932_v61 }
 0x201   : > { %1921 = vst.msk [vmem:[%s4585_s15 + $0xf8] sm:$0xff] %vm1700_vm8, %v1887_v3  ;;  %v2260_v25 = vrot.slane %v2259_v22, 4  ;;  %v2036_v53 = vsel %vm1700_vm8, %v1999_v59, 0.0 }
 0x202   : > { %1707 = vst.msk [vmem:[%s4891_s17 + $0x30] sm:$0xff] %vm1700_vm8, %v1635_v23  ;;  %v2159_v10 = vadd.f32 %v2158_v33, %v2157_v15  ;;  %v2037_v19 = vadd.f32 %v2036_v53, %v2035_v12 }
 0x203   : > { %v5094_v29 = vpop.f32.mrf.mxu2  ;;  %v2261_v18 = vadd.f32 %v2260_v25, %v2259_v22 }
 0x204   : > { %1720 = vst.msk [vmem:[%s4891_s17 + $0x98] sm:$0xff] %vm1700_vm8, %v5094_v29  ;;  %v2160_v37 = vrot.slane %v2159_v10, 2 }
 0x205   : > { %v2262_v35 = vrot.slane %v2261_v18, 2 }
 0x206   : > { %v1637_v0 = vpop.f32.mrf.mxu0  ;;  %v2161_v38 = vadd.f32 %v2160_v37, %v2159_v10 }
 0x207   : > { %1708 = vst.msk [vmem:[%s4891_s17 + $0x38] sm:$0xff] %vm1700_vm8, %v1637_v0  ;;  %v1935_v14 = vsel %vm1700_vm8, %v1637_v0, 0.0  ;;  %v2000_v60 = vmul.f32 %v1637_v0, %v1637_v0  ;;  %v2263_v39 = vadd.f32 %v2262_v35, %v2261_v18 }
 0x208   : > { %v1936_v57 = vadd.f32 %v1935_v14, %v1934_v41  ;;  %v2162_v27 = vrot.slane %v2161_v38, 1 }
 0x209   : > { %v2038_v21 = vsel %vm1700_vm8, %v2000_v60, 0.0  ;;  %v2264_v45 = vrot.slane %v2263_v39, 1  ;;  %v2009_v60 = vmul.f32 %v4979_v26, %v4979_v26 }
 0x20a   : > { %v2039_v28 = vadd.f32 %v2038_v21, %v2037_v19  ;;  %v2163_v9 = vadd.f32 %v2162_v27, %v2161_v38  ;;  %v2010_v27 = vmul.f32 %v5022_v55, %v5022_v55 }
 0x20b   : > { %v2265_v2 = vadd.f32 %v2264_v45, %v2263_v39 }
 0x20c   : > { %2164 = vst.msk [vmem:[%s5124_s25 + $0x2] sm:$0x1] %vm1991_vm0, %v2163_v9 }
 0x20d   : > { %2266 = vst.msk [vmem:[%s5124_s25 + $0x3] sm:$0x1] %vm1991_vm0, %v2265_v2  ;;  %v2011_v2 = vmul.f32 %v5069_v20, %v5069_v20 }
 0x20e   : > { %v5107_v62 = vpop.f32.mrf.mxu2 }
 0x20f   : > { %1721 = vst.msk [vmem:[%s4891_s17 + $0xa0] sm:$0xff] %vm1700_vm8, %v5107_v62 }
 0x214   : > { %v1640_v13 = vpop.f32.mrf.mxu0 }
 0x215   : > { %1709 = vst.msk [vmem:[%s4891_s17 + $0x40] sm:$0xff] %vm1700_vm8, %v1640_v13  ;;  %v1937_v30 = vsel %vm1700_vm8, %v1640_v13, 0.0  ;;  %v2001_v8 = vmul.f32 %v1640_v13, %v1640_v13 }
 0x216   : > { %v1938_v46 = vadd.f32 %v1937_v30, %v1936_v57  ;;  %v5118_v47 = vpop.f32.mrf.mxu2  ;;  %v2056_v30 = vsel %vm1700_vm8, %v2009_v60, 0.0 }
 0x217   : > { %v2040_v48 = vsel %vm1700_vm8, %v2001_v8, 0.0  ;;  %1722 = vst.msk [vmem:[%s4891_s17 + $0xa8] sm:$0xff] %vm1700_vm8, %v5118_v47  ;;  %v1955_v8 = vsel %vm1700_vm8, %v5022_v55, 0.0  ;;  %v1959_v55 = vsel %vm1700_vm8, %v5094_v29, 0.0 }
 0x218   : > { %v2041_v56 = vadd.f32 %v2040_v48, %v2039_v28  ;;  %v1953_v28 = vsel %vm1700_vm8, %v4979_v26, 0.0  ;;  %v1957_v26 = vsel %vm1700_vm8, %v5069_v20, 0.0  ;;  %v1961_v20 = vsel %vm1700_vm8, %v5107_v62, 0.0 }
 0x21c   : > { %v1642_v31 = vpop.f32.mrf.mxu0 }
 0x21d   : > { %1710 = vst.msk [vmem:[%s4891_s17 + $0x48] sm:$0xff] %vm1700_vm8, %v1642_v31  ;;  %v1939_v34 = vsel %vm1700_vm8, %v1642_v31, 0.0  ;;  %v2002_v43 = vmul.f32 %v1642_v31, %v1642_v31  ;;  %v2012_v31 = vmul.f32 %v5094_v29, %v5094_v29 }
 0x21e   : > { %v1940_v6 = vadd.f32 %v1939_v34, %v1938_v46 }
 0x21f   : > { %v2042_v49 = vsel %vm1700_vm8, %v2002_v43, 0.0 }
 0x220   : > { %v2043_v44 = vadd.f32 %v2042_v49, %v2041_v56  ;;  %v2058_v56 = vsel %vm1700_vm8, %v2010_v27, 0.0  ;;  %v2013_v49 = vmul.f32 %v5107_v62, %v5107_v62 }
 0x222   : > { %v2064_v29 = vsel %vm1700_vm8, %v2013_v49, 0.0 }
 0x225   : > { %v5134_v32 = vpop.f32.mrf.mxu2 }
 0x226   : > { %1723 = vst.msk [vmem:[%s4891_s17 + $0xb0] sm:$0xff] %vm1700_vm8, %v5134_v32 }
 0x22a   : > { %v1645_v52 = vpop.f32.mrf.mxu0 }
 0x22b   : > { %1711 = vst.msk [vmem:[%s4891_s17 + $0x50] sm:$0xff] %vm1700_vm8, %v1645_v52  ;;  %v2003_v61 = vmul.f32 %v1645_v52, %v1645_v52  ;;  %v1941_v5 = vsel %vm1700_vm8, %v1645_v52, 0.0 }
 0x22c   : > { %v1942_v36 = vadd.f32 %v1941_v5, %v1940_v6  ;;  %v2060_v6 = vsel %vm1700_vm8, %v2011_v2, 0.0 }
 0x22d   : > { %v5141_v54 = vpop.f32.mrf.mxu2  ;;  %v2044_v11 = vsel %vm1700_vm8, %v2003_v61, 0.0 }
 0x22e   : > { %1724 = vst.msk [vmem:[%s4891_s17 + $0xb8] sm:$0xff] %vm1700_vm8, %v5141_v54  ;;  %v2045_v22 = vadd.f32 %v2044_v11, %v2043_v44  ;;  %v2015_v11 = vmul.f32 %v5134_v32, %v5134_v32 }
 0x232   : > { %v1647_v58 = vpop.f32.mrf.mxu0 }
 0x233   : > { %1712 = vst.msk [vmem:[%s4891_s17 + $0x58] sm:$0xff] %vm1700_vm8, %v1647_v58  ;;  %v2004_v7 = vmul.f32 %v1647_v58, %v1647_v58  ;;  %v1943_v4 = vsel %vm1700_vm8, %v1647_v58, 0.0  ;;  %v2062_v58 = vsel %vm1700_vm8, %v2012_v31, 0.0 }
 0x234   : > { %v1944_v23 = vadd.f32 %v1943_v4, %v1942_v36  ;;  %v1965_v36 = vsel %vm1700_vm8, %v5134_v32, 0.0 }
 0x235   : > { %v2046_v40 = vsel %vm1700_vm8, %v2004_v7, 0.0  ;;  %v1963_v7 = vsel %vm1700_vm8, %v5118_v47, 0.0 }
 0x236   : > { %v2047_v41 = vadd.f32 %v2046_v40, %v2045_v22 }
 0x23d   : > { %v5148_v17 = vpop.f32.mrf.mxu2 }
 0x23e   : > { %1725 = vst.msk [vmem:[%s4891_s17 + $0xc0] sm:$0xff] %vm1700_vm8, %v5148_v17  ;;  %v2017_v22 = vmul.f32 %v5148_v17, %v5148_v17  ;;  %v1969_v32 = vsel %vm1700_vm8, %v5148_v17, 0.0 }
 0x243   : > { %v1650_v50 = vpop.f32.mrf.mxu0 }
 0x244   : > { %1713 = vst.msk [vmem:[%s4891_s17 + $0x60] sm:$0xff] %vm1700_vm8, %v1650_v50  ;;  %v2005_v51 = vmul.f32 %v1650_v50, %v1650_v50  ;;  %v1945_v42 = vsel %vm1700_vm8, %v1650_v50, 0.0  ;;  %v2014_v50 = vmul.f32 %v5118_v47, %v5118_v47  ;;  %v1967_v47 = vsel %vm1700_vm8, %v5141_v54, 0.0 }
 0x245   : > { %v5155_v63 = vpop.f32.mrf.mxu2  ;;  %v1946_v10 = vadd.f32 %v1945_v42, %v1944_v23 }
 0x246   : > { %1726 = vst.msk [vmem:[%s4891_s17 + $0xc8] sm:$0xff] %vm1700_vm8, %v5155_v63  ;;  %v2048_v33 = vsel %vm1700_vm8, %v2005_v51, 0.0  ;;  %v2066_v62 = vsel %vm1700_vm8, %v2014_v50, 0.0 }
 0x247   : > { %v2049_v19 = vadd.f32 %v2048_v33, %v2047_v41 }
 0x24b   : > { %v1652_v1 = vpop.f32.mrf.mxu0 }
 0x24c   : > { %1714 = vst.msk [vmem:[%s4891_s17 + $0x68] sm:$0xff] %vm1700_vm8, %v1652_v1  ;;  %v2006_v15 = vmul.f32 %v1652_v1, %v1652_v1  ;;  %v1947_v24 = vsel %vm1700_vm8, %v1652_v1, 0.0 }
 0x24d   : > { %v1948_v18 = vadd.f32 %v1947_v24, %v1946_v10 }
 0x24e   : > { %v2050_v25 = vsel %vm1700_vm8, %v2006_v15, 0.0  ;;  %v2068_v15 = vsel %vm1700_vm8, %v2015_v11, 0.0 }
 0x24f   : > { %v2051_v35 = vadd.f32 %v2050_v25, %v2049_v19 }
 0x255   : > { %v5162_v3 = vpop.f32.mrf.mxu2 }
 0x256   : > { %1727 = vst.msk [vmem:[%s4891_s17 + $0xd0] sm:$0xff] %vm1700_vm8, %v5162_v3  ;;  %v2019_v19 = vmul.f32 %v5162_v3, %v5162_v3 }
 0x25d   : > { %v1655_v12 = vpop.f32.mrf.mxu0  ;;  %v5170_v16 = vpop.f32.mrf.mxu2 }
 0x25e   : > { %1715 = vst.msk [vmem:[%s4891_s17 + $0x70] sm:$0xff] %vm1700_vm8, %v1655_v12  ;;  %v2007_v59 = vmul.f32 %v1655_v12, %v1655_v12  ;;  %v1949_v53 = vsel %vm1700_vm8, %v1655_v12, 0.0  ;;  %v2016_v12 = vmul.f32 %v5141_v54, %v5141_v54  ;;  %v2072_v54 = vsel %vm1700_vm8, %v2017_v22, 0.0 }
 0x25f   : > { %1728 = vst.msk [vmem:[%s4891_s17 + $0xd8] sm:$0xff] %vm1700_vm8, %v5170_v16  ;;  %v1950_v0 = vadd.f32 %v1949_v53, %v1948_v18  ;;  %v1971_v53 = vsel %vm1700_vm8, %v5155_v63, 0.0 }
 0x260   : > { %v2052_v37 = vsel %vm1700_vm8, %v2007_v59, 0.0  ;;  %v2070_v24 = vsel %vm1700_vm8, %v2016_v12, 0.0  ;;  %v2018_v59 = vmul.f32 %v5155_v63, %v5155_v63  ;;  %v1975_v63 = vsel %vm1700_vm8, %v5170_v16, 0.0 }
 0x261   : > { %v2053_v21 = vadd.f32 %v2052_v37, %v2051_v35  ;;  %v1973_v35 = vsel %vm1700_vm8, %v5162_v3, 0.0 }
 0x262   : > { %v2074_v17 = vsel %vm1700_vm8, %v2018_v59, 0.0 }
 0x265   : > { %v1657_v14 = vpop.f32.mrf.mxu0 }
 0x266   : > { %1716 = vst.msk [vmem:[%s4891_s17 + $0x78] sm:$0xff] %vm1700_vm8, %v1657_v14  ;;  %v1951_v57 = vsel %vm1700_vm8, %v1657_v14, 0.0  ;;  %v2008_v38 = vmul.f32 %v1657_v14, %v1657_v14 }
 0x267   : > { %v1952_v39 = vadd.f32 %v1951_v57, %v1950_v0  ;;  %v2020_v0 = vmul.f32 %v5170_v16, %v5170_v16  ;;  %v2076_v57 = vsel %vm1700_vm8, %v2019_v19, 0.0 }
 0x268   : > { %v2054_v45 = vsel %vm1700_vm8, %v2008_v38, 0.0 }
 0x269   : > { %v1954_v13 = vadd.f32 %v1953_v28, %v1952_v39  ;;  %v2055_v9 = vadd.f32 %v2054_v45, %v2053_v21  ;;  %v2078_v28 = vsel %vm1700_vm8, %v2020_v0, 0.0 }
 0x26b   : > { %v1956_v46 = vadd.f32 %v1955_v8, %v1954_v13  ;;  %v2057_v48 = vadd.f32 %v2056_v30, %v2055_v9 }
 0x26d   : > { %v1958_v34 = vadd.f32 %v1957_v26, %v1956_v46  ;;  %v2059_v43 = vadd.f32 %v2058_v56, %v2057_v48 }
 0x26f   : > { %v1960_v44 = vadd.f32 %v1959_v55, %v1958_v34  ;;  %v2061_v52 = vadd.f32 %v2060_v6, %v2059_v43 }
 0x270   : > { %v1690_v1 = vpop.f32.mrf.mxu2 }
 0x271   : > { %v1962_v61 = vadd.f32 %v1961_v20, %v1960_v44  ;;  %v2063_v5 = vadd.f32 %v2062_v58, %v2061_v52  ;;  %1729 = vst.msk [vmem:[%s4891_s17 + $0xe0] sm:$0xff] %vm1700_vm8, %v1690_v1  ;;  %v2021_v38 = vmul.f32 %v1690_v1, %v1690_v1  ;;  %v1977_v27 = vsel %vm1700_vm8, %v1690_v1, 0.0 }
 0x273   : > { %v1964_v4 = vadd.f32 %v1963_v7, %v1962_v61  ;;  %v2065_v51 = vadd.f32 %v2064_v29, %v2063_v5  ;;  %v2080_v30 = vsel %vm1700_vm8, %v2021_v38, 0.0 }
 0x275   : > { %v2067_v40 = vadd.f32 %v2066_v62, %v2065_v51  ;;  %v1966_v42 = vadd.f32 %v1965_v36, %v1964_v4 }
 0x277   : > { %v1968_v23 = vadd.f32 %v1967_v47, %v1966_v42  ;;  %v2069_v33 = vadd.f32 %v2068_v15, %v2067_v40 }
 0x278   : > { %v1692_v41 = vpop.f32.mrf.mxu2 }
 0x279   : > { %v1970_v10 = vadd.f32 %v1969_v32, %v1968_v23  ;;  %v2071_v25 = vadd.f32 %v2070_v24, %v2069_v33  ;;  %1730 = vst.msk [vmem:[%s4891_s17 + $0xe8] sm:$0xff] %vm1700_vm8, %v1692_v41  ;;  %v2022_v45 = vmul.f32 %v1692_v41, %v1692_v41  ;;  %v1979_v8 = vsel %vm1700_vm8, %v1692_v41, 0.0 }
 0x27b   : > { %v1972_v18 = vadd.f32 %v1971_v53, %v1970_v10  ;;  %v2073_v37 = vadd.f32 %v2072_v54, %v2071_v25  ;;  %v2082_v48 = vsel %vm1700_vm8, %v2022_v45, 0.0 }
 0x27d   : > { %v1974_v14 = vadd.f32 %v1973_v35, %v1972_v18  ;;  %v2075_v60 = vadd.f32 %v2074_v17, %v2073_v37 }
 0x27f   : > { %v1976_v21 = vadd.f32 %v1975_v63, %v1974_v14  ;;  %v2077_v39 = vadd.f32 %v2076_v57, %v2075_v60 }
 0x280   : > { %v1695_v13 = vpop.f32.mrf.mxu2 }
 0x281   : > { %v1978_v3 = vadd.f32 %v1977_v27, %v1976_v21  ;;  %v2079_v9 = vadd.f32 %v2078_v28, %v2077_v39  ;;  %1731 = vst.msk [vmem:[%s4891_s17 + $0xf0] sm:$0xff] %vm1700_vm8, %v1695_v13  ;;  %v2023_v46 = vmul.f32 %v1695_v13, %v1695_v13  ;;  %v1981_v26 = vsel %vm1700_vm8, %v1695_v13, 0.0 }
 0x283   : > { %v2081_v2 = vadd.f32 %v2080_v30, %v2079_v9  ;;  %v1980_v16 = vadd.f32 %v1979_v8, %v1978_v3  ;;  %v2084_v34 = vsel %vm1700_vm8, %v2023_v46, 0.0 }
 0x285   : > { %v2083_v56 = vadd.f32 %v2082_v48, %v2081_v2  ;;  %v1982_v31 = vadd.f32 %v1981_v26, %v1980_v16 }
 0x287   : > { %v2085_v43 = vadd.f32 %v2084_v34, %v2083_v56 }
 0x288   : > { %v1697_v6 = vpop.f32.mrf.mxu2 }
 0x289   : > { %1732 = vst.msk [vmem:[%s4891_s17 + $0xf8] sm:$0xff] %vm1700_vm8, %v1697_v6  ;;  %v1983_v55 = vsel %vm1700_vm8, %v1697_v6, 0.0  ;;  %v2024_v49 = vmul.f32 %v1697_v6, %v1697_v6 }
 0x28a   : > { %v1984_v44 = vadd.f32 %v1983_v55, %v1982_v31 }
 0x28b   : > { %v2086_v52 = vsel %vm1700_vm8, %v2024_v49, 0.0 }
 0x28c   : > { %v1985_v58 = vrot.slane %v1984_v44, 4  ;;  %v2087_v20 = vadd.f32 %v2086_v52, %v2085_v43 }
 0x28e   : > { %v1986_v50 = vadd.f32 %v1985_v58, %v1984_v44  ;;  %v2088_v1 = vrot.slane %v2087_v20, 4 }
 0x290   : > { %v1987_v61 = vrot.slane %v1986_v50, 2  ;;  %v2089_v5 = vadd.f32 %v2088_v1, %v2087_v20 }
 0x292   : > { %v1988_v29 = vadd.f32 %v1987_v61, %v1986_v50  ;;  %v2090_v7 = vrot.slane %v2089_v5, 2 }
 0x294   : > { %v1989_v11 = vrot.slane %v1988_v29, 1  ;;  %v2091_v4 = vadd.f32 %v2090_v7, %v2089_v5 }
 0x296   : > { %v1990_v51 = vadd.f32 %v1989_v11, %v1988_v29  ;;  %v2092_v62 = vrot.slane %v2091_v4, 1 }
 0x298   : > { %v2093_v36 = vadd.f32 %v2092_v62, %v2091_v4  ;;  %1992 = vst.msk [vmem:[%s5124_s25] sm:$0x1] %vm1991_vm0, %v1990_v51 }
 0x29a   : > { %2094 = vst.msk [vmem:[%s5124_s25 + $0x1] sm:$0x1] %vm1991_vm0, %v2093_v36 }
 0x29b   : > { %3252 = shalt.err (!%p3249_p3)
}
 0x29c   : > { %2551 = dma.vmem_to_hbm [thread:$0]  (%p3366_p5), %s2297_s10, 64, %s2299_s11, %s2278_s22  }
 0x29d PF: > { %p2557_p4 = scmp.ge.s32.totalorder %s3287_s21, 2  ;;  %s2326_s30 = sand.u32 1, %s3275_s18  }
 0x29e   : > { %s2327_s23 = scalar_lea.sflag [#allocation4], %s2326_s30 }
 0x29f   : > { %p2554_p7 = pnand %p2557_p4, %p3370_p6 }
 0x2a1   : > { %p2555_p8 = pneg %p2554_p7 }
 0x2a3   : > { %3270 = dma.done.wait (%p2555_p8), %s2327_s23, 64  }
 0x2a4   : > { %3272 = vsyncadd (%p2555_p8), %s2327_s23, 4294967232  ;;  %p16_p9 = scmp.ge.s32.totalorder %s3353_s24, 4   ;;  %s5310_s18 = smov %s3279_s19 }
 0x2a5   : > { %s5311_s19 = smov %s3283_s20  ;;  %s5312_s20 = smov %s3364_s27 }
 0x2a6   : > { %s5313_s21 = smov %s3353_s24  ;;  %18 = sbr.rel (!%p16_p9) target bundleno = 3 (0x3), region = 93 }
 0x2ab   :  { %2333 = vsyncpa [#allocation4], 1 }
 0x2ac   :  { %2335 = vsyncpa [#allocation4 + $0x1], 1 }

</bundles_post_ra>
